<compile_context>
chip_gen: v5e
topology: v5e:2x2
jax: 0.10.0
libtpu: 0.0.40
codegen_flags: <defaults>
</compile_context>

<pallas_src>
import functools

import jax
import jax.numpy as jnp
from jax.experimental import pallas as pl
from jax.experimental.pallas import tpu as pltpu

EPS = 1e-5  # nn.BatchNorm2d default eps


def _compiler_params():
    return pltpu.CompilerParams(
        dimension_semantics=("parallel",),       # batch axis -> both TCs on v7x
        vmem_limit_bytes=32 * 1024 * 1024,
    )


# ---------------------------------------------------------------------------
# Kernels
# ---------------------------------------------------------------------------
def _pool_conv_kernel(xw_ref, w_ref, y_ref, stats_ref, *, Wo, LR):
    """Fused 2x2 maxpool + 3x3 conv (as 9 shifted matmuls) + masked BN partial stats."""
    Wp = Wo + 2
    # 4 pooling taps are plain leading-dim indexes of one block; the result is already
    # the zero-padded, width-flattened layout ((Ho+2)*(Wo+2), Cin) the conv needs.
    pf = jnp.maximum(jnp.maximum(xw_ref[0, 0], xw_ref[1, 0]),
                     jnp.maximum(xw_ref[2, 0], xw_ref[3, 0]))        # (PR, Cin) f32

    cout = w_ref.shape[2]
    acc = jnp.zeros((LR, cout), jnp.float32)
    for t in range(9):                                               # im2col stays in VMEM
        dy, dx = t // 3, t % 3
        off = dy * Wp + dx
        lhs = pf[off:off + LR, :].astype(jnp.bfloat16)
        acc = acc + jnp.dot(lhs, w_ref[t], preferred_element_type=jnp.float32)

    # rows with (o mod Wp) >= Wo are phantom (centered on pad columns): exclude from stats
    cols = jax.lax.broadcasted_iota(jnp.int32, acc.shape, 0) % Wp
    mask = (cols < Wo).astype(jnp.float32)
    ym = acc * mask
    stats_ref[0, 0:1, :] = jnp.sum(ym, axis=0, keepdims=True)        # sum
    stats_ref[0, 1:2, :] = jnp.sum(ym * acc, axis=0, keepdims=True)  # sum of squares
    y_ref[0] = acc


def _bnrelu_conv_kernel(y1_ref, sc_ref, sh_ref, w_ref, y2_ref, stats_ref, pad_ref,
                        *, Wo, LR):
    """Fused BN(scale/shift)+ReLU of conv1 output + 3x3 conv2 + masked BN2 partial stats."""
    Wp = Wo + 2
    chid = y1_ref.shape[2]
    cout = w_ref.shape[2]

    cols1 = jax.lax.broadcasted_iota(jnp.int32, (LR, chid), 0) % Wp
    mask1 = (cols1 < Wo).astype(jnp.float32)
    # normalize + ReLU on the fly; phantom rows zeroed so the single contiguous store
    # below also writes conv2's zero padding correctly.
    a1 = jnp.maximum(y1_ref[0] * sc_ref[...] + sh_ref[...], 0.0) * mask1

    pad_ref[...] = jnp.zeros_like(pad_ref)                           # zero borders
    pad_ref[pl.ds(Wo + 3, LR), :] = a1                               # interior (+masked pads)
    pv = pad_ref[...]                                                # (PR, chid) f32

    acc = jnp.zeros((LR, cout), jnp.float32)
    for t in range(9):
        dy, dx = t // 3, t % 3
        off = dy * Wp + dx
        lhs = pv[off:off + LR, :].astype(jnp.bfloat16)
        acc = acc + jnp.dot(lhs, w_ref[t], preferred_element_type=jnp.float32)

    cols2 = jax.lax.broadcasted_iota(jnp.int32, acc.shape, 0) % Wp
    mask2 = (cols2 < Wo).astype(jnp.float32)
    ym = acc * mask2
    stats_ref[0, 0:1, :] = jnp.sum(ym, axis=0, keepdims=True)
    stats_ref[0, 1:2, :] = jnp.sum(ym * acc, axis=0, keepdims=True)
    y2_ref[0] = acc


def _bnrelu_unpad_kernel(y2_ref, sc_ref, sh_ref, o_ref, *, Ho, Wo):
    """Final BN(scale/shift)+ReLU and removal of the phantom pad columns."""
    Wp = Wo + 2
    a2 = jnp.maximum(y2_ref[0] * sc_ref[...] + sh_ref[...], 0.0)     # (LR, Cout)
    for ho in range(Ho):
        o_ref[0, ho] = a2[ho * Wp:ho * Wp + Wo, :]


# ---------------------------------------------------------------------------
# Glue (layout plumbing + tiny per-channel math)
# ---------------------------------------------------------------------------
def _prep_weight(w_oihw):
    # PyTorch (Cout, Cin, kh, kw) -> taps (kh*kw, Cin, Cout), bf16 for the MXU.
    co, ci, kh, kw = w_oihw.shape
    return jnp.transpose(w_oihw, (2, 3, 1, 0)).reshape(kh * kw, ci, co).astype(jnp.bfloat16)


def _bn_affine(stats, gamma, beta, count):
    # combine per-image masked partial sums -> training-mode BN scale/shift per channel
    s = jnp.sum(stats[:, 0, :], axis=0)
    ss = jnp.sum(stats[:, 1, :], axis=0)
    mean = s / count
    var = ss / count - mean * mean                 # biased variance (BN training mode)
    scale = gamma * jax.lax.rsqrt(var + EPS)
    shift = beta - mean * scale
    return scale.reshape(1, -1).astype(jnp.float32), shift.reshape(1, -1).astype(jnp.float32)


def downscale_forward(x_nchw, params):
    """Downscale.forward: maxpool(2) -> conv-bn-relu -> conv-bn-relu (training-mode BN)."""
    N, Cin, H, W = x_nchw.shape
    assert H % 2 == 0 and W % 2 == 0
    Ho, Wo = H // 2, W // 2
    Wp = Wo + 2
    LR = Ho * Wp - 2                 # rows of the width-padded flat conv layout
    PR = (Ho + 2) * Wp               # rows of the zero-padded flat image
    count = float(N * Ho * Wo)

    w1 = _prep_weight(params["w1"]); CH = w1.shape[2]
    w2 = _prep_weight(params["w2"]); CO = w2.shape[2]
    # NOTE: conv biases b1/b2 are intentionally not applied (cancelled exactly by the
    # batch-mean subtraction of training-mode BatchNorm).

    # Single layout copy (replaces the NCHW->NHWC transpose we need anyway):
    # fold conv zero-padding (pad=2 == pool window, so pad windows pool to exactly 0)
    # and the 2x2 window split into it.  xw[t, n, a*Wp+b, c] = x_pad[n, c, 2a+t//2, 2b+t%2].
    xp = jnp.pad(x_nchw, ((0, 0), (0, 0), (2, 2), (2, 2)))
    xw = jnp.transpose(xp.reshape(N, Cin, Ho + 2, 2, Wo + 2, 2), (3, 5, 0, 2, 4, 1))
    xw = xw.reshape(4, N, PR, Cin)

    cp = _compiler_params()

    # --- stage 1: fused maxpool + conv1 (+ BN1 partial stats) ------------------------
    y1, st1 = pl.pallas_call(
        functools.partial(_pool_conv_kernel, Wo=Wo, LR=LR),
        grid=(N,),
        in_specs=[
            pl.BlockSpec((4, 1, PR, Cin), lambda n: (0, n, 0, 0)),
            pl.BlockSpec((9, Cin, CH), lambda n: (0, 0, 0)),
        ],
        out_specs=(
            pl.BlockSpec((1, LR, CH), lambda n: (n, 0, 0)),
            pl.BlockSpec((1, 2, CH), lambda n: (n, 0, 0)),
        ),
        out_shape=(
            jax.ShapeDtypeStruct((N, LR, CH), jnp.float32),
            jax.ShapeDtypeStruct((N, 2, CH), jnp.float32),
        ),
        compiler_params=cp,
        cost_estimate=pl.CostEstimate(
            flops=2 * N * LR * 9 * Cin * CH,
            transcendentals=0,
            bytes_accessed=xw.size * 4 + w1.size * 2 + N * LR * CH * 4 + N * 2 * CH * 4,
        ),
    )(xw, w1)

    sc1, sh1 = _bn_affine(st1, params["g1"], params["bt1"], count)

    # --- stage 2: fused BN1+ReLU + conv2 (+ BN2 partial stats) -----------------------
    y2, st2 = pl.pallas_call(
        functools.partial(_bnrelu_conv_kernel, Wo=Wo, LR=LR),
        grid=(N,),
        in_specs=[
            pl.BlockSpec((1, LR, CH), lambda n: (n, 0, 0)),
            pl.BlockSpec((1, CH), lambda n: (0, 0)),
            pl.BlockSpec((1, CH), lambda n: (0, 0)),
            pl.BlockSpec((9, CH, CO), lambda n: (0, 0, 0)),
        ],
        out_specs=(
            pl.BlockSpec((1, LR, CO), lambda n: (n, 0, 0)),
            pl.BlockSpec((1, 2, CO), lambda n: (n, 0, 0)),
        ),
        out_shape=(
            jax.ShapeDtypeStruct((N, LR, CO), jnp.float32),
            jax.ShapeDtypeStruct((N, 2, CO), jnp.float32),
        ),
        scratch_shapes=[pltpu.VMEM((PR, CH), jnp.float32)],
        compiler_params=cp,
        cost_estimate=pl.CostEstimate(
            flops=2 * N * LR * 9 * CH * CO,
            transcendentals=0,
            bytes_accessed=y1.size * 4 + w2.size * 2 + N * LR * CO * 4 + N * 2 * CO * 4,
        ),
    )(y1, sc1, sh1, w2)

    sc2, sh2 = _bn_affine(st2, params["g2"], params["bt2"], count)

    # --- stage 3: BN2 + ReLU + drop phantom pad columns ------------------------------
    out_nhwc = pl.pallas_call(
        functools.partial(_bnrelu_unpad_kernel, Ho=Ho, Wo=Wo),
        grid=(N,),
        in_specs=[
            pl.BlockSpec((1, LR, CO), lambda n: (n, 0, 0)),
            pl.BlockSpec((1, CO), lambda n: (0, 0)),
            pl.BlockSpec((1, CO), lambda n: (0, 0)),
        ],
        out_specs=pl.BlockSpec((1, Ho, Wo, CO), lambda n: (n, 0, 0, 0)),
        out_shape=jax.ShapeDtypeStruct((N, Ho, Wo, CO), jnp.float32),
        compiler_params=cp,
    )(y2, sc2, sh2)

    return jnp.transpose(out_nhwc, (0, 3, 1, 2))     # NHWC -> NCHW


# ---------------------------------------------------------------------------
# Pure-JAX reference (same precision choices: bf16 matmul inputs, f32 accumulate)
# ---------------------------------------------------------------------------
def _ref_conv_bn_relu(x_nhwc, w_oihw, gamma, beta):
    N, H, W, _ = x_nhwc.shape
    co = w_oihw.shape[0]
    xb = x_nhwc.astype(jnp.bfloat16).astype(jnp.float32)
    wb = w_oihw.astype(jnp.bfloat16).astype(jnp.float32)
    xp = jnp.pad(xb, ((0, 0), (1, 1), (1, 1), (0, 0)))
    y = jnp.zeros((N, H, W, co), jnp.float32)
    for dy in range(3):
        for dx in range(3):
            patch = xp[:, dy:dy + H, dx:dx + W, :]
            y = y + jnp.einsum("nhwc,oc->nhwo", patch, wb[:, :, dy, dx],
                               precision=jax.lax.Precision.HIGHEST)
    mean = jnp.mean(y, axis=(0, 1, 2))
    var = jnp.mean(y * y, axis=(0, 1, 2)) - mean * mean
    yn = (y - mean) * (gamma * jax.lax.rsqrt(var + EPS)) + beta
    return jnp.maximum(yn, 0.0)


def reference_forward(x_nchw, params):
    N, C, H, W = x_nchw.shape
    pooled = jnp.max(x_nchw.reshape(N, C, H // 2, 2, W // 2, 2), axis=(3, 5))
    h = jnp.transpose(pooled, (0, 2, 3, 1))                   # NHWC
    h = _ref_conv_bn_relu(h, params["w1"], params["g1"], params["bt1"])
    h = _ref_conv_bn_relu(h, params["w2"], params["g2"], params["bt2"])
    return jnp.transpose(h, (0, 3, 1, 2))


# ---------------------------------------------------------------------------
# Deterministic parameter init (shapes follow ConvBlock(in_ch, out_ch))
# ---------------------------------------------------------------------------
def init_params(key, in_channels, out_channels):
    hidden = out_channels  # ConvBlock default hidden_dim
    k1, k2, k3, k4 = jax.random.split(key, 4)
    s1 = 1.0 / (in_channels * 9) ** 0.5
    s2 = 1.0 / (hidden * 9) ** 0.5
    return dict(
        w1=jax.random.uniform(k1, (hidden, in_channels, 3, 3), jnp.float32, -s1, s1),
        b1=jax.random.uniform(k2, (hidden,), jnp.float32, -s1, s1),   # no-op under training BN
        g1=jnp.ones((hidden,), jnp.float32),
        bt1=jnp.zeros((hidden,), jnp.float32),
        w2=jax.random.uniform(k3, (out_channels, hidden, 3, 3), jnp.float32, -s2, s2),
        b2=jax.random.uniform(k4, (out_channels,), jnp.float32, -s2, s2),
        g2=jnp.ones((out_channels,), jnp.float32),
        bt2=jnp.zeros((out_channels,), jnp.float32),
    )


if __name__ == "__main__":
    key = jax.random.PRNGKey(0)
    k_x, k_p = jax.random.split(key)

    in_channels, out_channels = 4, 8
    x = jax.random.normal(k_x, (2, in_channels, 16, 16), dtype=jnp.float32)  # NCHW
    params = init_params(k_p, in_channels, out_channels)

    y = jax.jit(downscale_forward)(x, params)
    y = jax.block_until_ready(y)

    assert y.shape == (2, out_channels, 8, 8), y.shape
    assert bool(jnp.all(jnp.isfinite(y)))
    assert bool(jnp.all(y >= 0.0))  # ReLU output

    y_ref = reference_forward(x, params)
    assert bool(jnp.allclose(y, y_ref, atol=5e-2, rtol=5e-2)), float(
        jnp.max(jnp.abs(y - y_ref)))

    print("KERNEL_OK")
</pallas_src>

<mosaic_0001>
module attributes {stable_mosaic.version = 11 : i64} {
  func.func @_pool_conv_kernel(%arg0: i32, %arg1: memref<4x1x100x4xf32, #tpu.memory_space<vmem>>, %arg2: memref<9x4x8xbf16, #tpu.memory_space<vmem>>, %arg3: memref<1x78x8xf32, #tpu.memory_space<vmem>>, %arg4: memref<1x2x8xf32, #tpu.memory_space<vmem>>) attributes {dimension_semantics = [#tpu.dimension_semantics<parallel>], iteration_bounds = array<i64: 2>, scalar_prefetch = 0 : i64, scratch_operands = 0 : i64, tpu.core_type = #tpu.core_type<tc>, window_params = [{transform_indices = @transform_0, window_bounds = array<i64: 4, 1, 100, 4>}, {pipeline_mode = #tpu.pipeline_mode<synchronous>, transform_indices = @transform_1, window_bounds = array<i64: 9, 4, 8>}, {transform_indices = @transform_2, window_bounds = array<i64: 1, 78, 8>}, {transform_indices = @transform_3, window_bounds = array<i64: 1, 2, 8>}]} {
    %c0 = arith.constant 0 : index
    %c0_0 = arith.constant 0 : index
    %c0_1 = arith.constant 0 : index
    %c0_2 = arith.constant 0 : index
    %0 = vector.load %arg1[%c0, %c0_0, %c0_1, %c0_2] : memref<4x1x100x4xf32, #tpu.memory_space<vmem>>, vector<1x1x100x4xf32>
    %1 = vector.shape_cast %0 : vector<1x1x100x4xf32> to vector<100x4xf32>
    %c1 = arith.constant 1 : index
    %c0_3 = arith.constant 0 : index
    %c0_4 = arith.constant 0 : index
    %c0_5 = arith.constant 0 : index
    %2 = vector.load %arg1[%c1, %c0_3, %c0_4, %c0_5] : memref<4x1x100x4xf32, #tpu.memory_space<vmem>>, vector<1x1x100x4xf32>
    %3 = vector.shape_cast %2 : vector<1x1x100x4xf32> to vector<100x4xf32>
    %4 = arith.maximumf %1, %3 : vector<100x4xf32>
    %c2 = arith.constant 2 : index
    %c0_6 = arith.constant 0 : index
    %c0_7 = arith.constant 0 : index
    %c0_8 = arith.constant 0 : index
    %5 = vector.load %arg1[%c2, %c0_6, %c0_7, %c0_8] : memref<4x1x100x4xf32, #tpu.memory_space<vmem>>, vector<1x1x100x4xf32>
    %6 = vector.shape_cast %5 : vector<1x1x100x4xf32> to vector<100x4xf32>
    %c3 = arith.constant 3 : index
    %c0_9 = arith.constant 0 : index
    %c0_10 = arith.constant 0 : index
    %c0_11 = arith.constant 0 : index
    %7 = vector.load %arg1[%c3, %c0_9, %c0_10, %c0_11] : memref<4x1x100x4xf32, #tpu.memory_space<vmem>>, vector<1x1x100x4xf32>
    %8 = vector.shape_cast %7 : vector<1x1x100x4xf32> to vector<100x4xf32>
    %9 = arith.maximumf %6, %8 : vector<100x4xf32>
    %10 = arith.maximumf %4, %9 : vector<100x4xf32>
    %cst = arith.constant 0.000000e+00 : f32
    %11 = vector.broadcast %cst : f32 to vector<78x8xf32>
    %12 = vector.extract_strided_slice %10 {offsets = [0, 0], sizes = [78, 4], strides = [1, 1]} : vector<100x4xf32> to vector<78x4xf32>
    %13 = arith.truncf %12 : vector<78x4xf32> to vector<78x4xbf16>
    %c0_12 = arith.constant 0 : index
    %c0_13 = arith.constant 0 : index
    %c0_14 = arith.constant 0 : index
    %14 = vector.load %arg2[%c0_12, %c0_13, %c0_14] : memref<9x4x8xbf16, #tpu.memory_space<vmem>>, vector<1x4x8xbf16>
    %15 = vector.shape_cast %14 : vector<1x4x8xbf16> to vector<4x8xbf16>
    %cst_15 = arith.constant dense<0.000000e+00> : vector<78x8xf32>
    %16 = tpu.matmul %13, %15, %cst_15 {dimension_numbers = #tpu.dot_dimension_numbers<[1], [0], [0], [1], [0, 0, 1, 1], [], []>} : vector<78x4xbf16>, vector<4x8xbf16>, vector<78x8xf32> -> vector<78x8xf32>
    %17 = arith.addf %11, %16 : vector<78x8xf32>
    %18 = vector.extract_strided_slice %10 {offsets = [1, 0], sizes = [78, 4], strides = [1, 1]} : vector<100x4xf32> to vector<78x4xf32>
    %19 = arith.truncf %18 : vector<78x4xf32> to vector<78x4xbf16>
    %c1_16 = arith.constant 1 : index
    %c0_17 = arith.constant 0 : index
    %c0_18 = arith.constant 0 : index
    %20 = vector.load %arg2[%c1_16, %c0_17, %c0_18] : memref<9x4x8xbf16, #tpu.memory_space<vmem>>, vector<1x4x8xbf16>
    %21 = vector.shape_cast %20 : vector<1x4x8xbf16> to vector<4x8xbf16>
    %cst_19 = arith.constant dense<0.000000e+00> : vector<78x8xf32>
    %22 = tpu.matmul %19, %21, %cst_19 {dimension_numbers = #tpu.dot_dimension_numbers<[1], [0], [0], [1], [0, 0, 1, 1], [], []>} : vector<78x4xbf16>, vector<4x8xbf16>, vector<78x8xf32> -> vector<78x8xf32>
    %23 = arith.addf %17, %22 : vector<78x8xf32>
    %24 = vector.extract_strided_slice %10 {offsets = [2, 0], sizes = [78, 4], strides = [1, 1]} : vector<100x4xf32> to vector<78x4xf32>
    %25 = arith.truncf %24 : vector<78x4xf32> to vector<78x4xbf16>
    %c2_20 = arith.constant 2 : index
    %c0_21 = arith.constant 0 : index
    %c0_22 = arith.constant 0 : index
    %26 = vector.load %arg2[%c2_20, %c0_21, %c0_22] : memref<9x4x8xbf16, #tpu.memory_space<vmem>>, vector<1x4x8xbf16>
    %27 = vector.shape_cast %26 : vector<1x4x8xbf16> to vector<4x8xbf16>
    %cst_23 = arith.constant dense<0.000000e+00> : vector<78x8xf32>
    %28 = tpu.matmul %25, %27, %cst_23 {dimension_numbers = #tpu.dot_dimension_numbers<[1], [0], [0], [1], [0, 0, 1, 1], [], []>} : vector<78x4xbf16>, vector<4x8xbf16>, vector<78x8xf32> -> vector<78x8xf32>
    %29 = arith.addf %23, %28 : vector<78x8xf32>
    %30 = vector.extract_strided_slice %10 {offsets = [10, 0], sizes = [78, 4], strides = [1, 1]} : vector<100x4xf32> to vector<78x4xf32>
    %31 = arith.truncf %30 : vector<78x4xf32> to vector<78x4xbf16>
    %c3_24 = arith.constant 3 : index
    %c0_25 = arith.constant 0 : index
    %c0_26 = arith.constant 0 : index
    %32 = vector.load %arg2[%c3_24, %c0_25, %c0_26] : memref<9x4x8xbf16, #tpu.memory_space<vmem>>, vector<1x4x8xbf16>
    %33 = vector.shape_cast %32 : vector<1x4x8xbf16> to vector<4x8xbf16>
    %cst_27 = arith.constant dense<0.000000e+00> : vector<78x8xf32>
    %34 = tpu.matmul %31, %33, %cst_27 {dimension_numbers = #tpu.dot_dimension_numbers<[1], [0], [0], [1], [0, 0, 1, 1], [], []>} : vector<78x4xbf16>, vector<4x8xbf16>, vector<78x8xf32> -> vector<78x8xf32>
    %35 = arith.addf %29, %34 : vector<78x8xf32>
    %36 = vector.extract_strided_slice %10 {offsets = [11, 0], sizes = [78, 4], strides = [1, 1]} : vector<100x4xf32> to vector<78x4xf32>
    %37 = arith.truncf %36 : vector<78x4xf32> to vector<78x4xbf16>
    %c4 = arith.constant 4 : index
    %c0_28 = arith.constant 0 : index
    %c0_29 = arith.constant 0 : index
    %38 = vector.load %arg2[%c4, %c0_28, %c0_29] : memref<9x4x8xbf16, #tpu.memory_space<vmem>>, vector<1x4x8xbf16>
    %39 = vector.shape_cast %38 : vector<1x4x8xbf16> to vector<4x8xbf16>
    %cst_30 = arith.constant dense<0.000000e+00> : vector<78x8xf32>
    %40 = tpu.matmul %37, %39, %cst_30 {dimension_numbers = #tpu.dot_dimension_numbers<[1], [0], [0], [1], [0, 0, 1, 1], [], []>} : vector<78x4xbf16>, vector<4x8xbf16>, vector<78x8xf32> -> vector<78x8xf32>
    %41 = arith.addf %35, %40 : vector<78x8xf32>
    %42 = vector.extract_strided_slice %10 {offsets = [12, 0], sizes = [78, 4], strides = [1, 1]} : vector<100x4xf32> to vector<78x4xf32>
    %43 = arith.truncf %42 : vector<78x4xf32> to vector<78x4xbf16>
    %c5 = arith.constant 5 : index
    %c0_31 = arith.constant 0 : index
    %c0_32 = arith.constant 0 : index
    %44 = vector.load %arg2[%c5, %c0_31, %c0_32] : memref<9x4x8xbf16, #tpu.memory_space<vmem>>, vector<1x4x8xbf16>
    %45 = vector.shape_cast %44 : vector<1x4x8xbf16> to vector<4x8xbf16>
    %cst_33 = arith.constant dense<0.000000e+00> : vector<78x8xf32>
    %46 = tpu.matmul %43, %45, %cst_33 {dimension_numbers = #tpu.dot_dimension_numbers<[1], [0], [0], [1], [0, 0, 1, 1], [], []>} : vector<78x4xbf16>, vector<4x8xbf16>, vector<78x8xf32> -> vector<78x8xf32>
    %47 = arith.addf %41, %46 : vector<78x8xf32>
    %48 = vector.extract_strided_slice %10 {offsets = [20, 0], sizes = [78, 4], strides = [1, 1]} : vector<100x4xf32> to vector<78x4xf32>
    %49 = arith.truncf %48 : vector<78x4xf32> to vector<78x4xbf16>
    %c6 = arith.constant 6 : index
    %c0_34 = arith.constant 0 : index
    %c0_35 = arith.constant 0 : index
    %50 = vector.load %arg2[%c6, %c0_34, %c0_35] : memref<9x4x8xbf16, #tpu.memory_space<vmem>>, vector<1x4x8xbf16>
    %51 = vector.shape_cast %50 : vector<1x4x8xbf16> to vector<4x8xbf16>
    %cst_36 = arith.constant dense<0.000000e+00> : vector<78x8xf32>
    %52 = tpu.matmul %49, %51, %cst_36 {dimension_numbers = #tpu.dot_dimension_numbers<[1], [0], [0], [1], [0, 0, 1, 1], [], []>} : vector<78x4xbf16>, vector<4x8xbf16>, vector<78x8xf32> -> vector<78x8xf32>
    %53 = arith.addf %47, %52 : vector<78x8xf32>
    %54 = vector.extract_strided_slice %10 {offsets = [21, 0], sizes = [78, 4], strides = [1, 1]} : vector<100x4xf32> to vector<78x4xf32>
    %55 = arith.truncf %54 : vector<78x4xf32> to vector<78x4xbf16>
    %c7 = arith.constant 7 : index
    %c0_37 = arith.constant 0 : index
    %c0_38 = arith.constant 0 : index
    %56 = vector.load %arg2[%c7, %c0_37, %c0_38] : memref<9x4x8xbf16, #tpu.memory_space<vmem>>, vector<1x4x8xbf16>
    %57 = vector.shape_cast %56 : vector<1x4x8xbf16> to vector<4x8xbf16>
    %cst_39 = arith.constant dense<0.000000e+00> : vector<78x8xf32>
    %58 = tpu.matmul %55, %57, %cst_39 {dimension_numbers = #tpu.dot_dimension_numbers<[1], [0], [0], [1], [0, 0, 1, 1], [], []>} : vector<78x4xbf16>, vector<4x8xbf16>, vector<78x8xf32> -> vector<78x8xf32>
    %59 = arith.addf %53, %58 : vector<78x8xf32>
    %60 = vector.extract_strided_slice %10 {offsets = [22, 0], sizes = [78, 4], strides = [1, 1]} : vector<100x4xf32> to vector<78x4xf32>
    %61 = arith.truncf %60 : vector<78x4xf32> to vector<78x4xbf16>
    %c8 = arith.constant 8 : index
    %c0_40 = arith.constant 0 : index
    %c0_41 = arith.constant 0 : index
    %62 = vector.load %arg2[%c8, %c0_40, %c0_41] : memref<9x4x8xbf16, #tpu.memory_space<vmem>>, vector<1x4x8xbf16>
    %63 = vector.shape_cast %62 : vector<1x4x8xbf16> to vector<4x8xbf16>
    %cst_42 = arith.constant dense<0.000000e+00> : vector<78x8xf32>
    %64 = tpu.matmul %61, %63, %cst_42 {dimension_numbers = #tpu.dot_dimension_numbers<[1], [0], [0], [1], [0, 0, 1, 1], [], []>} : vector<78x4xbf16>, vector<4x8xbf16>, vector<78x8xf32> -> vector<78x8xf32>
    %65 = arith.addf %59, %64 : vector<78x8xf32>
    %66 = tpu.iota {dimensions = array<i32: 0>} : vector<78x8xi32>
    %c10_i32 = arith.constant 10 : i32
    %c0_i32 = arith.constant 0 : i32
    %67 = arith.cmpi eq, %c10_i32, %c0_i32 : i32
    %c1_i32 = arith.constant 1 : i32
    %68 = arith.select %67, %c1_i32, %c10_i32 : i32
    %69 = vector.broadcast %68 : i32 to vector<78x8xi32>
    %70 = arith.remsi %66, %69 : vector<78x8xi32>
    %c0_i32_43 = arith.constant 0 : i32
    %71 = vector.broadcast %c0_i32_43 : i32 to vector<78x8xi32>
    %72 = arith.cmpi ne, %70, %71 : vector<78x8xi32>
    %c0_i32_44 = arith.constant 0 : i32
    %73 = vector.broadcast %c0_i32_44 : i32 to vector<78x8xi32>
    %74 = arith.cmpi slt, %70, %73 : vector<78x8xi32>
    %c0_i32_45 = arith.constant 0 : i32
    %75 = arith.cmpi slt, %68, %c0_i32_45 : i32
    %76 = vector.broadcast %75 : i1 to vector<78x8xi1>
    %77 = vector.broadcast %76 : vector<78x8xi1> to vector<78x8xi1>
    %78 = arith.xori %74, %77 : vector<78x8xi1>
    %79 = arith.andi %78, %72 : vector<78x8xi1>
    %80 = vector.broadcast %68 : i32 to vector<78x8xi32>
    %81 = arith.addi %70, %80 : vector<78x8xi32>
    %82 = arith.select %79, %81, %70 : vector<78x8xi1>, vector<78x8xi32>
    %c8_i32 = arith.constant 8 : i32
    %83 = vector.broadcast %c8_i32 : i32 to vector<78x8xi32>
    %84 = arith.cmpi slt, %82, %83 : vector<78x8xi32>
    %85 = arith.extui %84 : vector<78x8xi1> to vector<78x8xi32>
    %86 = arith.sitofp %85 : vector<78x8xi32> to vector<78x8xf32>
    %87 = arith.mulf %65, %86 : vector<78x8xf32>
    %cst_46 = arith.constant dense<0.000000e+00> : vector<8xf32>
    %88 = vector.multi_reduction <add>, %87, %cst_46 [0] : vector<78x8xf32> to vector<8xf32>
    %89 = vector.shape_cast %88 : vector<8xf32> to vector<1x8xf32>
    %c0_47 = arith.constant 0 : index
    %c0_48 = arith.constant 0 : index
    %c0_49 = arith.constant 0 : index
    %90 = vector.load %arg4[%c0_47, %c0_48, %c0_49] : memref<1x2x8xf32, #tpu.memory_space<vmem>>, vector<1x1x8xf32>
    %91 = vector.shape_cast %90 : vector<1x1x8xf32> to vector<1x8xf32>
    %92 = vector.shape_cast %89 : vector<1x8xf32> to vector<1x1x8xf32>
    tpu.vector_store %arg4[%c0_47, %c0_48, %c0_49], %92 {strides = array<i32>} : memref<1x2x8xf32, #tpu.memory_space<vmem>>, vector<1x1x8xf32>,
    %93 = arith.mulf %87, %65 : vector<78x8xf32>
    %cst_50 = arith.constant dense<0.000000e+00> : vector<8xf32>
    %94 = vector.multi_reduction <add>, %93, %cst_50 [0] : vector<78x8xf32> to vector<8xf32>
    %95 = vector.shape_cast %94 : vector<8xf32> to vector<1x8xf32>
    %c0_51 = arith.constant 0 : index
    %c1_52 = arith.constant 1 : index
    %c0_53 = arith.constant 0 : index
    %96 = vector.load %arg4[%c0_51, %c1_52, %c0_53] : memref<1x2x8xf32, #tpu.memory_space<vmem>>, vector<1x1x8xf32>
    %97 = vector.shape_cast %96 : vector<1x1x8xf32> to vector<1x8xf32>
    %98 = vector.shape_cast %95 : vector<1x8xf32> to vector<1x1x8xf32>
    tpu.vector_store %arg4[%c0_51, %c1_52, %c0_53], %98 {strides = array<i32>} : memref<1x2x8xf32, #tpu.memory_space<vmem>>, vector<1x1x8xf32>,
    %c0_54 = arith.constant 0 : index
    %c0_55 = arith.constant 0 : index
    %c0_56 = arith.constant 0 : index
    %99 = vector.load %arg3[%c0_54, %c0_55, %c0_56] : memref<1x78x8xf32, #tpu.memory_space<vmem>>, vector<1x78x8xf32>
    %100 = vector.shape_cast %99 : vector<1x78x8xf32> to vector<78x8xf32>
    %101 = vector.shape_cast %65 : vector<78x8xf32> to vector<1x78x8xf32>
    tpu.vector_store %arg3[%c0_54, %c0_55, %c0_56], %101 {strides = array<i32>} : memref<1x78x8xf32, #tpu.memory_space<vmem>>, vector<1x78x8xf32>,
    return
  }
  func.func @transform_0(%arg0: i32) -> (i32, i32, i32, i32) {
    %c0_i32 = arith.constant 0 : i32
    %c0_i32_0 = arith.constant 0 : i32
    %c0_i32_1 = arith.constant 0 : i32
    %c0_i32_2 = arith.constant 0 : i32
    return %c0_i32, %arg0, %c0_i32_0, %c0_i32_1 : i32, i32, i32, i32
  }
  func.func @transform_1(%arg0: i32) -> (i32, i32, i32) {
    %c0_i32 = arith.constant 0 : i32
    %c0_i32_0 = arith.constant 0 : i32
    %c0_i32_1 = arith.constant 0 : i32
    %c0_i32_2 = arith.constant 0 : i32
    return %c0_i32, %c0_i32_0, %c0_i32_1 : i32, i32, i32
  }
  func.func @transform_2(%arg0: i32) -> (i32, i32, i32) {
    %c0_i32 = arith.constant 0 : i32
    %c0_i32_0 = arith.constant 0 : i32
    %c0_i32_1 = arith.constant 0 : i32
    return %arg0, %c0_i32, %c0_i32_0 : i32, i32, i32
  }
  func.func @transform_3(%arg0: i32) -> (i32, i32, i32) {
    %c0_i32 = arith.constant 0 : i32
    %c0_i32_0 = arith.constant 0 : i32
    %c0_i32_1 = arith.constant 0 : i32
    return %arg0, %c0_i32, %c0_i32_0 : i32, i32, i32
  }
}

module attributes {stable_mosaic.version = 11 : i64} {
  func.func @_bnrelu_unpad_kernel(%arg0: i32, %arg1: memref<1x78x8xf32, #tpu.memory_space<vmem>>, %arg2: memref<1x8xf32, #tpu.memory_space<vmem>>, %arg3: memref<1x8xf32, #tpu.memory_space<vmem>>, %arg4: memref<1x8x8x8xf32, #tpu.memory_space<vmem>>) attributes {dimension_semantics = [#tpu.dimension_semantics<parallel>], iteration_bounds = array<i64: 2>, scalar_prefetch = 0 : i64, scratch_operands = 0 : i64, tpu.core_type = #tpu.core_type<tc>, window_params = [{transform_indices = @transform_0, window_bounds = array<i64: 1, 78, 8>}, {pipeline_mode = #tpu.pipeline_mode<synchronous>, transform_indices = @transform_1, window_bounds = array<i64: 1, 8>}, {pipeline_mode = #tpu.pipeline_mode<synchronous>, transform_indices = @transform_2, window_bounds = array<i64: 1, 8>}, {transform_indices = @transform_3, window_bounds = array<i64: 1, 8, 8, 8>}]} {
    %c0 = arith.constant 0 : index
    %c0_0 = arith.constant 0 : index
    %c0_1 = arith.constant 0 : index
    %0 = vector.load %arg1[%c0, %c0_0, %c0_1] : memref<1x78x8xf32, #tpu.memory_space<vmem>>, vector<1x78x8xf32>
    %1 = vector.shape_cast %0 : vector<1x78x8xf32> to vector<78x8xf32>
    %c0_2 = arith.constant 0 : index
    %c0_3 = arith.constant 0 : index
    %2 = vector.load %arg2[%c0_2, %c0_3] : memref<1x8xf32, #tpu.memory_space<vmem>>, vector<1x8xf32>
    %3 = vector.broadcast %2 : vector<1x8xf32> to vector<78x8xf32>
    %4 = arith.mulf %1, %3 : vector<78x8xf32>
    %c0_4 = arith.constant 0 : index
    %c0_5 = arith.constant 0 : index
    %5 = vector.load %arg3[%c0_4, %c0_5] : memref<1x8xf32, #tpu.memory_space<vmem>>, vector<1x8xf32>
    %6 = vector.broadcast %5 : vector<1x8xf32> to vector<78x8xf32>
    %7 = arith.addf %4, %6 : vector<78x8xf32>
    %cst = arith.constant 0.000000e+00 : f32
    %8 = vector.broadcast %cst : f32 to vector<78x8xf32>
    %9 = arith.maximumf %7, %8 : vector<78x8xf32>
    %10 = vector.extract_strided_slice %9 {offsets = [0, 0], sizes = [8, 8], strides = [1, 1]} : vector<78x8xf32> to vector<8x8xf32>
    %c0_6 = arith.constant 0 : index
    %c0_7 = arith.constant 0 : index
    %c0_8 = arith.constant 0 : index
    %c0_9 = arith.constant 0 : index
    %11 = vector.load %arg4[%c0_6, %c0_7, %c0_8, %c0_9] : memref<1x8x8x8xf32, #tpu.memory_space<vmem>>, vector<1x1x8x8xf32>
    %12 = vector.shape_cast %11 : vector<1x1x8x8xf32> to vector<8x8xf32>
    %13 = vector.shape_cast %10 : vector<8x8xf32> to vector<1x1x8x8xf32>
    tpu.vector_store %arg4[%c0_6, %c0_7, %c0_8, %c0_9], %13 {strides = array<i32>} : memref<1x8x8x8xf32, #tpu.memory_space<vmem>>, vector<1x1x8x8xf32>,
    %14 = vector.extract_strided_slice %9 {offsets = [10, 0], sizes = [8, 8], strides = [1, 1]} : vector<78x8xf32> to vector<8x8xf32>
    %c0_10 = arith.constant 0 : index
    %c1 = arith.constant 1 : index
    %c0_11 = arith.constant 0 : index
    %c0_12 = arith.constant 0 : index
    %15 = vector.load %arg4[%c0_10, %c1, %c0_11, %c0_12] : memref<1x8x8x8xf32, #tpu.memory_space<vmem>>, vector<1x1x8x8xf32>
    %16 = vector.shape_cast %15 : vector<1x1x8x8xf32> to vector<8x8xf32>
    %17 = vector.shape_cast %14 : vector<8x8xf32> to vector<1x1x8x8xf32>
    tpu.vector_store %arg4[%c0_10, %c1, %c0_11, %c0_12], %17 {strides = array<i32>} : memref<1x8x8x8xf32, #tpu.memory_space<vmem>>, vector<1x1x8x8xf32>,
    %18 = vector.extract_strided_slice %9 {offsets = [20, 0], sizes = [8, 8], strides = [1, 1]} : vector<78x8xf32> to vector<8x8xf32>
    %c0_13 = arith.constant 0 : index
    %c2 = arith.constant 2 : index
    %c0_14 = arith.constant 0 : index
    %c0_15 = arith.constant 0 : index
    %19 = vector.load %arg4[%c0_13, %c2, %c0_14, %c0_15] : memref<1x8x8x8xf32, #tpu.memory_space<vmem>>, vector<1x1x8x8xf32>
    %20 = vector.shape_cast %19 : vector<1x1x8x8xf32> to vector<8x8xf32>
    %21 = vector.shape_cast %18 : vector<8x8xf32> to vector<1x1x8x8xf32>
    tpu.vector_store %arg4[%c0_13, %c2, %c0_14, %c0_15], %21 {strides = array<i32>} : memref<1x8x8x8xf32, #tpu.memory_space<vmem>>, vector<1x1x8x8xf32>,
    %22 = vector.extract_strided_slice %9 {offsets = [30, 0], sizes = [8, 8], strides = [1, 1]} : vector<78x8xf32> to vector<8x8xf32>
    %c0_16 = arith.constant 0 : index
    %c3 = arith.constant 3 : index
    %c0_17 = arith.constant 0 : index
    %c0_18 = arith.constant 0 : index
    %23 = vector.load %arg4[%c0_16, %c3, %c0_17, %c0_18] : memref<1x8x8x8xf32, #tpu.memory_space<vmem>>, vector<1x1x8x8xf32>
    %24 = vector.shape_cast %23 : vector<1x1x8x8xf32> to vector<8x8xf32>
    %25 = vector.shape_cast %22 : vector<8x8xf32> to vector<1x1x8x8xf32>
    tpu.vector_store %arg4[%c0_16, %c3, %c0_17, %c0_18], %25 {strides = array<i32>} : memref<1x8x8x8xf32, #tpu.memory_space<vmem>>, vector<1x1x8x8xf32>,
    %26 = vector.extract_strided_slice %9 {offsets = [40, 0], sizes = [8, 8], strides = [1, 1]} : vector<78x8xf32> to vector<8x8xf32>
    %c0_19 = arith.constant 0 : index
    %c4 = arith.constant 4 : index
    %c0_20 = arith.constant 0 : index
    %c0_21 = arith.constant 0 : index
    %27 = vector.load %arg4[%c0_19, %c4, %c0_20, %c0_21] : memref<1x8x8x8xf32, #tpu.memory_space<vmem>>, vector<1x1x8x8xf32>
    %28 = vector.shape_cast %27 : vector<1x1x8x8xf32> to vector<8x8xf32>
    %29 = vector.shape_cast %26 : vector<8x8xf32> to vector<1x1x8x8xf32>
    tpu.vector_store %arg4[%c0_19, %c4, %c0_20, %c0_21], %29 {strides = array<i32>} : memref<1x8x8x8xf32, #tpu.memory_space<vmem>>, vector<1x1x8x8xf32>,
    %30 = vector.extract_strided_slice %9 {offsets = [50, 0], sizes = [8, 8], strides = [1, 1]} : vector<78x8xf32> to vector<8x8xf32>
    %c0_22 = arith.constant 0 : index
    %c5 = arith.constant 5 : index
    %c0_23 = arith.constant 0 : index
    %c0_24 = arith.constant 0 : index
    %31 = vector.load %arg4[%c0_22, %c5, %c0_23, %c0_24] : memref<1x8x8x8xf32, #tpu.memory_space<vmem>>, vector<1x1x8x8xf32>
    %32 = vector.shape_cast %31 : vector<1x1x8x8xf32> to vector<8x8xf32>
    %33 = vector.shape_cast %30 : vector<8x8xf32> to vector<1x1x8x8xf32>
    tpu.vector_store %arg4[%c0_22, %c5, %c0_23, %c0_24], %33 {strides = array<i32>} : memref<1x8x8x8xf32, #tpu.memory_space<vmem>>, vector<1x1x8x8xf32>,
    %34 = vector.extract_strided_slice %9 {offsets = [60, 0], sizes = [8, 8], strides = [1, 1]} : vector<78x8xf32> to vector<8x8xf32>
    %c0_25 = arith.constant 0 : index
    %c6 = arith.constant 6 : index
    %c0_26 = arith.constant 0 : index
    %c0_27 = arith.constant 0 : index
    %35 = vector.load %arg4[%c0_25, %c6, %c0_26, %c0_27] : memref<1x8x8x8xf32, #tpu.memory_space<vmem>>, vector<1x1x8x8xf32>
    %36 = vector.shape_cast %35 : vector<1x1x8x8xf32> to vector<8x8xf32>
    %37 = vector.shape_cast %34 : vector<8x8xf32> to vector<1x1x8x8xf32>
    tpu.vector_store %arg4[%c0_25, %c6, %c0_26, %c0_27], %37 {strides = array<i32>} : memref<1x8x8x8xf32, #tpu.memory_space<vmem>>, vector<1x1x8x8xf32>,
    %38 = vector.extract_strided_slice %9 {offsets = [70, 0], sizes = [8, 8], strides = [1, 1]} : vector<78x8xf32> to vector<8x8xf32>
    %c0_28 = arith.constant 0 : index
    %c7 = arith.constant 7 : index
    %c0_29 = arith.constant 0 : index
    %c0_30 = arith.constant 0 : index
    %39 = vector.load %arg4[%c0_28, %c7, %c0_29, %c0_30] : memref<1x8x8x8xf32, #tpu.memory_space<vmem>>, vector<1x1x8x8xf32>
    %40 = vector.shape_cast %39 : vector<1x1x8x8xf32> to vector<8x8xf32>
    %41 = vector.shape_cast %38 : vector<8x8xf32> to vector<1x1x8x8xf32>
    tpu.vector_store %arg4[%c0_28, %c7, %c0_29, %c0_30], %41 {strides = array<i32>} : memref<1x8x8x8xf32, #tpu.memory_space<vmem>>, vector<1x1x8x8xf32>,
    return
  }
  func.func @transform_0(%arg0: i32) -> (i32, i32, i32) {
    %c0_i32 = arith.constant 0 : i32
    %c0_i32_0 = arith.constant 0 : i32
    %c0_i32_1 = arith.constant 0 : i32
    return %arg0, %c0_i32, %c0_i32_0 : i32, i32, i32
  }
  func.func @transform_1(%arg0: i32) -> (i32, i32) {
    %c0_i32 = arith.constant 0 : i32
    %c0_i32_0 = arith.constant 0 : i32
    %c0_i32_1 = arith.constant 0 : i32
    return %c0_i32, %c0_i32_0 : i32, i32
  }
  func.func @transform_2(%arg0: i32) -> (i32, i32) {
    %c0_i32 = arith.constant 0 : i32
    %c0_i32_0 = arith.constant 0 : i32
    %c0_i32_1 = arith.constant 0 : i32
    return %c0_i32, %c0_i32_0 : i32, i32
  }
  func.func @transform_3(%arg0: i32) -> (i32, i32, i32, i32) {
    %c0_i32 = arith.constant 0 : i32
    %c0_i32_0 = arith.constant 0 : i32
    %c0_i32_1 = arith.constant 0 : i32
    %c0_i32_2 = arith.constant 0 : i32
    return %arg0, %c0_i32, %c0_i32_0, %c0_i32_1 : i32, i32, i32, i32
  }
}

module attributes {stable_mosaic.version = 11 : i64} {
  func.func @_bnrelu_conv_kernel(%arg0: i32, %arg1: memref<1x78x8xf32, #tpu.memory_space<vmem>>, %arg2: memref<1x8xf32, #tpu.memory_space<vmem>>, %arg3: memref<1x8xf32, #tpu.memory_space<vmem>>, %arg4: memref<9x8x8xbf16, #tpu.memory_space<vmem>>, %arg5: memref<1x78x8xf32, #tpu.memory_space<vmem>>, %arg6: memref<1x2x8xf32, #tpu.memory_space<vmem>>, %arg7: memref<100x8xf32, #tpu.memory_space<vmem>>) attributes {dimension_semantics = [#tpu.dimension_semantics<parallel>], iteration_bounds = array<i64: 2>, scalar_prefetch = 0 : i64, scratch_operands = 1 : i64, tpu.core_type = #tpu.core_type<tc>, window_params = [{transform_indices = @transform_0, window_bounds = array<i64: 1, 78, 8>}, {pipeline_mode = #tpu.pipeline_mode<synchronous>, transform_indices = @transform_1, window_bounds = array<i64: 1, 8>}, {pipeline_mode = #tpu.pipeline_mode<synchronous>, transform_indices = @transform_2, window_bounds = array<i64: 1, 8>}, {pipeline_mode = #tpu.pipeline_mode<synchronous>, transform_indices = @transform_3, window_bounds = array<i64: 9, 8, 8>}, {transform_indices = @transform_4, window_bounds = array<i64: 1, 78, 8>}, {transform_indices = @transform_5, window_bounds = array<i64: 1, 2, 8>}]} {
    %0 = tpu.iota {dimensions = array<i32: 0>} : vector<78x8xi32>
    %c10_i32 = arith.constant 10 : i32
    %c0_i32 = arith.constant 0 : i32
    %1 = arith.cmpi eq, %c10_i32, %c0_i32 : i32
    %c1_i32 = arith.constant 1 : i32
    %2 = arith.select %1, %c1_i32, %c10_i32 : i32
    %3 = vector.broadcast %2 : i32 to vector<78x8xi32>
    %4 = arith.remsi %0, %3 : vector<78x8xi32>
    %c0_i32_0 = arith.constant 0 : i32
    %5 = vector.broadcast %c0_i32_0 : i32 to vector<78x8xi32>
    %6 = arith.cmpi ne, %4, %5 : vector<78x8xi32>
    %c0_i32_1 = arith.constant 0 : i32
    %7 = vector.broadcast %c0_i32_1 : i32 to vector<78x8xi32>
    %8 = arith.cmpi slt, %4, %7 : vector<78x8xi32>
    %c0_i32_2 = arith.constant 0 : i32
    %9 = arith.cmpi slt, %2, %c0_i32_2 : i32
    %10 = vector.broadcast %9 : i1 to vector<78x8xi1>
    %11 = vector.broadcast %10 : vector<78x8xi1> to vector<78x8xi1>
    %12 = arith.xori %8, %11 : vector<78x8xi1>
    %13 = arith.andi %12, %6 : vector<78x8xi1>
    %14 = vector.broadcast %2 : i32 to vector<78x8xi32>
    %15 = arith.addi %4, %14 : vector<78x8xi32>
    %16 = arith.select %13, %15, %4 : vector<78x8xi1>, vector<78x8xi32>
    %c8_i32 = arith.constant 8 : i32
    %17 = vector.broadcast %c8_i32 : i32 to vector<78x8xi32>
    %18 = arith.cmpi slt, %16, %17 : vector<78x8xi32>
    %19 = arith.extui %18 : vector<78x8xi1> to vector<78x8xi32>
    %20 = arith.sitofp %19 : vector<78x8xi32> to vector<78x8xf32>
    %c0 = arith.constant 0 : index
    %c0_3 = arith.constant 0 : index
    %c0_4 = arith.constant 0 : index
    %21 = vector.load %arg1[%c0, %c0_3, %c0_4] : memref<1x78x8xf32, #tpu.memory_space<vmem>>, vector<1x78x8xf32>
    %22 = vector.shape_cast %21 : vector<1x78x8xf32> to vector<78x8xf32>
    %c0_5 = arith.constant 0 : index
    %c0_6 = arith.constant 0 : index
    %23 = vector.load %arg2[%c0_5, %c0_6] : memref<1x8xf32, #tpu.memory_space<vmem>>, vector<1x8xf32>
    %24 = vector.broadcast %23 : vector<1x8xf32> to vector<78x8xf32>
    %25 = arith.mulf %22, %24 : vector<78x8xf32>
    %c0_7 = arith.constant 0 : index
    %c0_8 = arith.constant 0 : index
    %26 = vector.load %arg3[%c0_7, %c0_8] : memref<1x8xf32, #tpu.memory_space<vmem>>, vector<1x8xf32>
    %27 = vector.broadcast %26 : vector<1x8xf32> to vector<78x8xf32>
    %28 = arith.addf %25, %27 : vector<78x8xf32>
    %cst = arith.constant 0.000000e+00 : f32
    %29 = vector.broadcast %cst : f32 to vector<78x8xf32>
    %30 = arith.maximumf %28, %29 : vector<78x8xf32>
    %31 = arith.mulf %30, %20 : vector<78x8xf32>
    %cst_9 = arith.constant 0.000000e+00 : f32
    %32 = vector.broadcast %cst_9 : f32 to vector<100x8xf32>
    %c0_10 = arith.constant 0 : index
    %c0_11 = arith.constant 0 : index
    %33 = vector.load %arg7[%c0_10, %c0_11] : memref<100x8xf32, #tpu.memory_space<vmem>>, vector<100x8xf32>
    tpu.vector_store %arg7[%c0_10, %c0_11], %32 {strides = array<i32>} : memref<100x8xf32, #tpu.memory_space<vmem>>, vector<100x8xf32>,
    %c11 = arith.constant 11 : index
    %c0_12 = arith.constant 0 : index
    %34 = vector.load %arg7[%c11, %c0_12] : memref<100x8xf32, #tpu.memory_space<vmem>>, vector<78x8xf32>
    tpu.vector_store %arg7[%c11, %c0_12], %31 {strides = array<i32>} : memref<100x8xf32, #tpu.memory_space<vmem>>, vector<78x8xf32>,
    %c0_13 = arith.constant 0 : index
    %c0_14 = arith.constant 0 : index
    %35 = vector.load %arg7[%c0_13, %c0_14] : memref<100x8xf32, #tpu.memory_space<vmem>>, vector<100x8xf32>
    %cst_15 = arith.constant 0.000000e+00 : f32
    %36 = vector.broadcast %cst_15 : f32 to vector<78x8xf32>
    %37 = vector.extract_strided_slice %35 {offsets = [0, 0], sizes = [78, 8], strides = [1, 1]} : vector<100x8xf32> to vector<78x8xf32>
    %38 = arith.truncf %37 : vector<78x8xf32> to vector<78x8xbf16>
    %c0_16 = arith.constant 0 : index
    %c0_17 = arith.constant 0 : index
    %c0_18 = arith.constant 0 : index
    %39 = vector.load %arg4[%c0_16, %c0_17, %c0_18] : memref<9x8x8xbf16, #tpu.memory_space<vmem>>, vector<1x8x8xbf16>
    %40 = vector.shape_cast %39 : vector<1x8x8xbf16> to vector<8x8xbf16>
    %cst_19 = arith.constant dense<0.000000e+00> : vector<78x8xf32>
    %41 = tpu.matmul %38, %40, %cst_19 {dimension_numbers = #tpu.dot_dimension_numbers<[1], [0], [0], [1], [0, 0, 1, 1], [], []>} : vector<78x8xbf16>, vector<8x8xbf16>, vector<78x8xf32> -> vector<78x8xf32>
    %42 = arith.addf %36, %41 : vector<78x8xf32>
    %43 = vector.extract_strided_slice %35 {offsets = [1, 0], sizes = [78, 8], strides = [1, 1]} : vector<100x8xf32> to vector<78x8xf32>
    %44 = arith.truncf %43 : vector<78x8xf32> to vector<78x8xbf16>
    %c1 = arith.constant 1 : index
    %c0_20 = arith.constant 0 : index
    %c0_21 = arith.constant 0 : index
    %45 = vector.load %arg4[%c1, %c0_20, %c0_21] : memref<9x8x8xbf16, #tpu.memory_space<vmem>>, vector<1x8x8xbf16>
    %46 = vector.shape_cast %45 : vector<1x8x8xbf16> to vector<8x8xbf16>
    %cst_22 = arith.constant dense<0.000000e+00> : vector<78x8xf32>
    %47 = tpu.matmul %44, %46, %cst_22 {dimension_numbers = #tpu.dot_dimension_numbers<[1], [0], [0], [1], [0, 0, 1, 1], [], []>} : vector<78x8xbf16>, vector<8x8xbf16>, vector<78x8xf32> -> vector<78x8xf32>
    %48 = arith.addf %42, %47 : vector<78x8xf32>
    %49 = vector.extract_strided_slice %35 {offsets = [2, 0], sizes = [78, 8], strides = [1, 1]} : vector<100x8xf32> to vector<78x8xf32>
    %50 = arith.truncf %49 : vector<78x8xf32> to vector<78x8xbf16>
    %c2 = arith.constant 2 : index
    %c0_23 = arith.constant 0 : index
    %c0_24 = arith.constant 0 : index
    %51 = vector.load %arg4[%c2, %c0_23, %c0_24] : memref<9x8x8xbf16, #tpu.memory_space<vmem>>, vector<1x8x8xbf16>
    %52 = vector.shape_cast %51 : vector<1x8x8xbf16> to vector<8x8xbf16>
    %cst_25 = arith.constant dense<0.000000e+00> : vector<78x8xf32>
    %53 = tpu.matmul %50, %52, %cst_25 {dimension_numbers = #tpu.dot_dimension_numbers<[1], [0], [0], [1], [0, 0, 1, 1], [], []>} : vector<78x8xbf16>, vector<8x8xbf16>, vector<78x8xf32> -> vector<78x8xf32>
    %54 = arith.addf %48, %53 : vector<78x8xf32>
    %55 = vector.extract_strided_slice %35 {offsets = [10, 0], sizes = [78, 8], strides = [1, 1]} : vector<100x8xf32> to vector<78x8xf32>
    %56 = arith.truncf %55 : vector<78x8xf32> to vector<78x8xbf16>
    %c3 = arith.constant 3 : index
    %c0_26 = arith.constant 0 : index
    %c0_27 = arith.constant 0 : index
    %57 = vector.load %arg4[%c3, %c0_26, %c0_27] : memref<9x8x8xbf16, #tpu.memory_space<vmem>>, vector<1x8x8xbf16>
    %58 = vector.shape_cast %57 : vector<1x8x8xbf16> to vector<8x8xbf16>
    %cst_28 = arith.constant dense<0.000000e+00> : vector<78x8xf32>
    %59 = tpu.matmul %56, %58, %cst_28 {dimension_numbers = #tpu.dot_dimension_numbers<[1], [0], [0], [1], [0, 0, 1, 1], [], []>} : vector<78x8xbf16>, vector<8x8xbf16>, vector<78x8xf32> -> vector<78x8xf32>
    %60 = arith.addf %54, %59 : vector<78x8xf32>
    %61 = vector.extract_strided_slice %35 {offsets = [11, 0], sizes = [78, 8], strides = [1, 1]} : vector<100x8xf32> to vector<78x8xf32>
    %62 = arith.truncf %61 : vector<78x8xf32> to vector<78x8xbf16>
    %c4 = arith.constant 4 : index
    %c0_29 = arith.constant 0 : index
    %c0_30 = arith.constant 0 : index
    %63 = vector.load %arg4[%c4, %c0_29, %c0_30] : memref<9x8x8xbf16, #tpu.memory_space<vmem>>, vector<1x8x8xbf16>
    %64 = vector.shape_cast %63 : vector<1x8x8xbf16> to vector<8x8xbf16>
    %cst_31 = arith.constant dense<0.000000e+00> : vector<78x8xf32>
    %65 = tpu.matmul %62, %64, %cst_31 {dimension_numbers = #tpu.dot_dimension_numbers<[1], [0], [0], [1], [0, 0, 1, 1], [], []>} : vector<78x8xbf16>, vector<8x8xbf16>, vector<78x8xf32> -> vector<78x8xf32>
    %66 = arith.addf %60, %65 : vector<78x8xf32>
    %67 = vector.extract_strided_slice %35 {offsets = [12, 0], sizes = [78, 8], strides = [1, 1]} : vector<100x8xf32> to vector<78x8xf32>
    %68 = arith.truncf %67 : vector<78x8xf32> to vector<78x8xbf16>
    %c5 = arith.constant 5 : index
    %c0_32 = arith.constant 0 : index
    %c0_33 = arith.constant 0 : index
    %69 = vector.load %arg4[%c5, %c0_32, %c0_33] : memref<9x8x8xbf16, #tpu.memory_space<vmem>>, vector<1x8x8xbf16>
    %70 = vector.shape_cast %69 : vector<1x8x8xbf16> to vector<8x8xbf16>
    %cst_34 = arith.constant dense<0.000000e+00> : vector<78x8xf32>
    %71 = tpu.matmul %68, %70, %cst_34 {dimension_numbers = #tpu.dot_dimension_numbers<[1], [0], [0], [1], [0, 0, 1, 1], [], []>} : vector<78x8xbf16>, vector<8x8xbf16>, vector<78x8xf32> -> vector<78x8xf32>
    %72 = arith.addf %66, %71 : vector<78x8xf32>
    %73 = vector.extract_strided_slice %35 {offsets = [20, 0], sizes = [78, 8], strides = [1, 1]} : vector<100x8xf32> to vector<78x8xf32>
    %74 = arith.truncf %73 : vector<78x8xf32> to vector<78x8xbf16>
    %c6 = arith.constant 6 : index
    %c0_35 = arith.constant 0 : index
    %c0_36 = arith.constant 0 : index
    %75 = vector.load %arg4[%c6, %c0_35, %c0_36] : memref<9x8x8xbf16, #tpu.memory_space<vmem>>, vector<1x8x8xbf16>
    %76 = vector.shape_cast %75 : vector<1x8x8xbf16> to vector<8x8xbf16>
    %cst_37 = arith.constant dense<0.000000e+00> : vector<78x8xf32>
    %77 = tpu.matmul %74, %76, %cst_37 {dimension_numbers = #tpu.dot_dimension_numbers<[1], [0], [0], [1], [0, 0, 1, 1], [], []>} : vector<78x8xbf16>, vector<8x8xbf16>, vector<78x8xf32> -> vector<78x8xf32>
    %78 = arith.addf %72, %77 : vector<78x8xf32>
    %79 = vector.extract_strided_slice %35 {offsets = [21, 0], sizes = [78, 8], strides = [1, 1]} : vector<100x8xf32> to vector<78x8xf32>
    %80 = arith.truncf %79 : vector<78x8xf32> to vector<78x8xbf16>
    %c7 = arith.constant 7 : index
    %c0_38 = arith.constant 0 : index
    %c0_39 = arith.constant 0 : index
    %81 = vector.load %arg4[%c7, %c0_38, %c0_39] : memref<9x8x8xbf16, #tpu.memory_space<vmem>>, vector<1x8x8xbf16>
    %82 = vector.shape_cast %81 : vector<1x8x8xbf16> to vector<8x8xbf16>
    %cst_40 = arith.constant dense<0.000000e+00> : vector<78x8xf32>
    %83 = tpu.matmul %80, %82, %cst_40 {dimension_numbers = #tpu.dot_dimension_numbers<[1], [0], [0], [1], [0, 0, 1, 1], [], []>} : vector<78x8xbf16>, vector<8x8xbf16>, vector<78x8xf32> -> vector<78x8xf32>
    %84 = arith.addf %78, %83 : vector<78x8xf32>
    %85 = vector.extract_strided_slice %35 {offsets = [22, 0], sizes = [78, 8], strides = [1, 1]} : vector<100x8xf32> to vector<78x8xf32>
    %86 = arith.truncf %85 : vector<78x8xf32> to vector<78x8xbf16>
    %c8 = arith.constant 8 : index
    %c0_41 = arith.constant 0 : index
    %c0_42 = arith.constant 0 : index
    %87 = vector.load %arg4[%c8, %c0_41, %c0_42] : memref<9x8x8xbf16, #tpu.memory_space<vmem>>, vector<1x8x8xbf16>
    %88 = vector.shape_cast %87 : vector<1x8x8xbf16> to vector<8x8xbf16>
    %cst_43 = arith.constant dense<0.000000e+00> : vector<78x8xf32>
    %89 = tpu.matmul %86, %88, %cst_43 {dimension_numbers = #tpu.dot_dimension_numbers<[1], [0], [0], [1], [0, 0, 1, 1], [], []>} : vector<78x8xbf16>, vector<8x8xbf16>, vector<78x8xf32> -> vector<78x8xf32>
    %90 = arith.addf %84, %89 : vector<78x8xf32>
    %91 = tpu.iota {dimensions = array<i32: 0>} : vector<78x8xi32>
    %c10_i32_44 = arith.constant 10 : i32
    %c0_i32_45 = arith.constant 0 : i32
    %92 = arith.cmpi eq, %c10_i32_44, %c0_i32_45 : i32
    %c1_i32_46 = arith.constant 1 : i32
    %93 = arith.select %92, %c1_i32_46, %c10_i32_44 : i32
    %94 = vector.broadcast %93 : i32 to vector<78x8xi32>
    %95 = arith.remsi %91, %94 : vector<78x8xi32>
    %c0_i32_47 = arith.constant 0 : i32
    %96 = vector.broadcast %c0_i32_47 : i32 to vector<78x8xi32>
    %97 = arith.cmpi ne, %95, %96 : vector<78x8xi32>
    %c0_i32_48 = arith.constant 0 : i32
    %98 = vector.broadcast %c0_i32_48 : i32 to vector<78x8xi32>
    %99 = arith.cmpi slt, %95, %98 : vector<78x8xi32>
    %c0_i32_49 = arith.constant 0 : i32
    %100 = arith.cmpi slt, %93, %c0_i32_49 : i32
    %101 = vector.broadcast %100 : i1 to vector<78x8xi1>
    %102 = vector.broadcast %101 : vector<78x8xi1> to vector<78x8xi1>
    %103 = arith.xori %99, %102 : vector<78x8xi1>
    %104 = arith.andi %103, %97 : vector<78x8xi1>
    %105 = vector.broadcast %93 : i32 to vector<78x8xi32>
    %106 = arith.addi %95, %105 : vector<78x8xi32>
    %107 = arith.select %104, %106, %95 : vector<78x8xi1>, vector<78x8xi32>
    %c8_i32_50 = arith.constant 8 : i32
    %108 = vector.broadcast %c8_i32_50 : i32 to vector<78x8xi32>
    %109 = arith.cmpi slt, %107, %108 : vector<78x8xi32>
    %110 = arith.extui %109 : vector<78x8xi1> to vector<78x8xi32>
    %111 = arith.sitofp %110 : vector<78x8xi32> to vector<78x8xf32>
    %112 = arith.mulf %90, %111 : vector<78x8xf32>
    %cst_51 = arith.constant dense<0.000000e+00> : vector<8xf32>
    %113 = vector.multi_reduction <add>, %112, %cst_51 [0] : vector<78x8xf32> to vector<8xf32>
    %114 = vector.shape_cast %113 : vector<8xf32> to vector<1x8xf32>
    %c0_52 = arith.constant 0 : index
    %c0_53 = arith.constant 0 : index
    %c0_54 = arith.constant 0 : index
    %115 = vector.load %arg6[%c0_52, %c0_53, %c0_54] : memref<1x2x8xf32, #tpu.memory_space<vmem>>, vector<1x1x8xf32>
    %116 = vector.shape_cast %115 : vector<1x1x8xf32> to vector<1x8xf32>
    %117 = vector.shape_cast %114 : vector<1x8xf32> to vector<1x1x8xf32>
    tpu.vector_store %arg6[%c0_52, %c0_53, %c0_54], %117 {strides = array<i32>} : memref<1x2x8xf32, #tpu.memory_space<vmem>>, vector<1x1x8xf32>,
    %118 = arith.mulf %112, %90 : vector<78x8xf32>
    %cst_55 = arith.constant dense<0.000000e+00> : vector<8xf32>
    %119 = vector.multi_reduction <add>, %118, %cst_55 [0] : vector<78x8xf32> to vector<8xf32>
    %120 = vector.shape_cast %119 : vector<8xf32> to vector<1x8xf32>
    %c0_56 = arith.constant 0 : index
    %c1_57 = arith.constant 1 : index
    %c0_58 = arith.constant 0 : index
    %121 = vector.load %arg6[%c0_56, %c1_57, %c0_58] : memref<1x2x8xf32, #tpu.memory_space<vmem>>, vector<1x1x8xf32>
    %122 = vector.shape_cast %121 : vector<1x1x8xf32> to vector<1x8xf32>
    %123 = vector.shape_cast %120 : vector<1x8xf32> to vector<1x1x8xf32>
    tpu.vector_store %arg6[%c0_56, %c1_57, %c0_58], %123 {strides = array<i32>} : memref<1x2x8xf32, #tpu.memory_space<vmem>>, vector<1x1x8xf32>,
    %c0_59 = arith.constant 0 : index
    %c0_60 = arith.constant 0 : index
    %c0_61 = arith.constant 0 : index
    %124 = vector.load %arg5[%c0_59, %c0_60, %c0_61] : memref<1x78x8xf32, #tpu.memory_space<vmem>>, vector<1x78x8xf32>
    %125 = vector.shape_cast %124 : vector<1x78x8xf32> to vector<78x8xf32>
    %126 = vector.shape_cast %90 : vector<78x8xf32> to vector<1x78x8xf32>
    tpu.vector_store %arg5[%c0_59, %c0_60, %c0_61], %126 {strides = array<i32>} : memref<1x78x8xf32, #tpu.memory_space<vmem>>, vector<1x78x8xf32>,
    return
  }
  func.func @transform_0(%arg0: i32) -> (i32, i32, i32) {
    %c0_i32 = arith.constant 0 : i32
    %c0_i32_0 = arith.constant 0 : i32
    %c0_i32_1 = arith.constant 0 : i32
    return %arg0, %c0_i32, %c0_i32_0 : i32, i32, i32
  }
  func.func @transform_1(%arg0: i32) -> (i32, i32) {
    %c0_i32 = arith.constant 0 : i32
    %c0_i32_0 = arith.constant 0 : i32
    %c0_i32_1 = arith.constant 0 : i32
    return %c0_i32, %c0_i32_0 : i32, i32
  }
  func.func @transform_2(%arg0: i32) -> (i32, i32) {
    %c0_i32 = arith.constant 0 : i32
    %c0_i32_0 = arith.constant 0 : i32
    %c0_i32_1 = arith.constant 0 : i32
    return %c0_i32, %c0_i32_0 : i32, i32
  }
  func.func @transform_3(%arg0: i32) -> (i32, i32, i32) {
    %c0_i32 = arith.constant 0 : i32
    %c0_i32_0 = arith.constant 0 : i32
    %c0_i32_1 = arith.constant 0 : i32
    %c0_i32_2 = arith.constant 0 : i32
    return %c0_i32, %c0_i32_0, %c0_i32_1 : i32, i32, i32
  }
  func.func @transform_4(%arg0: i32) -> (i32, i32, i32) {
    %c0_i32 = arith.constant 0 : i32
    %c0_i32_0 = arith.constant 0 : i32
    %c0_i32_1 = arith.constant 0 : i32
    return %arg0, %c0_i32, %c0_i32_0 : i32, i32, i32
  }
  func.func @transform_5(%arg0: i32) -> (i32, i32, i32) {
    %c0_i32 = arith.constant 0 : i32
    %c0_i32_0 = arith.constant 0 : i32
    %c0_i32_1 = arith.constant 0 : i32
    return %arg0, %c0_i32, %c0_i32_0 : i32, i32, i32
  }
}

</mosaic_0001>

<bundles_post_ra>
// kernel: downscale_forward.5
= control target key start
LH: loop header
LB: loop body
LE: loop exit
PB: predicated region body
PF: predicated region fallthrough
CT: control target
= control target key end

     0   :  { %s365_s12 = smov 0   ;;  %s430_s0 = inlined_call_operand.vmem [shape: f32[2,78,8], index: 0, kind: input, shape index: {}]   ;;  %s431_s1 = inlined_call_operand.vmem [shape: f32[1,8], index: 1, kind: input, shape index: {}]   ;;  %s432_s2 = inlined_call_operand.vmem [shape: f32[1,8], index: 2, kind: input, shape index: {}]   ;;  %s433_s3 = inlined_call_operand.vmem [shape: f32[2,8,8,8], index: 3, kind: output, shape index: {}]  }
   0x1 LB: > { %s302_s13 = sadd.s32 4294967295, %s343_s12   ;;  %p306_p0 = scmp.ge.s32.totalorder %s343_s12, 1  ;;  %s343_s12 = sphi %s365_s12, %s13_s12  }
   0x2   : > { %p137_p1 = scmp.lt.s32.totalorder %s343_s12, 3 }
   0x4   : > { %p138_p2 = pnand %p306_p0, %p137_p1 }
   0x5   : > { %p161_p3 = scmp.lt.s32.totalorder (!%p138_p2), %s302_s13, 1 }
   0x6   : > { %141 = sbr.rel (%p138_p2) target bundleno = 36 (0x24), region = 32 }
   0xb   : > { %s435_s13 = smov (!%p161_p3, %s302_s13), 1  ;;  %v335_v0 = vld [vmem:[%s431_s1] ss:$0 sm:$0xff]  ;;  %vm219_vm0 = vcmask 64512   ;;  %vm222_vm1 = vcmask 64514   ;;  %vm224_vm2 = vcmask 58368  }
   0xc   : > { %s326_s14 = smul.u32 80, %s435_s13  ;;  %v336_v1 = vld [vmem:[%s432_s2] ss:$0 sm:$0xff]  ;;  %s325_s22 = sshll.u32 %s435_s13, 6  ;;  %vm227_vm3 = vcmask 64516   ;;  %vm229_vm4 = vcmask 60416  }
   0xd   : > { %s395_s25 = scalar_lea.vmem %s433_s3, %s325_s22  ;;  %vm232_vm5 = vcmask 64518   ;;  %vm234_vm6 = vcmask 62464  }
   0xe   : > { %s379_s19 = scalar_lea.vmem %s430_s0, %s326_s14 }
   0xf   : > { %v171_v2 = vld [vmem:[%s379_s19] sm:$0xff]  ;;  %v172_v3 = vld [vmem:[%s379_s19 + $0x8] sm:$0xff]  ;;  %v173_v4 = vld [vmem:[%s379_s19 + $0x10] sm:$0xff] }
  0x10   : > { %v185_v5 = vmul.f32 %v335_v0, %v171_v2  ;;  %v186_v6 = vmul.f32 %v335_v0, %v172_v3  ;;  %v187_v7 = vmul.f32 %v335_v0, %v173_v4  ;;  %v174_v8 = vld [vmem:[%s379_s19 + $0x18] sm:$0xff]  ;;  %v175_v9 = vld [vmem:[%s379_s19 + $0x20] sm:$0xff]  ;;  %v176_v10 = vld [vmem:[%s379_s19 + $0x28] sm:$0xff] }
  0x11   : > { %v188_v11 = vmul.f32 %v335_v0, %v174_v8  ;;  %v189_v12 = vmul.f32 %v335_v0, %v175_v9  ;;  %v190_v13 = vmul.f32 %v335_v0, %v176_v10  ;;  %v177_v14 = vld [vmem:[%s379_s19 + $0x30] sm:$0xff]  ;;  %v178_v15 = vld [vmem:[%s379_s19 + $0x38] sm:$0xff]  ;;  %v179_v22 = vld [vmem:[%s379_s19 + $0x40] sm:$0xff] }
  0x12   : > { %v199_v16 = vadd.f32 %v336_v1, %v185_v5  ;;  %v200_v17 = vadd.f32 %v336_v1, %v186_v6  ;;  %v201_v18 = vadd.f32 %v336_v1, %v187_v7  ;;  %v191_v19 = vmul.f32 %v335_v0, %v177_v14  ;;  %v180_v27 = vld [vmem:[%s379_s19 + $0x48] sm:$0x3f] }
  0x13   : > { %v202_v20 = vadd.f32 %v336_v1, %v188_v11  ;;  %v192_v21 = vmul.f32 %v335_v0, %v178_v15  ;;  %v203_v26 = vadd.f32 %v336_v1, %v189_v12  ;;  %v204_v28 = vadd.f32 %v336_v1, %v190_v13 }
  0x14   : > { %v209_v23 = vmax.f32 %v199_v16, 0.0  ;;  %v210_v24 = vmax.f32 %v200_v17, 0.0  ;;  %v211_v25 = vmax.f32 %v201_v18, 0.0  ;;  %v205_v30 = vadd.f32 %v336_v1, %v191_v19 }
  0x15   : > { %v212_v29 = vmax.f32 %v202_v20, 0.0  ;;  %v193_v31 = vmul.f32 %v335_v0, %v179_v22  ;;  %v206_v32 = vadd.f32 %v336_v1, %v192_v21  ;;  %v194_v33 = vmul.f32 %v335_v0, %v180_v27 }
  0x16   : > { %220 = vst.msk [vmem:[%s395_s25] sm:$0xff] %vm219_vm0, %v209_v23  ;;  %v213_v34 = vmax.f32 %v203_v26, 0.0  ;;  %v214_v35 = vmax.f32 %v204_v28, 0.0  ;;  %v215_v37 = vmax.f32 %v205_v30, 0.0 }
  0x17   : > { %310 = vst.msk [vmem:[%s395_s25 + $0x6] sm:$0xfc] %vm222_vm1, %v210_v24  ;;  %v207_v36 = vadd.f32 %v336_v1, %v193_v31  ;;  %v216_v38 = vmax.f32 %v206_v32, 0.0  ;;  %v208_v39 = vadd.f32 %v336_v1, %v194_v33 }
  0x18   : > { %311 = vst.msk [vmem:[%s395_s25 + $0xe] sm:$0x3] %vm224_vm2, %v211_v25 }
  0x19   : > { %312 = vst.msk [vmem:[%s395_s25 + $0xc] sm:$0xf0] %vm227_vm3, %v211_v25  ;;  %v217_v40 = vmax.f32 %v207_v36, 0.0  ;;  %v218_v41 = vmax.f32 %v208_v39, 0.0 }
  0x1a   : > { %313 = vst.msk [vmem:[%s395_s25 + $0x14] sm:$0xf] %vm229_vm4, %v212_v29 }
  0x1b   : > { %314 = vst.msk [vmem:[%s395_s25 + $0x12] sm:$0xc0] %vm232_vm5, %v212_v29 }
  0x1c   : > { %315 = vst.msk [vmem:[%s395_s25 + $0x1a] sm:$0x3f] %vm234_vm6, %v213_v34 }
  0x1d   : > { %316 = vst.msk [vmem:[%s395_s25 + $0x20] sm:$0xff] %vm219_vm0, %v214_v35 }
  0x1e   : > { %317 = vst.msk [vmem:[%s395_s25 + $0x26] sm:$0xfc] %vm222_vm1, %v215_v37 }
  0x1f   : > { %318 = vst.msk [vmem:[%s395_s25 + $0x2e] sm:$0x3] %vm224_vm2, %v216_v38 }
  0x20   : > { %319 = vst.msk [vmem:[%s395_s25 + $0x2c] sm:$0xf0] %vm227_vm3, %v216_v38 }
  0x21   : > { %320 = vst.msk [vmem:[%s395_s25 + $0x34] sm:$0xf] %vm229_vm4, %v217_v40 }
  0x22   : > { %321 = vst.msk [vmem:[%s395_s25 + $0x32] sm:$0xc0] %vm232_vm5, %v217_v40 }
  0x23   : > { %322 = vst.msk [vmem:[%s395_s25 + $0x3a] sm:$0x3f] %vm234_vm6, %v218_v41 }
  0x24 PF: > { %s13_s12 = sadd.s32 1, %s343_s12  }
  0x25   : > { %p10_p4 = scmp.ge.s32.totalorder %s13_s12, 4  }
  0x27   :  { %12 = sbr.rel (!%p10_p4) target bundleno = 1 (0x1), region = 69 }

// kernel: downscale_forward.3
= control target key start
LH: loop header
LB: loop body
LE: loop exit
PB: predicated region body
PF: predicated region fallthrough
CT: control target
= control target key end

     0   :  { %s2022_s12 = smov 0   ;;  %s2024_s13 = smov 0   ;;  %s2895_s0 = inlined_call_operand.vmem [shape: f32[4,2,100,4], index: 0, kind: input, shape index: {}]   ;;  %s2896_s1 = inlined_call_operand.vmem [shape: bf16[9,4,8], index: 1, kind: input, shape index: {}]   ;;  %s2897_s2 = inlined_call_operand.vmem [shape: f32[2,78,8], index: 2, kind: output, shape index: {0}]   ;;  %s2898_s3 = inlined_call_operand.vmem [shape: f32[2,2,8], index: 3, kind: output, shape index: {1}]  }
   0x1   :  { %s2026_s14 = smov 0  }
   0x2 LB: > { %s1831_s15 = sadd.s32 4294967295, %s1998_s14   ;;  %s2039_s16 = sadd.s32 1, %s1998_s14   ;;  %s1998_s14 = sphi %s2026_s14, %s2930_s14   ;;  %s1994_s13 = sphi %s2024_s13, %s2929_s13   ;;  %s1990_s12 = sphi %s2022_s12, %s2928_s12  }
   0x3   : > { %s18_s17 = ssub.s32 %s1998_s14, %s2039_s16  ;;  %s21_s18 = sadd.s32 1, %s1994_s13 }
   0x4   : > { %p19_p0 = scmp.eq.s32.totalorder %s18_s17, 0  ;;  %p28_p1 = scmp.ne.s32.totalorder %s1994_s13, %s1990_s12 }
   0x5   : > { %p29_p2 = scmp.eq.s32.totalorder %s1998_s14, 0  ;;  %p1834_p4 = scmp.ge.s32.totalorder %s1998_s14, 2 }
   0x6   : > { %s2048_s19 = scalar_select %p19_p0, %s1994_s13, %s21_s18  }
   0x7   : > { %p30_p3 = por %p29_p2, %p28_p1  ;;  %130 = sbr.rel (%p1834_p4) target bundleno = 69 (0x45), region = 20 }
   0xc   : > { %133 = sbr.rel (!%p30_p3) target bundleno = 69 (0x45), region = 24  ;;  %s135_s20 = sand.u32 (%p30_p3), 1, %s1994_s13  }
   0xd   : > { %s1947_s21 = smul.u32 (%p30_p3), 104, %s1998_s14 }
   0xe   : > { %s1946_s22 = smul.u32 (%p30_p3), 416, %s135_s20 }
   0xf   : > { %s2056_s25 = scalar_lea.vmem (%p30_p3), %s2895_s0, %s1947_s21 }
  0x10   : > { %v271_v0 = vld [vmem:[%s2056_s25] sm:$0xff] (%p30_p3)  ;;  %v273_v1 = vld [vmem:[%s2056_s25 + $0x8] sm:$0xff] (%p30_p3)  ;;  %v275_v2 = vld [vmem:[%s2056_s25 + $0x10] sm:$0xff] (%p30_p3)  ;;  %s2061_s26 = scalar_lea.vmem (%p30_p3), [#allocation2], %s1946_s22 }
  0x11   : > { %272 = vst [vmem:[%s2061_s26] sm:$0xff] %v271_v0  ;;  %v277_v3 = vld [vmem:[%s2056_s25 + $0x18] sm:$0xff]  ;;  %v279_v4 = vld [vmem:[%s2056_s25 + $0x20] sm:$0xff]  ;;  %v281_v5 = vld [vmem:[%s2056_s25 + $0x28] sm:$0xff] }
  0x12   : > { %274 = vst [vmem:[%s2061_s26 + $0x8] sm:$0xff] %v273_v1  ;;  %v283_v6 = vld [vmem:[%s2056_s25 + $0x30] sm:$0xff]  ;;  %v285_v7 = vld [vmem:[%s2056_s25 + $0x38] sm:$0xff]  ;;  %v287_v8 = vld [vmem:[%s2056_s25 + $0x40] sm:$0xff] }
  0x13   : > { %276 = vst [vmem:[%s2061_s26 + $0x10] sm:$0xff] %v275_v2  ;;  %v289_v9 = vld [vmem:[%s2056_s25 + $0x48] sm:$0xff]  ;;  %v291_v10 = vld [vmem:[%s2056_s25 + $0x50] sm:$0xff]  ;;  %v293_v11 = vld [vmem:[%s2056_s25 + $0x58] sm:$0xff] }
  0x14   : > { %278 = vst [vmem:[%s2061_s26 + $0x18] sm:$0xff] %v277_v3  ;;  %v295_v12 = vld [vmem:[%s2056_s25 + $0x60] sm:$0xff]  ;;  %v297_v13 = vld [vmem:[%s2056_s25 + $0xd0] sm:$0xff]  ;;  %v299_v14 = vld [vmem:[%s2056_s25 + $0xd8] sm:$0xff] }
  0x15   : > { %280 = vst [vmem:[%s2061_s26 + $0x20] sm:$0xff] %v279_v4  ;;  %v301_v15 = vld [vmem:[%s2056_s25 + $0xe0] sm:$0xff]  ;;  %v303_v16 = vld [vmem:[%s2056_s25 + $0xe8] sm:$0xff]  ;;  %v305_v17 = vld [vmem:[%s2056_s25 + $0xf0] sm:$0xff] }
  0x16   : > { %282 = vst [vmem:[%s2061_s26 + $0x28] sm:$0xff] %v281_v5  ;;  %v307_v18 = vld [vmem:[%s2056_s25 + $0xf8] sm:$0xff]  ;;  %v309_v19 = vld [vmem:[%s2056_s25 + $0x100] sm:$0xff]  ;;  %v311_v20 = vld [vmem:[%s2056_s25 + $0x108] sm:$0xff] }
  0x17   : > { %284 = vst [vmem:[%s2061_s26 + $0x30] sm:$0xff] %v283_v6  ;;  %v313_v21 = vld [vmem:[%s2056_s25 + $0x110] sm:$0xff]  ;;  %v315_v22 = vld [vmem:[%s2056_s25 + $0x118] sm:$0xff]  ;;  %v317_v23 = vld [vmem:[%s2056_s25 + $0x120] sm:$0xff] }
  0x18   : > { %286 = vst [vmem:[%s2061_s26 + $0x38] sm:$0xff] %v285_v7  ;;  %v319_v24 = vld [vmem:[%s2056_s25 + $0x128] sm:$0xff]  ;;  %v321_v25 = vld [vmem:[%s2056_s25 + $0x130] sm:$0xff]  ;;  %v323_v26 = vld [vmem:[%s2056_s25 + $0x1a0] sm:$0xff] }
  0x19   : > { %288 = vst [vmem:[%s2061_s26 + $0x40] sm:$0xff] %v287_v8  ;;  %v325_v27 = vld [vmem:[%s2056_s25 + $0x1a8] sm:$0xff]  ;;  %v327_v28 = vld [vmem:[%s2056_s25 + $0x1b0] sm:$0xff]  ;;  %v329_v29 = vld [vmem:[%s2056_s25 + $0x1b8] sm:$0xff] }
  0x1a   : > { %290 = vst [vmem:[%s2061_s26 + $0x48] sm:$0xff] %v289_v9  ;;  %v331_v30 = vld [vmem:[%s2056_s25 + $0x1c0] sm:$0xff]  ;;  %v333_v31 = vld [vmem:[%s2056_s25 + $0x1c8] sm:$0xff]  ;;  %v335_v32 = vld [vmem:[%s2056_s25 + $0x1d0] sm:$0xff] }
  0x1b   : > { %292 = vst [vmem:[%s2061_s26 + $0x50] sm:$0xff] %v291_v10  ;;  %v337_v33 = vld [vmem:[%s2056_s25 + $0x1d8] sm:$0xff]  ;;  %v339_v34 = vld [vmem:[%s2056_s25 + $0x1e0] sm:$0xff]  ;;  %v341_v35 = vld [vmem:[%s2056_s25 + $0x1e8] sm:$0xff] }
  0x1c   : > { %294 = vst [vmem:[%s2061_s26 + $0x58] sm:$0xff] %v293_v11  ;;  %v343_v36 = vld [vmem:[%s2056_s25 + $0x1f0] sm:$0xff]  ;;  %v345_v37 = vld [vmem:[%s2056_s25 + $0x1f8] sm:$0xff]  ;;  %v347_v38 = vld [vmem:[%s2056_s25 + $0x200] sm:$0xff] }
  0x1d   : > { %296 = vst [vmem:[%s2061_s26 + $0x60] sm:$0xff] %v295_v12  ;;  %v349_v39 = vld [vmem:[%s2056_s25 + $0x270] sm:$0xff]  ;;  %v351_v40 = vld [vmem:[%s2056_s25 + $0x278] sm:$0xff]  ;;  %v353_v41 = vld [vmem:[%s2056_s25 + $0x280] sm:$0xff] }
  0x1e   : > { %298 = vst [vmem:[%s2061_s26 + $0x68] sm:$0xff] %v297_v13  ;;  %v355_v42 = vld [vmem:[%s2056_s25 + $0x288] sm:$0xff]  ;;  %v357_v43 = vld [vmem:[%s2056_s25 + $0x290] sm:$0xff]  ;;  %v359_v44 = vld [vmem:[%s2056_s25 + $0x298] sm:$0xff] }
  0x1f   : > { %300 = vst [vmem:[%s2061_s26 + $0x70] sm:$0xff] %v299_v14  ;;  %v361_v45 = vld [vmem:[%s2056_s25 + $0x2a0] sm:$0xff]  ;;  %v363_v46 = vld [vmem:[%s2056_s25 + $0x2a8] sm:$0xff]  ;;  %v365_v47 = vld [vmem:[%s2056_s25 + $0x2b0] sm:$0xff] }
  0x20   : > { %302 = vst [vmem:[%s2061_s26 + $0x78] sm:$0xff] %v301_v15  ;;  %v367_v48 = vld [vmem:[%s2056_s25 + $0x2b8] sm:$0xff]  ;;  %v369_v49 = vld [vmem:[%s2056_s25 + $0x2c0] sm:$0xff]  ;;  %v371_v50 = vld [vmem:[%s2056_s25 + $0x2c8] sm:$0xff] }
  0x21   : > { %304 = vst [vmem:[%s2061_s26 + $0x80] sm:$0xff] %v303_v16  ;;  %v373_v51 = vld [vmem:[%s2056_s25 + $0x2d0] sm:$0xff] }
  0x22   : > { %306 = vst [vmem:[%s2061_s26 + $0x88] sm:$0xff] %v305_v17 }
  0x23   : > { %308 = vst [vmem:[%s2061_s26 + $0x90] sm:$0xff] %v307_v18 }
  0x24   : > { %310 = vst [vmem:[%s2061_s26 + $0x98] sm:$0xff] %v309_v19 }
  0x25   : > { %312 = vst [vmem:[%s2061_s26 + $0xa0] sm:$0xff] %v311_v20 }
  0x26   : > { %314 = vst [vmem:[%s2061_s26 + $0xa8] sm:$0xff] %v313_v21 }
  0x27   : > { %316 = vst [vmem:[%s2061_s26 + $0xb0] sm:$0xff] %v315_v22 }
  0x28   : > { %318 = vst [vmem:[%s2061_s26 + $0xb8] sm:$0xff] %v317_v23 }
  0x29   : > { %320 = vst [vmem:[%s2061_s26 + $0xc0] sm:$0xff] %v319_v24 }
  0x2a   : > { %322 = vst [vmem:[%s2061_s26 + $0xc8] sm:$0xff] %v321_v25 }
  0x2b   : > { %324 = vst [vmem:[%s2061_s26 + $0xd0] sm:$0xff] %v323_v26 }
  0x2c   : > { %326 = vst [vmem:[%s2061_s26 + $0xd8] sm:$0xff] %v325_v27 }
  0x2d   : > { %328 = vst [vmem:[%s2061_s26 + $0xe0] sm:$0xff] %v327_v28 }
  0x2e   : > { %330 = vst [vmem:[%s2061_s26 + $0xe8] sm:$0xff] %v329_v29 }
  0x2f   : > { %332 = vst [vmem:[%s2061_s26 + $0xf0] sm:$0xff] %v331_v30 }
  0x30   : > { %334 = vst [vmem:[%s2061_s26 + $0xf8] sm:$0xff] %v333_v31 }
  0x31   : > { %336 = vst [vmem:[%s2061_s26 + $0x100] sm:$0xff] %v335_v32 }
  0x32   : > { %338 = vst [vmem:[%s2061_s26 + $0x108] sm:$0xff] %v337_v33 }
  0x33   : > { %340 = vst [vmem:[%s2061_s26 + $0x110] sm:$0xff] %v339_v34 }
  0x34   : > { %342 = vst [vmem:[%s2061_s26 + $0x118] sm:$0xff] %v341_v35 }
  0x35   : > { %344 = vst [vmem:[%s2061_s26 + $0x120] sm:$0xff] %v343_v36 }
  0x36   : > { %346 = vst [vmem:[%s2061_s26 + $0x128] sm:$0xff] %v345_v37 }
  0x37   : > { %348 = vst [vmem:[%s2061_s26 + $0x130] sm:$0xff] %v347_v38 }
  0x38   : > { %350 = vst [vmem:[%s2061_s26 + $0x138] sm:$0xff] %v349_v39 }
  0x39   : > { %352 = vst [vmem:[%s2061_s26 + $0x140] sm:$0xff] %v351_v40 }
  0x3a   : > { %354 = vst [vmem:[%s2061_s26 + $0x148] sm:$0xff] %v353_v41 }
  0x3b   : > { %356 = vst [vmem:[%s2061_s26 + $0x150] sm:$0xff] %v355_v42 }
  0x3c   : > { %358 = vst [vmem:[%s2061_s26 + $0x158] sm:$0xff] %v357_v43 }
  0x3d   : > { %360 = vst [vmem:[%s2061_s26 + $0x160] sm:$0xff] %v359_v44 }
  0x3e   : > { %362 = vst [vmem:[%s2061_s26 + $0x168] sm:$0xff] %v361_v45 }
  0x3f   : > { %364 = vst [vmem:[%s2061_s26 + $0x170] sm:$0xff] %v363_v46 }
  0x40   : > { %366 = vst [vmem:[%s2061_s26 + $0x178] sm:$0xff] %v365_v47 }
  0x41   : > { %368 = vst [vmem:[%s2061_s26 + $0x180] sm:$0xff] %v367_v48 }
  0x42   : > { %370 = vst [vmem:[%s2061_s26 + $0x188] sm:$0xff] %v369_v49 }
  0x43   : > { %372 = vst [vmem:[%s2061_s26 + $0x190] sm:$0xff] %v371_v50 }
  0x44   : > { %374 = vst [vmem:[%s2061_s26 + $0x198] sm:$0xff] %v373_v51 }
  0x45 PF: > { %p1836_p5 = scmp.ge.s32.totalorder %s1998_s14, 1  ;;  %p379_p6 = scmp.lt.s32.totalorder %s1998_s14, 3 }
  0x47   : > { %p380_p7 = pnand %p1836_p5, %p379_p6 }
  0x48   : > { %s386_s29 = sand.u32 (!%p380_p7), 1, %s1990_s12   ;;  %p2599_p8 = scmp.lt.s32.totalorder (!%p380_p7), %s1831_s15, 1 }
  0x49   : > { %383 = sbr.rel (%p380_p7) target bundleno = 440 (0x1b8), region = 62 }
  0x4a   : > { %s1948_s30 = smul.u32 (!%p380_p7), 416, %s386_s29 }
  0x4c   : > { %s2179_s8 = scalar_lea.vmem (!%p380_p7), [#allocation2], %s1948_s30 }
  0x4e   : > { %v1878_v52 = vld [vmem:[%s2896_s1 + $0x2] sm:$0x3]  ;;  %vm581_vm0 = vcmask 1041408   ;;  %v1889_v54 = vld [vmem:[%s2896_s1 + $0x4] sm:$0x3]  ;;  %v425_v58 = vld [vmem:[%s2179_s8 + $0x10] sm:$0xff] }
  0x4f   : > { %v583_v53 = vsel %vm581_vm0, %v1878_v52, 0  ;;  %v699_v55 = vsel %vm581_vm0, %v1889_v54, 0  ;;  %v522_v56 = vld [vmem:[%s2896_s1] sm:$0x3]  ;;  %v426_v59 = vld [vmem:[%s2179_s8 + $0x18] sm:$0xff]  ;;  %v428_v61 = vld [vmem:[%s2179_s8 + $0x28] sm:$0xff] }
  0x50   : > { %1943 = vmatpush.bf16.msra.mxu1 %v583_v53  ;;  %1944 = vmatpush.bf16.msra.mxu2 %v583_v53  ;;  %v630_v57 = vsel %vm581_vm0, %v522_v56, 0  ;;  %v427_v60 = vld [vmem:[%s2179_s8 + $0x20] sm:$0xff]  ;;  %v1841_v62 = vld [vmem:[%s2179_s8 + $0x78] sm:$0xff]  ;;  %v1843_v0 = vld [vmem:[%s2179_s8 + $0x88] sm:$0xff]  ;;  %vm525_vm1 = vsmask.f32 7424 }
  0x51   : > { %1945 = vmatpush.bf16.msra.mxu3 %v583_v53  ;;  %592 = vmatpush.bf16.msra.mxu0 %v583_v53  ;;  %v1842_v63 = vld [vmem:[%s2179_s8 + $0x80] sm:$0xff]  ;;  %v1844_v1 = vld [vmem:[%s2179_s8 + $0x90] sm:$0xff]  ;;  %v452_v3 = vmax.f32 %v425_v58, %v1841_v62  ;;  %v454_v5 = vmax.f32 %v427_v60, %v1843_v0  ;;  %v1855_v6 = vld [vmem:[%s2179_s8 + $0xe8] sm:$0xff]  ;;  %vm565_vm2 = vcmask 31744   ;;  %vm673_vm3 = vcmask 1046528   ;;  %s2932_s15 = smov (!%p2599_p8, %s1831_s15), 1 }
  0x52   : > { %v1854_v2 = vld [vmem:[%s2179_s8 + $0xe0] sm:$0xff]  ;;  %v453_v4 = vmax.f32 %v426_v59, %v1842_v63  ;;  %v1856_v7 = vld [vmem:[%s2179_s8 + $0xf0] sm:$0xff]  ;;  %v1857_v8 = vld [vmem:[%s2179_s8 + $0xf8] sm:$0xff]  ;;  %v455_v9 = vmax.f32 %v428_v61, %v1844_v1  ;;  %vm831_vm4 = vsmask.f32 6400  ;;  %vm946_vm5 = vcmask 1045504  }
  0x53   : > { %v1867_v10 = vld [vmem:[%s2179_s8 + $0x148] sm:$0xff]  ;;  %v1868_v11 = vld [vmem:[%s2179_s8 + $0x150] sm:$0xff]  ;;  %v1869_v12 = vld [vmem:[%s2179_s8 + $0x158] sm:$0xff]  ;;  %vm1101_vm6 = vsmask.f32 5376  ;;  %vm1199_vm7 = vcmask 1044480  }
  0x54   : > { %708 = vmatpush.bf16.msrb.mxu2 %v699_v55  ;;  %639 = vmatpush.bf16.msrb.mxu1 %v630_v57  ;;  %v1870_v13 = vld [vmem:[%s2179_s8 + $0x160] sm:$0xff]  ;;  %v493_v14 = vmax.f32 %v1854_v2, %v1867_v10  ;;  %v494_v15 = vmax.f32 %v1855_v6, %v1868_v11  ;;  %v495_v16 = vmax.f32 %v1856_v7, %v1869_v12  ;;  %v429_v17 = vld [vmem:[%s2179_s8 + $0x30] sm:$0xff]  ;;  %v430_v18 = vld [vmem:[%s2179_s8 + $0x38] sm:$0xff]  ;;  %s1949_s14 = smul.u32 80, %s2932_s15  ;;  %s1838_s30 = sshll.u32 %s2932_s15, 1 }
  0x55   : > { %v496_v19 = vmax.f32 %v1857_v8, %v1870_v13  ;;  %v1845_v20 = vld [vmem:[%s2179_s8 + $0x98] sm:$0xff]  ;;  %v1846_v21 = vld [vmem:[%s2179_s8 + $0xa0] sm:$0xff]  ;;  %v1859_v27 = vld [vmem:[%s2179_s8 + $0x108] sm:$0xff]  ;;  %s421_s6 = scalar_lea.vmem %s2898_s3, %s1838_s30 }
  0x56   : > { %v1858_v22 = vld [vmem:[%s2179_s8 + $0x100] sm:$0xff]  ;;  %v2202_v23 = vmax.f32 %v452_v3, %v493_v14  ;;  %v2204_v24 = vmax.f32 %v453_v4, %v494_v15  ;;  %v2206_v25 = vmax.f32 %v454_v5, %v495_v16  ;;  %v456_v26 = vmax.f32 %v429_v17, %v1845_v20  ;;  %v1871_v28 = vld [vmem:[%s2179_s8 + $0x168] sm:$0xff]  ;;  %v1872_v29 = vld [vmem:[%s2179_s8 + $0x170] sm:$0xff]  ;;  %s2671_s29 = scalar_lea.vmem %s2897_s2, %s1949_s14 }
  0x57   : > { %v2211_v30 = vmax.f32 %v455_v9, %v496_v19  ;;  %v457_v31 = vmax.f32 %v430_v18, %v1846_v21  ;;  %v497_v32 = vmax.f32 %v1858_v22, %v1871_v28  ;;  %v498_v33 = vmax.f32 %v1859_v27, %v1872_v29  ;;  %v431_v34 = vld [vmem:[%s2179_s8 + $0x40] sm:$0xff]  ;;  %v432_v35 = vld [vmem:[%s2179_s8 + $0x48] sm:$0xff]  ;;  %v1848_v38 = vld [vmem:[%s2179_s8 + $0xb0] sm:$0xff] }
  0x58   : > { %v1847_v36 = vld [vmem:[%s2179_s8 + $0xa8] sm:$0xff]  ;;  %v2218_v37 = vpack.c.bf16 %v2204_v24, %v2202_v23  ;;  %v1860_v40 = vld [vmem:[%s2179_s8 + $0x110] sm:$0xff]  ;;  %v1861_v41 = vld [vmem:[%s2179_s8 + $0x118] sm:$0xff]  ;;  %v459_v45 = vmax.f32 %v432_v35, %v1848_v38 }
  0x59   : > { %v458_v39 = vmax.f32 %v431_v34, %v1847_v36  ;;  %v2225_v42 = vpack.c.bf16 %v2211_v30, %v2206_v25  ;;  %v2227_v43 = vmax.f32 %v456_v26, %v497_v32  ;;  %v2229_v44 = vmax.f32 %v457_v31, %v498_v33  ;;  %v1873_v46 = vld [vmem:[%s2179_s8 + $0x178] sm:$0xff]  ;;  %v1874_v47 = vld [vmem:[%s2179_s8 + $0x180] sm:$0xff]  ;;  %v1839_v53 = vld [vmem:[%s2179_s8 + $0x68] sm:$0xff] }
  0x5a   : > { %v534_v48 = vshll.u32 %v2218_v37, 16  ;;  %v538_v49 = vshrl.u32 %v2218_v37, 16  ;;  %v499_v50 = vmax.f32 %v1860_v40, %v1873_v46  ;;  %v500_v51 = vmax.f32 %v1861_v41, %v1874_v47  ;;  %v423_v52 = vld [vmem:[%s2179_s8] sm:$0xff]  ;;  %v424_v57 = vld [vmem:[%s2179_s8 + $0x8] sm:$0xff]  ;;  %v1840_v58 = vld [vmem:[%s2179_s8 + $0x70] sm:$0xff] }
  0x5b   : > { %v542_v54 = vshll.u32 %v2225_v42, 16  ;;  %v2240_v55 = vpack.c.bf16 %v2229_v44, %v2227_v43  ;;  %v546_v56 = vshrl.u32 %v2225_v42, 16  ;;  %v1852_v59 = vld [vmem:[%s2179_s8 + $0xd0] sm:$0xff]  ;;  %v1853_v63 = vld [vmem:[%s2179_s8 + $0xd8] sm:$0xff]  ;;  %v1866_v1 = vld [vmem:[%s2179_s8 + $0x140] sm:$0xff]  ;;  %v450_v4 = vmax.f32 %v423_v52, %v1839_v53 }
  0x5c   : > { %v536_v60 = vrot.slane %v534_v48, 1  ;;  %v2248_v61 = vmax.f32 %v458_v39, %v499_v50  ;;  %v2250_v62 = vmax.f32 %v459_v45, %v500_v51  ;;  %v1865_v0 = vld [vmem:[%s2179_s8 + $0x138] sm:$0xff]  ;;  %v1895_v5 = vld [vmem:[%s2896_s1 + $0x6] sm:$0x3]  ;;  %v451_v8 = vmax.f32 %v424_v57, %v1840_v58  ;;  %v1901_v13 = vld [vmem:[%s2896_s1 + $0x8] sm:$0x3] }
  0x5d   : > { %v544_v2 = vrot.slane %v542_v54, 1  ;;  %v550_v3 = vshll.u32 %v2240_v55, 16  ;;  %v491_v11 = vmax.f32 %v1852_v59, %v1865_v0  ;;  %v492_v12 = vmax.f32 %v1853_v63, %v1866_v1  ;;  %v1913_v26 = vld [vmem:[%s2896_s1 + $0xc] sm:$0x3]  ;;  %v1919_v31 = vld [vmem:[%s2896_s1 + $0xe] sm:$0x3] }
  0x5e   : > { %v540_v6 = vor.u32 %v538_v49, %v536_v60  ;;  %v2265_v7 = vpack.c.bf16 %v2250_v62, %v2248_v61  ;;  %v782_v17 = vsel %vm581_vm0, %v1895_v5, 0  ;;  %v897_v22 = vsel %vm581_vm0, %v1901_v13, 0  ;;  %v1907_v34 = vld [vmem:[%s2896_s1 + $0xa] sm:$0x3]  ;;  %v1925_v39 = vld [vmem:[%s2896_s1 + $0x10] sm:$0x3] }
  0x5f   : > { %v548_v9 = vor.u32 %v546_v56, %v544_v2  ;;  %v552_v10 = vrot.slane %v550_v3, 1  ;;  %v504_v19 = vmax.f32 %v450_v4, %v491_v11  ;;  %v505_v20 = vmax.f32 %v451_v8, %v492_v12  ;;  %791 = vmatpush.bf16.msrb.mxu3 %v782_v17  ;;  %906 = vmatpush.bf16.msrb.mxu0 %v897_v22 }
  0x60   : > { %v545_v14 = vsel %vm525_vm1, %v540_v6, %v544_v2  ;;  %v558_v15 = vshll.u32 %v2265_v7, 16  ;;  %v562_v16 = vshrl.u32 %v2265_v7, 16  ;;  %v1053_v28 = vsel %vm581_vm0, %v1913_v26, 0 }
  0x61   : > { %1880 = vmatmul.msk.bf16.vlgmr.msra.gmra.mxu1 %vm565_vm2, %v545_v14  ;;  %v553_v18 = vsel %vm525_vm1, %v548_v9, %v552_v10  ;;  %v517_v27 = vpack.c.bf16 %v505_v20, %v504_v19  ;;  %v554_v35 = vshrl.u32 %v2240_v55, 16  ;;  %v1151_v38 = vsel %vm581_vm0, %v1919_v31, 0  ;;  %v1862_v31 = vld [vmem:[%s2179_s8 + $0x120] sm:$0xff] }
  0x62   : > { %1881 = vmatmul.msk.bf16.vlgmr.msra.gmra.mxu2 %vm565_vm2, %v553_v18  ;;  %v560_v21 = vrot.slane %v558_v15, 1  ;;  %v974_v40 = vsel %vm581_vm0, %v1907_v34, 0  ;;  %v1227_v45 = vsel %vm581_vm0, %v1925_v39, 0  ;;  %v2307_v47 = vpack.c.bf16 %v2202_v23, %v505_v20 }
  0x63   : > { %1062 = vmatpush.bf16.msra.mxu2 %v1053_v28  ;;  %v527_v32 = vshrl.u32 %v517_v27, 16  ;;  %v529_v33 = vshll.u32 %v517_v27, 16  ;;  %983 = vmatpush.bf16.msra.mxu1 %v974_v40  ;;  %v556_v46 = vor.u32 %v554_v35, %v552_v10  ;;  %v2312_v51 = vpack.c.bf16 %v2206_v25, %v2204_v24  ;;  %v433_v28 = vld [vmem:[%s2179_s8 + $0x50] sm:$0xff] }
  0x64   : > { %v564_v29 = vor.u32 %v562_v16, %v560_v21  ;;  %v833_v52 = vshrl.u32 %v2307_v47, 16  ;;  %v836_v53 = vshll.u32 %v2307_v47, 16  ;;  %v757_v59 = vrot.slane %v2307_v47, 1 }
  0x65   : > { %v531_v36 = vrot.slane %v529_v33, 1  ;;  %v841_v57 = vshrl.u32 %v2312_v51, 16  ;;  %v844_v58 = vshll.u32 %v2312_v51, 16  ;;  %v561_v23 = vsel %vm525_vm1, %v556_v46, %v560_v21 }
  0x66   : > { %1883 = vmatmul.msk.bf16.vlgmr.msra.gmra.mxu3 %vm565_vm2, %v564_v29  ;;  %v835_v24 = vrot.slane %v833_v52, 1  ;;  %v838_v25 = vrot.slane %v836_v53, 2  ;;  %v674_v6 = vrot.slane %v517_v27, 1  ;;  %v675_v8 = vrot.slane %v2218_v37, 1  ;;  %v1849_v29 = vld [vmem:[%s2179_s8 + $0xb8] sm:$0xff] }
  0x67   : > { %1160 = vmatpush.bf16.msra.mxu3 %v1151_v38  ;;  %v532_v41 = vor.u32 %v531_v36, %v527_v32  ;;  %v843_v63 = vrot.slane %v841_v57, 1  ;;  %v846_v0 = vrot.slane %v844_v58, 2  ;;  %v2330_v9 = vpack.c.bf16 %v2227_v43, %v2211_v30  ;;  %v1875_v32 = vld [vmem:[%s2179_s8 + $0x188] sm:$0xff] }
  0x68   : > { %v839_v2 = vor.u32 %v838_v25, %v835_v24  ;;  %v676_v12 = vsel %vm673_vm3, %v674_v6, %v675_v8  ;;  %v677_v19 = vrot.slane %v2225_v42, 1  ;;  %v2346_v20 = vpack.c.bf16 %v2248_v61, %v2229_v44  ;;  %v1850_v25 = vld [vmem:[%s2179_s8 + $0xc0] sm:$0xff] }
  0x69   : > { %v537_v50 = vsel %vm525_vm1, %v532_v41, %v536_v60  ;;  %v758_v60 = vrot.slane %v2312_v51, 1  ;;  %v847_v4 = vor.u32 %v846_v0, %v843_v63  ;;  %v850_v10 = vshrl.u32 %v2330_v9, 16  ;;  %v1863_v63 = vld [vmem:[%s2179_s8 + $0x128] sm:$0xff]  ;;  %v1876_v0 = vld [vmem:[%s2179_s8 + $0x190] sm:$0xff] }
  0x6a   : > { %1879 = vmatmul.msk.bf16.vlgmr.msra.gmra.mxu0 %vm565_vm2, %v537_v50  ;;  %v853_v11 = vshll.u32 %v2330_v9, 16  ;;  %v760_v13 = vrot.slane %v2330_v9, 1  ;;  %v859_v21 = vshrl.u32 %v2346_v20, 16  ;;  %v862_v22 = vshll.u32 %v2346_v20, 16 }
  0x6b   : > { %1236 = vmatpush.bf16.msra.mxu0 %v1227_v45  ;;  %v759_v1 = vsel %vm673_vm3, %v757_v59, %v758_v60  ;;  %v848_v5 = vsel %vm831_vm4, %v839_v2, %v847_v4  ;;  %v852_v14 = vrot.slane %v850_v10, 1  ;;  %v678_v26 = vsel %vm673_vm3, %v675_v8, %v677_v19 }
  0x6c   : > { %v855_v17 = vrot.slane %v853_v11, 2  ;;  %v761_v30 = vsel %vm673_vm3, %v758_v60, %v760_v13  ;;  %v861_v33 = vrot.slane %v859_v21, 1  ;;  %v864_v44 = vrot.slane %v862_v22, 2 }
  0x6d   : > { %v460_v34 = vmax.f32 %v433_v28, %v1849_v29  ;;  %v501_v36 = vmax.f32 %v1862_v31, %v1875_v32  ;;  %v679_v41 = vrot.slane %v2240_v55, 1  ;;  %v1106_v52 = vrot.slane %v542_v54, 3 }
  0x6e   : > { %v856_v43 = vor.u32 %v855_v17, %v852_v14  ;;  %v865_v38 = vor.u32 %v864_v44, %v861_v33  ;;  %v1105_v53 = vrot.slane %v546_v56, 2  ;;  %v947_v58 = vrot.slane %v2307_v47, 2  ;;  %v434_v56 = vld [vmem:[%s2179_s8 + $0x58] sm:$0xff] }
  0x6f   : > { %v2362_v39 = vmax.f32 %v460_v34, %v501_v36  ;;  %v680_v57 = vsel %vm673_vm3, %v677_v19, %v679_v41  ;;  %v1102_v59 = vrot.slane %v538_v49, 2  ;;  %v1103_v47 = vrot.slane %v534_v48, 3 }
  0x70   : > { %v857_v18 = vsel %vm831_vm4, %v847_v4, %v856_v43  ;;  %v866_v40 = vsel %vm831_vm4, %v856_v43, %v865_v38  ;;  %v1107_v49 = vor.u32 %v1106_v52, %v1105_v53  ;;  %v461_v4 = vmax.f32 %v434_v56, %v1850_v25  ;;  %v1864_v52 = vld [vmem:[%s2179_s8 + $0x130] sm:$0xf] }
  0x71   : > { %1884 = vmatmul.msk.bf16.vlgmr.msrb.gmra.mxu1 %vm565_vm2, %v517_v27  ;;  %v762_v27 = vrot.slane %v2346_v20, 1  ;;  %v2368_v45 = vpack.c.bf16 %v2362_v39, %v2250_v62  ;;  %v950_v8 = vrot.slane %v2330_v9, 2  ;;  %v681_v48 = vrot.slane %v2265_v7, 1 }
  0x72   : > { %1882 = vmatmul.msk.bf16.gmra.mxu2 %vm565_vm2, %v561_v23  ;;  %v948_v23 = vrot.slane %v2312_v51, 2  ;;  %v1200_v43 = vrot.slane %v2218_v37, 3  ;;  %v1026_v21 = vrot.slane %v2218_v37, 2  ;;  %v1027_v22 = vrot.slane %v2225_v42, 2 }
  0x73   : > { %v763_v61 = vsel %vm673_vm3, %v760_v13, %v762_v27  ;;  %v868_v46 = vshrl.u32 %v2368_v45, 16  ;;  %v871_v50 = vshll.u32 %v2368_v45, 16  ;;  %v764_v62 = vrot.slane %v2368_v45, 1 }
  0x74   : > { %v949_v24 = vsel %vm946_vm5, %v947_v58, %v948_v23  ;;  %v951_v10 = vsel %vm946_vm5, %v948_v23, %v950_v8  ;;  %v682_v14 = vsel %vm673_vm3, %v679_v41, %v681_v48  ;;  %v1028_v28 = vsel %vm946_vm5, %v1026_v21, %v1027_v22 }
  0x75   : > { %v870_v54 = vrot.slane %v868_v46, 1  ;;  %v873_v60 = vrot.slane %v871_v50, 2  ;;  %v765_v51 = vsel %vm673_vm3, %v762_v27, %v764_v62  ;;  %v1110_v27 = vrot.slane %v550_v3, 3  ;;  %v435_v46 = vld [vmem:[%s2179_s8 + $0x60] sm:$0xf] }
  0x76   : > { %1896 = vmatmul.msk.bf16.vlgmr.msrb.gmra.mxu3 %vm565_vm2, %v759_v1  ;;  %v1104_v1 = vor.u32 %v1103_v47, %v1102_v59  ;;  %v1114_v3 = vrot.slane %v558_v15, 3  ;;  %v1851_v50 = vld [vmem:[%s2179_s8 + $0xc8] sm:$0xf] }
  0x77   : > { %v874_v2 = vor.u32 %v873_v60, %v870_v54  ;;  %v1205_v54 = vrot.slane %v2265_v7, 3 }
  0x78   : > { %v1108_v6 = vsel %vm1101_vm6, %v1104_v1, %v1107_v49 }
  0x79   : > { %v875_v11 = vsel %vm831_vm4, %v865_v38, %v874_v2  ;;  %v952_v38 = vrot.slane %v2346_v20, 2 }
  0x7a   : > { %1902 = vmatmul.msk.bf16.vlgmr.msrb.gmra.mxu0 %vm565_vm2, %v848_v5  ;;  %v502_v5 = vmax.f32 %v1863_v63, %v1876_v0 }
  0x7b   : > { %v953_v41 = vsel %vm946_vm5, %v950_v8, %v952_v38 }
  0x81   : > { %1885 = vmatmul.msk.bf16.gmra.mxu1 %vm565_vm2, %v2218_v37 }
  0x82   : > { %1890 = vmatmul.msk.bf16.vlgmr.msrb.gmra.mxu2 %vm565_vm2, %v676_v12  ;;  %v515_v12 = vmax.f32 %v461_v4, %v502_v5 }
  0x84   : > { %v2401_v13 = vpack.c.bf16 %v515_v12, %v515_v12  ;;  %v2426_v31 = vpack.c.bf16 %v515_v12, %v2362_v39  ;;  %v1029_v39 = vrot.slane %v2240_v55, 2 }
  0x86   : > { %1897 = vmatmul.msk.bf16.gmra.mxu3 %vm565_vm2, %v761_v30  ;;  %v877_v17 = vshll.u32 %v2401_v13, 16  ;;  %v1118_v32 = vshrl.u32 %v2426_v31, 16  ;;  %v1121_v33 = vshll.u32 %v2426_v31, 16  ;;  %v1030_v53 = vsel %vm946_vm5, %v1027_v22, %v1029_v39 }
  0x87   : > { %v956_v21 = vrot.slane %v2401_v13, 2  ;;  %v1033_v22 = vrot.slane %v2426_v31, 2 }
  0x88   : > { %v879_v9 = vrot.slane %v877_v17, 2  ;;  %v1120_v44 = vrot.slane %v1118_v32, 2 }
  0x8a   : > { %1903 = vmatmul.msk.bf16.gmra.mxu0 %vm565_vm2, %v857_v18  ;;  %v880_v30 = vsel %vm831_vm4, %v874_v2, %v879_v9  ;;  %v1201_v18 = vrot.slane %v2225_v42, 3  ;;  %v1031_v2 = vrot.slane %v2265_v7, 2 }
  0x8c   : > { %v1202_v19 = vsel %vm1199_vm7, %v1200_v43, %v1201_v18 }
  0x91   : > { %1886 = vmatmul.msk.bf16.gmra.mxu1 %vm565_vm2, %v2225_v42  ;;  %v1113_v42 = vrot.slane %v562_v16, 2 }
  0x92   : > { %1891 = vmatmul.msk.bf16.gmra.mxu2 %vm565_vm2, %v678_v26  ;;  %v1109_v26 = vrot.slane %v554_v35, 2  ;;  %v1203_v35 = vrot.slane %v2240_v55, 3 }
  0x93   : > { %v1115_v16 = vor.u32 %v1114_v3, %v1113_v42 }
  0x94   : > { %v1111_v29 = vor.u32 %v1110_v27, %v1109_v26  ;;  %v1204_v34 = vsel %vm1199_vm7, %v1201_v18, %v1203_v35 }
  0x96   : > { %1898 = vmatmul.msk.bf16.gmra.mxu3 %vm565_vm2, %v763_v61  ;;  %v1112_v37 = vsel %vm1101_vm6, %v1107_v49, %v1111_v29  ;;  %v1123_v61 = vrot.slane %v1121_v33, 3  ;;  %v1116_v20 = vsel %vm1101_vm6, %v1111_v29, %v1115_v16  ;;  %v954_v49 = vrot.slane %v2368_v45, 2 }
  0x97   : > { %v1207_v45 = vrot.slane %v2426_v31, 3 }
  0x98   : > { %v1124_v36 = vor.u32 %v1123_v61, %v1120_v44  ;;  %v955_v8 = vsel %vm946_vm5, %v952_v38, %v954_v49 }
  0x9a   : > { %1904 = vmatmul.msk.bf16.gmra.mxu0 %vm565_vm2, %v866_v40  ;;  %v1125_v15 = vsel %vm1101_vm6, %v1115_v16, %v1124_v36 }
  0xa1   : > { %1887 = vmatmul.msk.bf16.gmra.mxu1 %vm565_vm2, %v2240_v55 }
  0xa2   : > { %1892 = vmatmul.msk.bf16.gmra.mxu2 %vm565_vm2, %v680_v57  ;;  %v462_v57 = vmax.f32 %v435_v46, %v1851_v50 }
  0xa6   : > { %1899 = vmatmul.msk.bf16.gmra.mxu3 %vm565_vm2, %v765_v51  ;;  %v1206_v51 = vsel %vm1199_vm7, %v1203_v35, %v1205_v54 }
  0xaa   : > { %1905 = vmatmul.msk.bf16.gmra.mxu0 %vm565_vm2, %v875_v11  ;;  %v1032_v11 = vsel %vm946_vm5, %v1029_v39, %v1031_v2 }
  0xb1   : > { %1888 = vmatmul.msk.bf16.gmra.mxu1 %vm565_vm2, %v2265_v7 }
  0xb2   : > { %1893 = vmatmul.msk.bf16.gmra.mxu2 %vm565_vm2, %v682_v14 }
  0xb6   : > { %1900 = vmatmul.msk.bf16.gmra.mxu3 %vm565_vm2, %v764_v62  ;;  %v1877_v62 = vld [vmem:[%s2179_s8 + $0x198] sm:$0xf] }
  0xb7   : > { %v503_v58 = vmax.f32 %v1864_v52, %v1877_v62 }
  0xb9   : > { %v516_v55 = vmax.f32 %v462_v57, %v503_v58 }
  0xba   : > { %1906 = vmatmul.msk.bf16.gmra.mxu0 %vm565_vm2, %v880_v30 }
  0xbb   : > { %v2453_v23 = vpack.c.bf16 %v516_v55, %v516_v55 }
  0xbd   : > { %v1130_v56 = vshll.u32 %v2453_v23, 16  ;;  %v1209_v7 = vrot.slane %v2453_v23, 3  ;;  %v1035_v16 = vrot.slane %v2453_v23, 2 }
  0xbf   : > { %v1132_v63 = vrot.slane %v1130_v56, 3  ;;  %v1210_v14 = vsel %vm1199_vm7, %v1207_v45, %v1209_v7 }
  0xc1   : > { %1908 = vmatmul.msk.bf16.vlgmr.msra.gmra.mxu1 %vm565_vm2, %v949_v24  ;;  %v1127_v24 = vshrl.u32 %v2453_v23, 16 }
  0xc2   : > { %1894 = vmatmul.msk.bf16.gmra.mxu2 %vm565_vm2, %v681_v48 }
  0xc3   : > { %v1129_v25 = vrot.slane %v1127_v24, 2 }
  0xc5   : > { %v1133_v1 = vor.u32 %v1132_v63, %v1129_v25 }
  0xc6   : > { %1920 = vmatmul.msk.bf16.vlgmr.msra.gmra.mxu3 %vm565_vm2, %v1108_v6 }
  0xc7   : > { %v1134_v4 = vsel %vm1101_vm6, %v1124_v36, %v1133_v1 }
  0xca   : > { %1926 = vmatmul.msk.bf16.vlgmr.msra.gmra.mxu0 %vm565_vm2, %v1202_v19  ;;  %v1208_v19 = vsel %vm1199_vm7, %v1205_v54, %v1207_v45 }
  0xd1   : > { %1909 = vmatmul.msk.bf16.gmra.mxu1 %vm565_vm2, %v951_v10 }
  0xd2   : > { %1914 = vmatmul.msk.bf16.vlgmr.msra.gmra.mxu2 %vm565_vm2, %v1028_v28  ;;  %v957_v28 = vsel %vm946_vm5, %v954_v49, %v956_v21  ;;  %v2000_v21 = vmov 0  }
  0xd6   : > { %1921 = vmatmul.msk.bf16.gmra.mxu3 %vm565_vm2, %v1112_v37  ;;  %v1034_v37 = vsel %vm946_vm5, %v1031_v2, %v1033_v22 }
  0xda   : > { %1927 = vmatmul.msk.bf16.gmra.mxu0 %vm565_vm2, %v1204_v34 }
  0xde   : > { %v599_v40 = vpop.f32.mrf.mxu1 }
  0xe1   : > { %1910 = vmatmul.msk.bf16.gmra.mxu1 %vm565_vm2, %v953_v41 }
  0xe2   : > { %1915 = vmatmul.msk.bf16.gmra.mxu2 %vm565_vm2, %v1030_v53 }
  0xe5   : > { %v604_v59 = vpop.f32.mrf.mxu2 }
  0xe6   : > { %v601_v60 = vpop.f32.mrf.mxu1  ;;  %1922 = vmatmul.msk.bf16.gmra.mxu3 %vm565_vm2, %v1116_v20 }
  0xe7   : > { %v594_v47 = vpop.f32.mrf.mxu0 }
  0xe9   : > { %v2459_v0 = vpop.f32.mrf.mxu3 }
  0xea   : > { %1928 = vmatmul.msk.bf16.gmra.mxu0 %vm565_vm2, %v1206_v51 }
  0xed   : > { %v606_v5 = vpop.f32.mrf.mxu2 }
  0xee   : > { %v641_v6 = vpop.f32.mrf.mxu1 }
  0xef   : > { %v642_v10 = vadd.f32 %v641_v6, %v594_v47  ;;  %v596_v48 = vpop.f32.mrf.mxu0 }
  0xf1   : > { %1911 = vmatmul.msk.bf16.gmra.mxu1 %vm565_vm2, %v955_v8  ;;  %v2469_v12 = vpop.f32.mrf.mxu3 }
  0xf2   : > { %1916 = vmatmul.msk.bf16.gmra.mxu2 %vm565_vm2, %v1032_v11 }
  0xf5   : > { %v609_v17 = vpop.f32.mrf.mxu2 }
  0xf6   : > { %v643_v9 = vpop.f32.mrf.mxu1  ;;  %1923 = vmatmul.msk.bf16.gmra.mxu3 %vm565_vm2, %v1125_v15 }
  0xf7   : > { %v644_v30 = vadd.f32 %v643_v9, %v596_v48  ;;  %v908_v18 = vpop.f32.mrf.mxu0 }
  0xf9   : > { %v793_v43 = vpop.f32.mrf.mxu3 }
  0xfa   : > { %1929 = vmatmul.msk.bf16.gmra.mxu0 %vm565_vm2, %v1208_v19 }
  0xfd   : > { %v611_v26 = vpop.f32.mrf.mxu2 }
  0xfe   : > { %v646_v27 = vpop.f32.mrf.mxu1 }
  0xff   : > { %v647_v29 = vadd.f32 %v646_v27, %v599_v40  ;;  %v910_v35 = vpop.f32.mrf.mxu0  ;;  %v1036_v40 = vsel %vm946_vm5, %v1033_v22, %v1035_v16 }
 0x101   : > { %1912 = vmatmul.msk.bf16.gmra.mxu1 %vm565_vm2, %v957_v28  ;;  %v795_v42 = vpop.f32.mrf.mxu3 }
 0x102   : > { %1917 = vmatmul.msk.bf16.gmra.mxu2 %vm565_vm2, %v1034_v37 }
 0x105   : > { %v710_v3 = vpop.f32.mrf.mxu2 }
 0x106   : > { %v735_v32 = vadd.f32 %v710_v3, %v642_v10  ;;  %v648_v13 = vpop.f32.mrf.mxu1  ;;  %1924 = vmatmul.msk.bf16.gmra.mxu3 %vm565_vm2, %v1134_v4 }
 0x107   : > { %v649_v31 = vadd.f32 %v648_v13, %v601_v60  ;;  %v913_v61 = vpop.f32.mrf.mxu0 }
 0x108   : > { %v818_v33 = vadd.f32 %v793_v43, %v735_v32 }
 0x109   : > { %v798_v44 = vpop.f32.mrf.mxu3 }
 0x10a   : > { %v2485_v34 = vadd.f32 %v908_v18, %v818_v33  ;;  %1930 = vmatmul.msk.bf16.gmra.mxu0 %vm565_vm2, %v1210_v14 }
 0x10d   : > { %v712_v36 = vpop.f32.mrf.mxu2 }
 0x10e   : > { %v736_v38 = vadd.f32 %v712_v36, %v644_v30  ;;  %v651_v39 = vpop.f32.mrf.mxu1 }
 0x10f   : > { %v652_v15 = vadd.f32 %v651_v39, %v604_v59  ;;  %v915_v50 = vpop.f32.mrf.mxu0  ;;  %v1273_v59 = vlaneseq }
 0x110   : > { %v819_v41 = vadd.f32 %v795_v42, %v736_v38 }
 0x111   : > { %v800_v46 = vpop.f32.mrf.mxu3  ;;  %v2497_v63 = vshrl.u32 %v1273_v59, 7 }
 0x112   : > { %1918 = vmatmul.msk.bf16.gmra.mxu2 %vm565_vm2, %v1036_v40  ;;  %v2491_v52 = vadd.f32 %v910_v35, %v819_v41 }
 0x113   : > { %v1287_v1 = vand.u32 65535, %v2497_v63  ;;  %v1288_v4 = vshrl.u32 %v2497_v63, 16  ;;  %v2506_v43 = vadd.s32 8, %v2497_v63  ;;  %v2518_v40 = vadd.s32 16, %v2497_v63 }
 0x115   : > { %v715_v53 = vpop.f32.mrf.mxu2  ;;  %v1290_v8 = vmul.u32 52429, %v1287_v1  ;;  %v1292_v10 = vmul.u32 52429, %v1288_v4  ;;  %v1293_v14 = vmul.u32 52428, %v1288_v4  ;;  %v1316_v28 = vand.u32 65535, %v2506_v43 }
 0x116   : > { %v737_v57 = vadd.f32 %v715_v53, %v647_v29  ;;  %v653_v62 = vpop.f32.mrf.mxu1  ;;  %v1317_v42 = vshrl.u32 %v2506_v43, 16 }
 0x117   : > { %v654_v58 = vadd.f32 %v653_v62, %v606_v5  ;;  %v918_v23 = vpop.f32.mrf.mxu0  ;;  %v1291_v5 = vmul.u32 52428, %v1287_v1  ;;  %v1320_v3 = vmul.u32 52428, %v1316_v28  ;;  %v1297_v13 = vshrl.u32 %v1292_v10, 16 }
 0x118   : > { %v820_v55 = vadd.f32 %v798_v44, %v737_v57  ;;  %v1321_v33 = vmul.u32 52429, %v1317_v42  ;;  %v1322_v39 = vmul.u32 52428, %v1317_v42 }
 0x119   : > { %v803_v20 = vpop.f32.mrf.mxu3  ;;  %v1294_v11 = vshll.u32 %v1291_v5, 16  ;;  %v1323_v36 = vshll.u32 %v1320_v3, 16 }
 0x11a   : > { %v2493_v54 = vadd.f32 %v913_v61, %v820_v55 }
 0x11b   : > { %vm1298_vm8 = vc.u32 %v1290_v8, %v1294_v11  ;;  %v1300_v30 = vadd.s32 %v1294_v11, %v1290_v8  ;;  %v1326_v8 = vshrl.u32 %v1321_v33, 16 }
 0x11c   : > { %v1299_v22 = vsel %vm1298_vm8, 1, %v2000_v21 }
 0x11d   : > { %v717_v60 = vpop.f32.mrf.mxu2  ;;  %v1301_v27 = vadd.s32 %v1299_v22, %v1293_v14 }
 0x11e   : > { %v738_v24 = vadd.f32 %v717_v60, %v649_v31  ;;  %v656_v56 = vpop.f32.mrf.mxu1  ;;  %v1319_v31 = vmul.u32 52429, %v1316_v28  ;;  %v1346_v60 = vshrl.u32 %v2518_v40, 16 }
 0x11f   : > { %v2495_v25 = vadd.f32 %v656_v56, %v609_v17  ;;  %v920_v49 = vpop.f32.mrf.mxu0  ;;  %v1296_v17 = vshll.u32 %v1292_v10, 16 }
 0x120   : > { %v821_v47 = vadd.f32 %v800_v46, %v738_v24  ;;  %vm1327_vm10 = vc.u32 %v1319_v31, %v1323_v36  ;;  %v1329_v46 = vadd.s32 %v1323_v36, %v1319_v31  ;;  %v1350_v1 = vmul.u32 52429, %v1346_v60 }
 0x121   : > { %v805_v51 = vpop.f32.mrf.mxu3  ;;  %vm1302_vm9 = vc.u32 %v1300_v30, %v1296_v17  ;;  %v1328_v62 = vsel %vm1327_vm10, 1, %v2000_v21  ;;  %v1351_v11 = vmul.u32 52428, %v1346_v60 }
 0x122   : > { %v2500_v2 = vadd.f32 %v915_v50, %v821_v47  ;;  %v1303_v37 = vsel %vm1302_vm9, 1, %v2000_v21  ;;  %v1330_v55 = vadd.s32 %v1328_v62, %v1322_v39 }
 0x123   : > { %v1305_v35 = vadd.s32 %v1303_v37, %v1301_v27  ;;  %v2536_v27 = vadd.s32 24, %v2497_v63 }
 0x125   : > { %v720_v6 = vpop.f32.mrf.mxu2  ;;  %v1374_v37 = vand.u32 65535, %v2536_v27 }
 0x126   : > { %v739_v48 = vadd.f32 %v720_v6, %v652_v15  ;;  %v658_v45 = vpop.f32.mrf.mxu1  ;;  %v1325_v15 = vshll.u32 %v1321_v33, 16 }
 0x127   : > { %v2503_v7 = vadd.f32 %v658_v45, %v611_v26  ;;  %v923_v19 = vpop.f32.mrf.mxu0  ;;  %v1295_v26 = vshrl.u32 %v1291_v5, 16  ;;  %v1354_v45 = vshll.u32 %v1350_v1, 16  ;;  %v1377_v33 = vmul.u32 52429, %v1374_v37 }
 0x128   : > { %v822_v9 = vadd.f32 %v803_v20, %v739_v48  ;;  %vm1331_vm11 = vc.u32 %v1329_v46, %v1325_v15  ;;  %v1324_v20 = vshrl.u32 %v1320_v3, 16  ;;  %v1355_v3 = vshrl.u32 %v1350_v1, 16 }
 0x129   : > { %v808_v18 = vpop.f32.mrf.mxu3  ;;  %v1306_v16 = vadd.s32 %v1305_v35, %v1295_v26  ;;  %v2550_v46 = vadd.s32 32, %v2497_v63 }
 0x12a   : > { %v2510_v29 = vadd.f32 %v918_v23, %v822_v9  ;;  %v1332_v23 = vsel %vm1331_vm11, 1, %v2000_v21  ;;  %vm1664_vm11 = vcmask 64512  }
 0x12b   : > { %v1307_v57 = vadd.s32 %v1306_v16, %v1297_v13  ;;  %v1334_v24 = vadd.s32 %v1332_v23, %v1330_v55  ;;  %v1404_v60 = vshrl.u32 %v2550_v46, 16 }
 0x12d   : > { %v722_v32 = vpop.f32.mrf.mxu2  ;;  %v1308_v47 = vshrl.u32 %v1307_v57, 3 }
 0x12e   : > { %v740_v44 = vadd.f32 %v722_v32, %v654_v58  ;;  %v661_v61 = vpop.f32.mrf.mxu1  ;;  %v1345_v58 = vand.u32 65535, %v2518_v40 }
 0x12f   : > { %v2515_v38 = vadd.f32 %v661_v61, %v2459_v0  ;;  %v2520_v53 = vpop.f32.mrf.mxu0  ;;  %v1309_v9 = vmul.u32 10, %v1308_v47 }
 0x130   : > { %v823_v41 = vadd.f32 %v805_v51, %v740_v44  ;;  %v1349_v59 = vmul.u32 52428, %v1345_v58  ;;  %v1348_v51 = vmul.u32 52429, %v1345_v58  ;;  %v1378_v44 = vmul.u32 52428, %v1374_v37 }
 0x131   : > { %v810_v50 = vpop.f32.mrf.mxu3  ;;  %v2543_v35 = vsub.s32 %v2497_v63, %v1309_v9 }
 0x132   : > { %v2524_v0 = vadd.f32 %v920_v49, %v823_v41  ;;  %v1352_v4 = vshll.u32 %v1349_v59, 16  ;;  %v1335_v49 = vadd.s32 %v1334_v24, %v1324_v20  ;;  %v1353_v26 = vshrl.u32 %v1349_v59, 16 }
 0x133   : > { %v1381_v41 = vshll.u32 %v1378_v44, 16  ;;  %vm1574_vm14 = vcmp.ne.s32.totalorder %v2543_v35, 0  ;;  %v1403_v20 = vand.u32 65535, %v2550_v46  ;;  %vm1584_vm0 = vcmp.lt.s32.totalorder %v2543_v35, 0 }
 0x134   : > { %vm1356_vm12 = vc.u32 %v1348_v51, %v1352_v4  ;;  %v1358_v22 = vadd.s32 %v1352_v4, %v1348_v51  ;;  %v1382_v24 = vshrl.u32 %v1378_v44, 16  ;;  %v1604_v51 = vadd.s32 10, %v2543_v35  ;;  %vm2566_vm2 = vmand %vm1584_vm0, %vm1574_vm14 }
 0x135   : > { %v725_v56 = vpop.f32.mrf.mxu2  ;;  %v1357_v30 = vsel %vm1356_vm12, 1, %v2000_v21  ;;  %vm1385_vm15 = vc.u32 %v1377_v33, %v1381_v41  ;;  %v1387_v55 = vadd.s32 %v1381_v41, %v1377_v33 }
 0x136   : > { %v741_v5 = vadd.f32 %v725_v56, %v2495_v25  ;;  %v663_v6 = vpop.f32.mrf.mxu1  ;;  %v1359_v25 = vadd.s32 %v1357_v30, %v1351_v11  ;;  %vm1360_vm13 = vc.u32 %v1358_v22, %v1354_v45  ;;  %v1408_v45 = vmul.u32 52429, %v1404_v60 }
 0x137   : > { %v2530_v10 = vadd.f32 %v663_v6, %v2469_v12  ;;  %v2532_v17 = vpop.f32.mrf.mxu0  ;;  %v1336_v12 = vadd.s32 %v1335_v49, %v1326_v8  ;;  %v1361_v32 = vsel %vm1360_vm13, 1, %v2000_v21  ;;  %v1407_v8 = vmul.u32 52428, %v1403_v20 }
 0x138   : > { %v824_v48 = vadd.f32 %v808_v18, %v741_v5  ;;  %v1375_v18 = vshrl.u32 %v2536_v27, 16 }
 0x139   : > { %v813_v14 = vpop.f32.mrf.mxu3  ;;  %v1337_v61 = vshrl.u32 %v1336_v12, 3  ;;  %v1410_v12 = vshll.u32 %v1407_v8, 16 }
 0x13a   : > { %v2538_v28 = vadd.f32 %v923_v19, %v824_v48  ;;  %v1363_v19 = vadd.s32 %v1361_v32, %v1359_v25  ;;  %v1379_v16 = vmul.u32 52429, %v1375_v18  ;;  %v1380_v36 = vmul.u32 52428, %v1375_v18 }
 0x13b   : > { %v1338_v23 = vmul.u32 10, %v1337_v61  ;;  %v1406_v48 = vmul.u32 52429, %v1403_v20  ;;  %v1409_v18 = vmul.u32 52428, %v1404_v60 }
 0x13c   : > { %v1364_v15 = vadd.s32 %v1363_v19, %v1353_v26  ;;  %v1384_v5 = vshrl.u32 %v1379_v16, 16  ;;  %v2595_v19 = vadd.s32 40, %v2497_v63 }
 0x13d   : > { %v727_v42 = vpop.f32.mrf.mxu2  ;;  %v2571_v11 = vsub.s32 %v2506_v43, %v1338_v23  ;;  %v1614_v43 = vsel %vm2566_vm2, %v1604_v51, %v2543_v35  ;;  %vm1414_vm4 = vc.u32 %v1406_v48, %v1410_v12  ;;  %v1411_v35 = vshrl.u32 %v1407_v8, 16 }
 0x13e   : > { %v742_v13 = vadd.f32 %v727_v42, %v2503_v7  ;;  %v2547_v31 = vpop.f32.mrf.mxu1  ;;  %v1383_v7 = vshll.u32 %v1379_v16, 16  ;;  %v1365_v58 = vadd.s32 %v1364_v15, %v1355_v3  ;;  %v1412_v42 = vshll.u32 %v1408_v45, 16 }
 0x13f   : > { %v2552_v62 = vpop.f32.mrf.mxu0  ;;  %vm1575_vm3 = vcmp.ne.s32.totalorder %v2571_v11, 0  ;;  %vm1585_vm5 = vcmp.lt.s32.totalorder %v2571_v11, 0  ;;  %v1605_v61 = vadd.s32 10, %v2571_v11  ;;  %v1432_v41 = vand.u32 65535, %v2595_v19 }
 0x140   : > { %v825_v39 = vadd.f32 %v810_v50, %v742_v13  ;;  %v1386_v50 = vsel %vm1385_vm15, 1, %v2000_v21  ;;  %v1366_v59 = vshrl.u32 %v1365_v58, 3  ;;  %vm1389_vm1 = vc.u32 %v1387_v55, %v1383_v7  ;;  %vm2608_vm7 = vmand %vm1585_vm5, %vm1575_vm3 }
 0x141   : > { %v815_v57 = vpop.f32.mrf.mxu3  ;;  %v1388_v56 = vadd.s32 %v1386_v50, %v1380_v36  ;;  %v1390_v1 = vsel %vm1389_vm1, 1, %v2000_v21  ;;  %v1415_v13 = vsel %vm1414_vm4, 1, %v2000_v21  ;;  %vm2613_vm8 = vcmp.lt.s32.totalorder %v1614_v43, 8 }
 0x142   : > { %v2574_v9 = vadd.f32 %v2520_v53, %v825_v39  ;;  %v1367_v22 = vmul.u32 10, %v1366_v59  ;;  %v1416_v53 = vadd.s32 %v1410_v12, %v1406_v48  ;;  %v1417_v44 = vadd.s32 %v1415_v13, %v1409_v18 }
 0x143   : > { %v1392_v6 = vadd.s32 %v1390_v1, %v1388_v56  ;;  %v1413_v39 = vshrl.u32 %v1408_v45, 16  ;;  %v1436_v50 = vmul.u32 52428, %v1432_v41  ;;  %v1615_v60 = vsel %vm2608_vm7, %v1605_v61, %v2571_v11 }
 0x144   : > { %v2591_v32 = vsub.s32 %v2518_v40, %v1367_v22  ;;  %vm1418_vm6 = vc.u32 %v1416_v53, %v1412_v42  ;;  %vm2657_vm14 = vcmp.lt.s32.totalorder %v1615_v60, 8 }
 0x145   : > { %v730_v47 = vpop.f32.mrf.mxu2  ;;  %v1393_v25 = vadd.s32 %v1392_v6, %v1382_v24  ;;  %v1419_v16 = vsel %vm1418_vm6, 1, %v2000_v21  ;;  %v1435_v24 = vmul.u32 52429, %v1432_v41  ;;  %v1439_v1 = vshll.u32 %v1436_v50, 16 }
 0x146   : > { %v743_v4 = vadd.f32 %v730_v47, %v2515_v38  ;;  %v2576_v30 = vpop.f32.mrf.mxu1  ;;  %v1421_v15 = vadd.s32 %v1419_v16, %v1417_v44  ;;  %vm1576_vm9 = vcmp.ne.s32.totalorder %v2591_v32, 0  ;;  %vm1586_vm10 = vcmp.lt.s32.totalorder %v2591_v32, 0 }
 0x147   : > { %v2580_v37 = vpop.f32.mrf.mxu0  ;;  %v1394_v3 = vadd.s32 %v1393_v25, %v1384_v5  ;;  %v1606_v59 = vadd.s32 10, %v2591_v32  ;;  %v1010_v5 = vadd.f32 %v2547_v31, %v2485_v34  ;;  %v2001_v6 = vmov 0.0   ;;  %vm2646_vm12 = vmand %vm1586_vm10, %vm1576_vm9 }
 0x148   : > { %v826_v38 = vadd.f32 %v813_v14, %v743_v4  ;;  %v1931_v8 = vsel %vm2613_vm8, 1.0, %v2001_v6  ;;  %vm1443_vm13 = vc.u32 %v1435_v24, %v1439_v1  ;;  %v1445_v12 = vadd.s32 %v1439_v1, %v1435_v24 }
 0x149   : > { %v2578_v26 = vpop.f32.mrf.mxu3  ;;  %v1444_v25 = vsel %vm1443_vm13, 1, %v2000_v21  ;;  %v1616_v18 = vsel %vm2646_vm12, %v1606_v59, %v2591_v32  ;;  %v1440_v53 = vshrl.u32 %v1436_v50, 16  ;;  %v1932_v59 = vsel %vm2657_vm14, 1.0, %v2001_v6 }
 0x14a   : > { %v2587_v14 = vadd.f32 %v2532_v17, %v826_v38  ;;  %v1395_v17 = vshrl.u32 %v1394_v3, 3  ;;  %vm2683_vm2 = vcmp.lt.s32.totalorder %v1616_v18, 8 }
 0x14c   : > { %v1396_v23 = vmul.u32 10, %v1395_v17 }
 0x14d   : > { %v732_v33 = vpop.f32.mrf.mxu2 }
 0x14e   : > { %v744_v40 = vadd.f32 %v732_v33, %v2530_v10  ;;  %v1433_v10 = vshrl.u32 %v2595_v19, 16  ;;  %v990_v56 = vpop.f32.mrf.mxu1  ;;  %v2655_v34 = vsub.s32 %v2536_v27, %v1396_v23 }
 0x14f   : > { %v2627_v20 = vpop.f32.mrf.mxu0  ;;  %v1012_v50 = vadd.f32 %v990_v56, %v2493_v54 }
 0x150   : > { %v827_v7 = vadd.f32 %v815_v57, %v744_v40  ;;  %v1422_v57 = vadd.s32 %v1421_v15, %v1411_v35  ;;  %v1437_v51 = vmul.u32 52429, %v1433_v10  ;;  %v1438_v11 = vmul.u32 52428, %v1433_v10 }
 0x151   : > { %v2625_v55 = vpop.f32.mrf.mxu3  ;;  %vm1577_vm0 = vcmp.ne.s32.totalorder %v2655_v34, 0  ;;  %vm1587_vm1 = vcmp.lt.s32.totalorder %v2655_v34, 0  ;;  %v2690_v16 = vadd.s32 10, %v2655_v34 }
 0x152   : > { %v1423_v47 = vadd.s32 %v1422_v57, %v1413_v39  ;;  %v2635_v4 = vadd.f32 %v2552_v62, %v827_v7  ;;  %v2651_v62 = vadd.s32 48, %v2497_v63  ;;  %v1441_v45 = vshll.u32 %v1437_v51, 16  ;;  %vm2698_vm3 = vmand %vm1587_vm1, %vm1577_vm0 }
 0x153   : > { %v1446_v43 = vadd.s32 %v1444_v25, %v1438_v11  ;;  %v1442_v36 = vshrl.u32 %v1437_v51, 16  ;;  %v2707_v57 = vadd.s32 56, %v2497_v63  ;;  %v1617_v24 = vsel %vm2698_vm3, %v2690_v16, %v2655_v34 }
 0x154   : > { %v1424_v31 = vshrl.u32 %v1423_v47, 3  ;;  %v1461_v27 = vand.u32 65535, %v2651_v62  ;;  %vm1447_vm15 = vc.u32 %v1445_v12, %v1441_v45  ;;  %v1462_v13 = vshrl.u32 %v2651_v62, 16 }
 0x155   : > { %v1064_v48 = vpop.f32.mrf.mxu2  ;;  %v1448_v32 = vsel %vm1447_vm15, 1, %v2000_v21  ;;  %v1490_v11 = vand.u32 65535, %v2707_v57  ;;  %vm2761_vm9 = vcmp.lt.s32.totalorder %v1617_v24, 8 }
 0x156   : > { %v1089_v38 = vadd.f32 %v1064_v48, %v1010_v5  ;;  %v1425_v42 = vmul.u32 10, %v1424_v31  ;;  %v2678_v17 = vmul.u32 52428, %v1461_v27  ;;  %v1450_v40 = vadd.s32 %v1448_v32, %v1446_v43  ;;  %v992_v58 = vpop.f32.mrf.mxu1 }
 0x157   : > { %v2687_v61 = vpop.f32.mrf.mxu0  ;;  %v1464_v39 = vmul.u32 52429, %v1461_v27  ;;  %v2692_v15 = vmul.u32 52429, %v1462_v13  ;;  %v1467_v23 = vmul.u32 52428, %v1462_v13  ;;  %v1491_v31 = vshrl.u32 %v2707_v57, 16 }
 0x158   : > { %v1187_v3 = vadd.f32 %v2578_v26, %v1089_v38  ;;  %v1011_v26 = vadd.f32 %v2576_v30, %v2491_v52  ;;  %v2703_v30 = vsub.s32 %v2550_v46, %v1425_v42  ;;  %v1468_v7 = vshll.u32 %v2678_v17, 16 }
 0x159   : > { %v2673_v33 = vpop.f32.mrf.mxu3  ;;  %v1933_v46 = vsel %vm2683_vm2, 1.0, %v2001_v6  ;;  %v1470_v51 = vshll.u32 %v2692_v15, 16  ;;  %v2732_v22 = vmul.u32 52428, %v1490_v11  ;;  %v1469_v12 = vshrl.u32 %v2678_v17, 16 }
 0x15a   : > { %v1263_v35 = vadd.f32 %v2580_v37, %v1187_v3  ;;  %v1451_v37 = vadd.s32 %v1450_v40, %v1440_v53  ;;  %vm1472_vm4 = vc.u32 %v1464_v39, %v1468_v7  ;;  %vm1578_vm5 = vcmp.ne.s32.totalorder %v2703_v30, 0 }
 0x15b   : > { %v1473_v56 = vsel %vm1472_vm4, 1, %v2000_v21  ;;  %vm1588_vm6 = vcmp.lt.s32.totalorder %v2703_v30, 0  ;;  %v2728_v34 = vadd.s32 10, %v2703_v30  ;;  %v2738_v18 = vmul.u32 52429, %v1491_v31 }
 0x15c   : > { %v1654_v41 = vmul.f32 %v1931_v8, %v1263_v35  ;;  %1729 = vst.msk [vmem:[%s2671_s29] sm:$0xff] %vm1664_vm11, %v1263_v35  ;;  %v1452_v47 = vadd.s32 %v1451_v37, %v1442_v36  ;;  %v1474_v8 = vadd.s32 %v1468_v7, %v1464_v39  ;;  %v1475_v49 = vadd.s32 %v1473_v56, %v1467_v23  ;;  %vm2748_vm8 = vmand %vm1588_vm6, %vm1578_vm5 }
 0x15d   : > { %v1066_v10 = vpop.f32.mrf.mxu2  ;;  %v1493_v53 = vmul.u32 52429, %v1490_v11  ;;  %v1497_v13 = vshll.u32 %v2732_v22, 16  ;;  %v1471_v44 = vshrl.u32 %v2692_v15, 16  ;;  %v1499_v39 = vshll.u32 %v2738_v18, 16 }
 0x15e   : > { %v1090_v60 = vadd.f32 %v1066_v10, %v1011_v26  ;;  %v1693_v1 = vmul.f32 %v1654_v41, %v1263_v35  ;;  %v1453_v5 = vshrl.u32 %v1452_v47, 3  ;;  %vm1476_vm7 = vc.u32 %v1474_v8, %v1470_v51  ;;  %v995_v17 = vpop.f32.mrf.mxu1 }
 0x15f   : > { %v1245_v27 = vpop.f32.mrf.mxu0  ;;  %v1496_v7 = vmul.u32 52428, %v1491_v31  ;;  %vm1501_vm10 = vc.u32 %v1493_v53, %v1497_v13 }
 0x160   : > { %v1188_v54 = vadd.f32 %v2625_v55, %v1090_v60  ;;  %v1665_v55 = vsel %vm1664_vm11, %v1654_v41, 0.0  ;;  %v1454_v38 = vmul.u32 10, %v1453_v5  ;;  %v1703_v42 = vsel %vm1664_vm11, %v1693_v1, 0.0 }
 0x161   : > { %v1169_v45 = vpop.f32.mrf.mxu3  ;;  %v2757_v41 = vadd.s32 64, %v2497_v63  ;;  %v1502_v47 = vsel %vm1501_vm10, 1, %v2000_v21 }
 0x162   : > { %v1264_v48 = vadd.f32 %v2627_v20, %v1188_v54  ;;  %v1477_v20 = vsel %vm1476_vm7, 1, %v2000_v21  ;;  %v2753_v36 = vsub.s32 %v2595_v19, %v1454_v38  ;;  %v1503_v19 = vadd.s32 %v1497_v13, %v1493_v53 }
 0x163   : > { %v1479_v3 = vadd.s32 %v1477_v20, %v1475_v49  ;;  %v1519_v24 = vand.u32 65535, %v2757_v41  ;;  %v1520_v56 = vshrl.u32 %v2757_v41, 16 }
 0x164   : > { %v1655_v25 = vmul.f32 %v1932_v59, %v1264_v48  ;;  %1730 = vst.msk [vmem:[%s2671_s29 + $0x8] sm:$0xff] %vm1664_vm11, %v1264_v48  ;;  %v1618_v59 = vsel %vm2748_vm8, %v2728_v34, %v2703_v30  ;;  %vm1579_vm12 = vcmp.ne.s32.totalorder %v2753_v36, 0  ;;  %vm1505_vm13 = vc.u32 %v1503_v19, %v1499_v39 }
 0x165   : > { %v1069_v43 = vpop.f32.mrf.mxu2  ;;  %v1480_v37 = vadd.s32 %v1479_v3, %v1469_v12  ;;  %vm1589_vm14 = vcmp.lt.s32.totalorder %v2753_v36, 0  ;;  %v1500_v30 = vshrl.u32 %v2738_v18, 16  ;;  %v1506_v54 = vsel %vm1505_vm13, 1, %v2000_v21 }
 0x166   : > { %v1666_v32 = vsel %vm1664_vm11, %v1655_v25, 0.0  ;;  %v1694_v26 = vmul.f32 %v1655_v25, %v1264_v48  ;;  %v1091_v35 = vadd.f32 %v1069_v43, %v1012_v50  ;;  %v1013_v50 = vadd.f32 %v992_v58, %v2500_v2  ;;  %vm2791_vm0 = vmand %vm1589_vm14, %vm1579_vm12 }
 0x167   : > { %v1667_v40 = vadd.f32 %v1666_v32, %v1665_v55  ;;  %v1498_v2 = vshrl.u32 %v2732_v22, 16  ;;  %v1523_v5 = vmul.u32 52428, %v1519_v24  ;;  %v1248_v34 = vpop.f32.mrf.mxu0  ;;  %v1522_v55 = vmul.u32 52429, %v1519_v24 }
 0x168   : > { %v1704_v15 = vsel %vm1664_vm11, %v1694_v26, 0.0  ;;  %v1189_v52 = vadd.f32 %v2673_v33, %v1091_v35  ;;  %v1481_v33 = vadd.s32 %v1480_v37, %v1471_v44  ;;  %v1524_v38 = vmul.u32 52429, %v1520_v56 }
 0x169   : > { %v1705_v10 = vadd.f32 %v1704_v15, %v1703_v42  ;;  %v1172_v1 = vpop.f32.mrf.mxu3  ;;  %v1934_v12 = vsel %vm2761_vm9, 1.0, %v2001_v6  ;;  %v1609_v20 = vadd.s32 10, %v2753_v36  ;;  %v997_v42 = vpop.f32.mrf.mxu1  ;;  %v1525_v3 = vmul.u32 52428, %v1520_v56 }
 0x16a   : > { %v1265_v60 = vadd.f32 %v2687_v61, %v1189_v52  ;;  %v1504_v61 = vadd.s32 %v1502_v47, %v1496_v7  ;;  %v1482_v11 = vshrl.u32 %v1481_v33, 3  ;;  %v1526_v53 = vshll.u32 %v1523_v5, 16 }
 0x16b   : > { %vm1628_vm15 = vcmp.lt.s32.totalorder %v1618_v59, 8  ;;  %v1528_v35 = vshll.u32 %v1524_v38, 16  ;;  %v1014_v44 = vadd.f32 %v995_v17, %v2510_v29  ;;  %v1619_v52 = vsel %vm2791_vm0, %v1609_v20, %v2753_v36 }
 0x16c   : > { %v1656_v51 = vmul.f32 %v1933_v46, %v1265_v60  ;;  %1731 = vst.msk [vmem:[%s2671_s29 + $0x10] sm:$0xff] %vm1664_vm11, %v1265_v60  ;;  %v1508_v31 = vadd.s32 %v1506_v54, %v1504_v61  ;;  %v1483_v32 = vmul.u32 10, %v1482_v11  ;;  %vm1530_vm1 = vc.u32 %v1522_v55, %v1526_v53 }
 0x16d   : > { %v1071_v58 = vpop.f32.mrf.mxu2  ;;  %v1532_v16 = vadd.s32 %v1526_v53, %v1522_v55  ;;  %v1935_v15 = vsel %vm1628_vm15, 1.0, %v2001_v6  ;;  %v2804_v7 = vadd.s32 72, %v2497_v63  ;;  %v1527_v59 = vshrl.u32 %v1523_v5, 16 }
 0x16e   : > { %v1668_v8 = vsel %vm1664_vm11, %v1656_v51, 0.0  ;;  %v1695_v49 = vmul.f32 %v1656_v51, %v1265_v60  ;;  %v1092_v46 = vadd.f32 %v1071_v58, %v1013_v50  ;;  %v1509_v43 = vadd.s32 %v1508_v31, %v1498_v2 }
 0x16f   : > { %v1669_v48 = vadd.f32 %v1668_v8, %v1667_v40  ;;  %v2808_v23 = vsub.s32 %v2651_v62, %v1483_v32  ;;  %vm1534_vm2 = vc.u32 %v1532_v16, %v1528_v35  ;;  %v1548_v63 = vand.u32 65535, %v2804_v7  ;;  %v1250_v51 = vpop.f32.mrf.mxu0 }
 0x170   : > { %v1706_v22 = vsel %vm1664_vm11, %v1695_v49, 0.0  ;;  %v1190_v25 = vadd.f32 %v1169_v45, %v1092_v46  ;;  %v1510_v26 = vadd.s32 %v1509_v43, %v1500_v30  ;;  %v1535_v47 = vsel %vm1534_vm2, 1, %v2000_v21 }
 0x171   : > { %v1707_v18 = vadd.f32 %v1706_v22, %v1705_v10  ;;  %v1174_v50 = vpop.f32.mrf.mxu3  ;;  %v1529_v2 = vshrl.u32 %v1524_v38, 16  ;;  %v1549_v62 = vshrl.u32 %v2804_v7, 16  ;;  %v1552_v30 = vmul.u32 52428, %v1548_v63  ;;  %v1000_v56 = vpop.f32.mrf.mxu1 }
 0x172   : > { %v1266_v13 = vadd.f32 %v1245_v27, %v1190_v25  ;;  %v1531_v27 = vsel %vm1530_vm1, 1, %v2000_v21  ;;  %v1511_v60 = vshrl.u32 %v1510_v26, 3  ;;  %v1015_v54 = vadd.f32 %v997_v42, %v2524_v0 }
 0x173   : > { %v1533_v37 = vadd.s32 %v1531_v27, %v1525_v3  ;;  %vm2815_vm3 = vcmp.lt.s32.totalorder %v1619_v52, 8  ;;  %vm1580_vm4 = vcmp.ne.s32.totalorder %v2808_v23, 0  ;;  %v1553_v46 = vmul.u32 52429, %v1549_v62 }
 0x174   : > { %v1657_v40 = vmul.f32 %v1934_v12, %v1266_v13  ;;  %1732 = vst.msk [vmem:[%s2671_s29 + $0x18] sm:$0xff] %vm1664_vm11, %v1266_v13  ;;  %v1512_v49 = vmul.u32 10, %v1511_v60  ;;  %vm1590_vm5 = vcmp.lt.s32.totalorder %v2808_v23, 0  ;;  %v1555_v31 = vshll.u32 %v1552_v30, 16 }
 0x175   : > { %v1074_v39 = vpop.f32.mrf.mxu2  ;;  %v1537_v61 = vadd.s32 %v1535_v47, %v1533_v37  ;;  %v1936_v25 = vsel %vm2815_vm3, 1.0, %v2001_v6  ;;  %v1610_v12 = vadd.s32 10, %v2808_v23  ;;  %v1554_v20 = vmul.u32 52428, %v1549_v62  ;;  %vm2831_vm6 = vmand %vm1590_vm5, %vm1580_vm4 }
 0x176   : > { %v1670_v10 = vsel %vm1664_vm11, %v1657_v40, 0.0  ;;  %v1696_v29 = vmul.f32 %v1657_v40, %v1266_v13  ;;  %v1093_v17 = vadd.f32 %v1074_v39, %v1014_v44  ;;  %v1513_v3 = vsub.s32 %v2707_v57, %v1512_v49 }
 0x177   : > { %v1671_v19 = vadd.f32 %v1670_v10, %v1669_v48  ;;  %v1557_v53 = vshll.u32 %v1553_v46, 16  ;;  %v1253_v40 = vpop.f32.mrf.mxu0  ;;  %v1620_v27 = vsel %vm2831_vm6, %v1610_v12, %v2808_v23  ;;  %v1556_v16 = vshrl.u32 %v1552_v30, 16 }
 0x178   : > { %v1708_v33 = vsel %vm1664_vm11, %v1696_v29, 0.0  ;;  %v1191_v36 = vadd.f32 %v1172_v1, %v1093_v17  ;;  %v1538_v1 = vadd.s32 %v1537_v61, %v1527_v59  ;;  %v1016_v57 = vadd.f32 %v1000_v56, %v2538_v28 }
 0x179   : > { %v1709_v24 = vadd.f32 %v1708_v33, %v1707_v18  ;;  %v1177_v45 = vpop.f32.mrf.mxu3  ;;  %vm1581_vm9 = vcmp.ne.s32.totalorder %v1513_v3, 0  ;;  %v1002_v37 = vpop.f32.mrf.mxu1  ;;  %vm1591_vm10 = vcmp.lt.s32.totalorder %v1513_v3, 0  ;;  %v1558_v17 = vshrl.u32 %v1553_v46, 16 }
 0x17a   : > { %v1267_v58 = vadd.f32 %v1248_v34, %v1191_v36  ;;  %v1539_v48 = vadd.s32 %v1538_v1, %v1529_v2  ;;  %v1551_v34 = vmul.u32 52429, %v1548_v63  ;;  %vm1630_vm12 = vcmp.lt.s32.totalorder %v1620_v27, 8  ;;  %vm2847_vm13 = vmand %vm1591_vm10, %vm1581_vm9 }
 0x17b   : > { %v1611_v28 = vadd.s32 10, %v1513_v3 }
 0x17c   : > { %v1658_v8 = vmul.f32 %v1935_v15, %v1267_v58  ;;  %1733 = vst.msk [vmem:[%s2671_s29 + $0x20] sm:$0xff] %vm1664_vm11, %v1267_v58  ;;  %v1540_v32 = vshrl.u32 %v1539_v48, 3  ;;  %vm1559_vm7 = vc.u32 %v1551_v34, %v1555_v31  ;;  %v1561_v26 = vadd.s32 %v1555_v31, %v1551_v34 }
 0x17d   : > { %v1076_v11 = vpop.f32.mrf.mxu2  ;;  %v1560_v44 = vsel %vm1559_vm7, 1, %v2000_v21  ;;  %vm1682_vm7 = vcmask 62464  }
 0x17e   : > { %v1672_v0 = vsel %vm1664_vm11, %v1658_v8, 0.0  ;;  %v1697_v55 = vmul.f32 %v1658_v8, %v1267_v58  ;;  %v1094_v38 = vadd.f32 %v1076_v11, %v1015_v54  ;;  %v1562_v39 = vadd.s32 %v1560_v44, %v1554_v20 }
 0x17f   : > { %v1673_v22 = vadd.f32 %v1672_v0, %v1671_v19  ;;  %vm1563_vm8 = vc.u32 %v1561_v26, %v1557_v53  ;;  %v1541_v29 = vmul.u32 10, %v1540_v32  ;;  %v1621_v58 = vsel %vm2847_vm13, %v1611_v28, %v1513_v3  ;;  %v1255_v5 = vpop.f32.mrf.mxu0 }
 0x180   : > { %v1710_v18 = vsel %vm1664_vm11, %v1697_v55, 0.0  ;;  %v1192_v42 = vadd.f32 %v1174_v50, %v1094_v38  ;;  %v1564_v52 = vsel %vm1563_vm8, 1, %v2000_v21  ;;  %v1017_v54 = vadd.f32 %v1002_v37, %v2574_v9 }
 0x181   : > { %v1711_v13 = vadd.f32 %v1710_v18, %v1709_v24  ;;  %v1566_v19 = vadd.s32 %v1564_v52, %v1562_v39  ;;  %v1937_v24 = vsel %vm1630_vm12, 1.0, %v2001_v6  ;;  %v1179_v62 = vpop.f32.mrf.mxu3  ;;  %vm1631_vm0 = vcmp.lt.s32.totalorder %v1621_v58, 8  ;;  %v1005_v11 = vpop.f32.mrf.mxu1 }
 0x182   : > { %v1268_v35 = vadd.f32 %v1250_v51, %v1192_v42  ;;  %v1542_v51 = vsub.s32 %v2757_v41, %v1541_v29  ;;  %v1938_v38 = vsel %vm1631_vm0, 1.0, %v2001_v6  ;;  %v1018_v20 = vadd.f32 %v1005_v11, %v2587_v14 }
 0x183   : > { %v1567_v33 = vadd.s32 %v1566_v19, %v1556_v16 }
 0x184   : > { %v1659_v15 = vmul.f32 %v1936_v25, %v1268_v35  ;;  %1734 = vst.msk [vmem:[%s2671_s29 + $0x28] sm:$0xff] %vm1664_vm11, %v1268_v35  ;;  %vm1582_vm14 = vcmp.ne.s32.totalorder %v1542_v51, 0  ;;  %vm1592_vm15 = vcmp.lt.s32.totalorder %v1542_v51, 0  ;;  %v1612_v34 = vadd.s32 10, %v1542_v51 }
 0x185   : > { %v1079_v10 = vpop.f32.mrf.mxu2  ;;  %v1568_v2 = vadd.s32 %v1567_v33, %v1558_v17  ;;  %vm2860_vm1 = vmand %vm1592_vm15, %vm1582_vm14 }
 0x186   : > { %v1674_v50 = vsel %vm1664_vm11, %v1659_v15, 0.0  ;;  %v1698_v23 = vmul.f32 %v1659_v15, %v1268_v35  ;;  %v1095_v60 = vadd.f32 %v1079_v10, %v1016_v57  ;;  %v1622_v12 = vsel %vm2860_vm1, %v1612_v34, %v1542_v51 }
 0x187   : > { %v1675_v59 = vadd.f32 %v1674_v50, %v1673_v22  ;;  %v1569_v30 = vshrl.u32 %v1568_v2, 3  ;;  %vm1632_vm4 = vcmp.lt.s32.totalorder %v1622_v12, 8 }
 0x188   : > { %v1712_v36 = vsel %vm1664_vm11, %v1698_v23, 0.0  ;;  %v1193_v47 = vadd.f32 %v1177_v45, %v1095_v60  ;;  %v1258_v45 = vpop.f32.mrf.mxu0 }
 0x189   : > { %v1713_v63 = vadd.f32 %v1712_v36, %v1711_v13  ;;  %v1570_v8 = vmul.u32 10, %v1569_v30  ;;  %v1182_v42 = vpop.f32.mrf.mxu3  ;;  %v1007_v14 = vpop.f32.mrf.mxu1 }
 0x18a   : > { %v1269_v61 = vadd.f32 %v1253_v40, %v1193_v47  ;;  %v1939_v40 = vsel %vm1632_vm4, 1.0, %v2001_v6  ;;  %v1019_v39 = vadd.f32 %v1007_v14, %v2635_v4 }
 0x18b   : > { %v1571_v22 = vsub.s32 %v2804_v7, %v1570_v8 }
 0x18c   : > { %v1660_v56 = vmul.f32 %v1937_v24, %v1269_v61  ;;  %1735 = vst.msk [vmem:[%s2671_s29 + $0x30] sm:$0xff] %vm1664_vm11, %v1269_v61 }
 0x18d   : > { %v1081_v1 = vpop.f32.mrf.mxu2  ;;  %vm1583_vm2 = vcmp.ne.s32.totalorder %v1571_v22, 0  ;;  %vm1593_vm3 = vcmp.lt.s32.totalorder %v1571_v22, 0  ;;  %v1613_v32 = vadd.s32 10, %v1571_v22 }
 0x18e   : > { %v1676_v49 = vsel %vm1664_vm11, %v1660_v56, 0.0  ;;  %v1699_v41 = vmul.f32 %v1660_v56, %v1269_v61  ;;  %v1096_v46 = vadd.f32 %v1081_v1, %v1017_v54  ;;  %vm1603_vm5 = vmand %vm1593_vm3, %vm1583_vm2 }
 0x18f   : > { %v1677_v48 = vadd.f32 %v1676_v49, %v1675_v59  ;;  %v1623_v16 = vsel %vm1603_vm5, %v1613_v32, %v1571_v22 }
 0x190   : > { %v1714_v31 = vsel %vm1664_vm11, %v1699_v41, 0.0  ;;  %v1194_v9 = vadd.f32 %v1179_v62, %v1096_v46  ;;  %vm1633_vm6 = vcmp.lt.s32.totalorder %v1623_v16, 8  ;;  %v1260_v60 = vpop.f32.mrf.mxu0 }
 0x191   : > { %v1715_v55 = vadd.f32 %v1714_v31, %v1713_v63  ;;  %v1184_v17 = vpop.f32.mrf.mxu3  ;;  %v1940_v4 = vsel %vm1633_vm6, 1.0, %v2001_v6 }
 0x192   : > { %v1270_v25 = vadd.f32 %v1255_v5, %v1194_v9 }
 0x194   : > { %v1661_v18 = vmul.f32 %v1938_v38, %v1270_v25  ;;  %1736 = vst.msk [vmem:[%s2671_s29 + $0x38] sm:$0xff] %vm1664_vm11, %v1270_v25 }
 0x195   : > { %v1084_v43 = vpop.f32.mrf.mxu2 }
 0x196   : > { %v1678_v3 = vsel %vm1664_vm11, %v1661_v18, 0.0  ;;  %v1700_v53 = vmul.f32 %v1661_v18, %v1270_v25  ;;  %v1097_v13 = vadd.f32 %v1084_v43, %v1018_v20 }
 0x197   : > { %v1679_v7 = vadd.f32 %v1678_v3, %v1677_v48 }
 0x198   : > { %v1716_v26 = vsel %vm1664_vm11, %v1700_v53, 0.0  ;;  %v1195_v35 = vadd.f32 %v1182_v42, %v1097_v13 }
 0x199   : > { %v1717_v44 = vadd.f32 %v1716_v26, %v1715_v55 }
 0x19a   : > { %v1271_v27 = vadd.f32 %v1258_v45, %v1195_v35 }
 0x19c   : > { %v1662_v57 = vmul.f32 %v1939_v40, %v1271_v27  ;;  %1737 = vst.msk [vmem:[%s2671_s29 + $0x40] sm:$0xff] %vm1664_vm11, %v1271_v27 }
 0x19d   : > { %v1086_v15 = vpop.f32.mrf.mxu2 }
 0x19e   : > { %v1680_v52 = vsel %vm1664_vm11, %v1662_v57, 0.0  ;;  %v1701_v37 = vmul.f32 %v1662_v57, %v1271_v27  ;;  %v1098_v10 = vadd.f32 %v1086_v15, %v1019_v39 }
 0x19f   : > { %v1681_v29 = vadd.f32 %v1680_v52, %v1679_v7 }
 0x1a0   : > { %v1718_v19 = vsel %vm1664_vm11, %v1701_v37, 0.0  ;;  %v1196_v50 = vadd.f32 %v1184_v17, %v1098_v10  ;;  %vm1691_vm11 = vcmask 57344  }
 0x1a1   : > { %v1719_v23 = vadd.f32 %v1718_v19, %v1717_v44 }
 0x1a2   : > { %v1272_v59 = vadd.f32 %v1260_v60, %v1196_v50 }
 0x1a4   : > { %v1663_v28 = vmul.f32 %v1940_v4, %v1272_v59  ;;  %1738 = vst.msk [vmem:[%s2671_s29 + $0x48] sm:$0x3f] %vm1682_vm7, %v1272_v59 }
 0x1a6   : > { %v1683_v33 = vsel %vm1682_vm7, %v1663_v28, 0.0  ;;  %v1702_v36 = vmul.f32 %v1663_v28, %v1272_v59 }
 0x1a7   : > { %v1684_v47 = vadd.f32 %v1683_v33, %v1681_v29 }
 0x1a8   : > { %v1720_v21 = vsel %vm1682_vm7, %v1702_v36, 0.0 }
 0x1a9   : > { %v1685_v63 = vrot.slane %v1684_v47, 4  ;;  %v1721_v24 = vadd.f32 %v1720_v21, %v1719_v23 }
 0x1ab   : > { %v1686_v51 = vadd.f32 %v1685_v63, %v1684_v47  ;;  %v1722_v2 = vrot.slane %v1721_v24, 4 }
 0x1ad   : > { %v1687_v61 = vrot.slane %v1686_v51, 2  ;;  %v1723_v62 = vadd.f32 %v1722_v2, %v1721_v24 }
 0x1af   : > { %v1688_v58 = vadd.f32 %v1687_v61, %v1686_v51  ;;  %v1724_v30 = vrot.slane %v1723_v62, 2 }
 0x1b1   : > { %v1689_v54 = vrot.slane %v1688_v58, 1  ;;  %v1725_v56 = vadd.f32 %v1724_v30, %v1723_v62 }
 0x1b3   : > { %v1690_v6 = vadd.f32 %v1689_v54, %v1688_v58  ;;  %v1726_v5 = vrot.slane %v1725_v56, 1 }
 0x1b5   : > { %1692 = vst.msk [vmem:[%s421_s6] sm:$0x1] %vm1691_vm11, %v1690_v6  ;;  %v1727_v1 = vadd.f32 %v1726_v5, %v1725_v56 }
 0x1b7   : > { %1728 = vst.msk [vmem:[%s421_s6 + $0x1] sm:$0x1] %vm1691_vm11, %v1727_v1 }
 0x1b8 PF: > { %p11_p9 = scmp.ge.s32.totalorder %s2039_s16, 4   ;;  %s2928_s12 = smov %s1994_s13 }
 0x1b9   : > { %s2929_s13 = smov %s2048_s19  ;;  %s2930_s14 = smov %s2039_s16 }
 0x1ba   :  { %13 = sbr.rel (!%p11_p9) target bundleno = 2 (0x2), region = 124 }

// kernel: downscale_forward.4
= control target key start
LH: loop header
LB: loop body
LE: loop exit
PB: predicated region body
PF: predicated region fallthrough
CT: control target
= control target key end

     0   :  { %s1768_s18 = smov 0   ;;  %s2385_s0 = inlined_call_operand.vmem [shape: f32[2,78,8], index: 0, kind: input, shape index: {}]   ;;  %s2386_s1 = inlined_call_operand.vmem [shape: f32[1,8], index: 1, kind: input, shape index: {}]   ;;  %s2387_s2 = inlined_call_operand.vmem [shape: f32[1,8], index: 2, kind: input, shape index: {}]   ;;  %s2388_s3 = inlined_call_operand.vmem [shape: bf16[9,8,8], index: 3, kind: input, shape index: {}]   ;;  %s2389_s4 = inlined_call_operand.vmem [shape: f32[2,78,8], index: 4, kind: output, shape index: {0}]   ;;  %s2390_s5 = inlined_call_operand.vmem [shape: f32[2,2,8], index: 5, kind: output, shape index: {1}]  }
   0x1 LB: > { %s1639_s19 = sadd.s32 4294967295, %s1734_s18   ;;  %p1643_p0 = scmp.ge.s32.totalorder %s1734_s18, 1  ;;  %s1734_s18 = sphi %s1768_s18, %s16_s18  }
   0x2   : > { %p190_p1 = scmp.lt.s32.totalorder %s1734_s18, 3 }
   0x4   : > { %p191_p2 = pnand %p1643_p0, %p190_p1 }
   0x5   : > { %p1812_p3 = scmp.lt.s32.totalorder (!%p191_p2), %s1639_s19, 1 }
   0x6   : > { %194 = sbr.rel (%p191_p2) target bundleno = 446 (0x1be), region = 36 }
   0xb   : > { %v1657_v0 = vld [vmem:[%s2388_s3 + $0x4] sm:$0xf]  ;;  %vm778_vm0 = vcmask 1043456   ;;  %v237_v1 = vlaneseq  ;;  %v1736_v34 = vmov 0   ;;  %s2401_s19 = smov (!%p1812_p3, %s1639_s19), 1 }
   0xc   : > { %v780_v2 = vsel %vm778_vm0, %v1657_v0, 0  ;;  %s1715_s23 = smul.u32 80, %s2401_s19 }
   0xd   : > { %1712 = vmatpush.bf16.msra.mxu1 %v780_v2  ;;  %1713 = vmatpush.bf16.msra.mxu2 %v780_v2  ;;  %v1780_v3 = vshrl.u32 %v237_v1, 7 }
   0xe   : > { %1714 = vmatpush.bf16.msra.mxu3 %v780_v2  ;;  %789 = vmatpush.bf16.msra.mxu0 %v780_v2  ;;  %s1835_s26 = scalar_lea.vmem %s2385_s0, %s1715_s23  ;;  %s2317_s27 = scalar_lea.vmem %s2389_s4, %s1715_s23 }
   0xf   : > { %v1783_v4 = vadd.s32 8, %v1780_v3  ;;  %v1786_v5 = vadd.s32 16, %v1780_v3  ;;  %v1789_v6 = vadd.s32 24, %v1780_v3  ;;  %v1792_v7 = vadd.s32 32, %v1780_v3  ;;  %s1646_s23 = sshll.u32 %s2401_s19, 1 }
  0x10   : > { %v251_v8 = vand.u32 65535, %v1780_v3  ;;  %v252_v9 = vshrl.u32 %v1780_v3, 16  ;;  %v1797_v10 = vadd.s32 40, %v1780_v3  ;;  %s235_s30 = scalar_lea.vmem %s2390_s5, %s1646_s23 }
  0x11   : > { %v280_v11 = vand.u32 65535, %v1783_v4  ;;  %v281_v12 = vshrl.u32 %v1783_v4, 16  ;;  %v309_v13 = vand.u32 65535, %v1786_v5  ;;  %v310_v14 = vshrl.u32 %v1786_v5, 16 }
  0x12   : > { %v254_v15 = vmul.u32 52429, %v251_v8  ;;  %v255_v16 = vmul.u32 52428, %v251_v8  ;;  %v256_v17 = vmul.u32 52429, %v252_v9  ;;  %v257_v18 = vmul.u32 52428, %v252_v9 }
  0x13   : > { %v283_v19 = vmul.u32 52429, %v280_v11  ;;  %v284_v20 = vmul.u32 52428, %v280_v11  ;;  %v285_v21 = vmul.u32 52429, %v281_v12  ;;  %v286_v22 = vmul.u32 52428, %v281_v12 }
  0x14   : > { %v258_v23 = vshll.u32 %v255_v16, 16  ;;  %v259_v24 = vshrl.u32 %v255_v16, 16  ;;  %v260_v25 = vshll.u32 %v256_v17, 16  ;;  %v261_v26 = vshrl.u32 %v256_v17, 16 }
  0x15   : > { %v287_v27 = vshll.u32 %v284_v20, 16  ;;  %v288_v28 = vshrl.u32 %v284_v20, 16  ;;  %v289_v29 = vshll.u32 %v285_v21, 16  ;;  %v290_v30 = vshrl.u32 %v285_v21, 16 }
  0x16   : > { %vm262_vm1 = vc.u32 %v254_v15, %v258_v23  ;;  %v264_v31 = vadd.s32 %v258_v23, %v254_v15  ;;  %v312_v32 = vmul.u32 52429, %v309_v13  ;;  %v313_v33 = vmul.u32 52428, %v309_v13 }
  0x17   : > { %v263_v35 = vsel %vm262_vm1, 1, %v1736_v34  ;;  %vm291_vm2 = vc.u32 %v283_v19, %v287_v27  ;;  %v293_v36 = vadd.s32 %v287_v27, %v283_v19  ;;  %v314_v37 = vmul.u32 52429, %v310_v14 }
  0x18   : > { %v265_v38 = vadd.s32 %v263_v35, %v257_v18  ;;  %vm266_vm3 = vc.u32 %v264_v31, %v260_v25  ;;  %v292_v39 = vsel %vm291_vm2, 1, %v1736_v34  ;;  %v315_v40 = vmul.u32 52428, %v310_v14 }
  0x19   : > { %v267_v41 = vsel %vm266_vm3, 1, %v1736_v34  ;;  %v294_v42 = vadd.s32 %v292_v39, %v286_v22  ;;  %vm295_vm4 = vc.u32 %v293_v36, %v289_v29  ;;  %v316_v43 = vshll.u32 %v313_v33, 16 }
  0x1a   : > { %v269_v44 = vadd.s32 %v267_v41, %v265_v38  ;;  %v296_v45 = vsel %vm295_vm4, 1, %v1736_v34  ;;  %v317_v46 = vshrl.u32 %v313_v33, 16  ;;  %v318_v47 = vshll.u32 %v314_v37, 16 }
  0x1b   : > { %v298_v48 = vadd.s32 %v296_v45, %v294_v42  ;;  %v319_v49 = vshrl.u32 %v314_v37, 16  ;;  %vm320_vm5 = vc.u32 %v312_v32, %v316_v43  ;;  %v322_v50 = vadd.s32 %v316_v43, %v312_v32 }
  0x1c   : > { %v270_v51 = vadd.s32 %v269_v44, %v259_v24  ;;  %v321_v52 = vsel %vm320_vm5, 1, %v1736_v34  ;;  %v338_v53 = vand.u32 65535, %v1789_v6  ;;  %v339_v54 = vshrl.u32 %v1789_v6, 16 }
  0x1d   : > { %v299_v55 = vadd.s32 %v298_v48, %v288_v28  ;;  %v323_v56 = vadd.s32 %v321_v52, %v315_v40  ;;  %vm324_vm6 = vc.u32 %v322_v50, %v318_v47  ;;  %v367_v57 = vand.u32 65535, %v1792_v7  ;;  %v1851_v47 = vld [vmem:[%s2386_s1] ss:$0 sm:$0xff] }
  0x1e   : > { %v271_v58 = vadd.s32 %v270_v51, %v261_v26  ;;  %v325_v59 = vsel %vm324_vm6, 1, %v1736_v34  ;;  %v341_v60 = vmul.u32 52429, %v338_v53  ;;  %v342_v61 = vmul.u32 52428, %v338_v53  ;;  %v618_v52 = vld [vmem:[%s1835_s26] sm:$0xff]  ;;  %v619_v53 = vld [vmem:[%s1835_s26 + $0x8] sm:$0xff] }
  0x1f   : > { %v300_v62 = vadd.s32 %v299_v55, %v290_v30  ;;  %v327_v63 = vadd.s32 %v325_v59, %v323_v56  ;;  %v343_v0 = vmul.u32 52429, %v339_v54  ;;  %v344_v1 = vmul.u32 52428, %v339_v54  ;;  %v620_v55 = vld [vmem:[%s1835_s26 + $0x10] sm:$0xff]  ;;  %v621_v56 = vld [vmem:[%s1835_s26 + $0x18] sm:$0xff] }
  0x20   : > { %v272_v2 = vshrl.u32 %v271_v58, 3  ;;  %v345_v8 = vshll.u32 %v342_v61, 16  ;;  %v346_v9 = vshrl.u32 %v342_v61, 16  ;;  %v368_v11 = vshrl.u32 %v1792_v7, 16  ;;  %v622_v61 = vld [vmem:[%s1835_s26 + $0x20] sm:$0xff] }
  0x21   : > { %v301_v12 = vshrl.u32 %v300_v62, 3  ;;  %v328_v13 = vadd.s32 %v327_v63, %v317_v46  ;;  %v347_v14 = vshll.u32 %v343_v0, 16  ;;  %v348_v15 = vshrl.u32 %v343_v0, 16 }
  0x22   : > { %v273_v16 = vmul.u32 10, %v272_v2  ;;  %vm349_vm7 = vc.u32 %v341_v60, %v345_v8  ;;  %v351_v17 = vadd.s32 %v345_v8, %v341_v60  ;;  %v370_v18 = vmul.u32 52429, %v367_v57 }
  0x23   : > { %v302_v19 = vmul.u32 10, %v301_v12  ;;  %v329_v20 = vadd.s32 %v328_v13, %v319_v49  ;;  %v350_v21 = vsel %vm349_vm7, 1, %v1736_v34  ;;  %v371_v22 = vmul.u32 52428, %v367_v57  ;;  %v1864_v57 = vld [vmem:[%s2387_s2] ss:$0 sm:$0xff] }
  0x24   : > { %v274_v23 = vsub.s32 %v1780_v3, %v273_v16  ;;  %v352_v24 = vadd.s32 %v350_v21, %v344_v1  ;;  %vm353_vm8 = vc.u32 %v351_v17, %v347_v14  ;;  %v372_v25 = vmul.u32 52429, %v368_v11 }
  0x25   : > { %v303_v26 = vsub.s32 %v1783_v4, %v302_v19  ;;  %v330_v27 = vshrl.u32 %v329_v20, 3  ;;  %v354_v28 = vsel %vm353_vm8, 1, %v1736_v34  ;;  %v373_v29 = vmul.u32 52428, %v368_v11 }
  0x26   : > { %v356_v30 = vadd.s32 %v354_v28, %v352_v24  ;;  %v374_v31 = vshll.u32 %v371_v22, 16  ;;  %v375_v32 = vshrl.u32 %v371_v22, 16  ;;  %v376_v33 = vshll.u32 %v372_v25, 16 }
  0x27   : > { %v331_v35 = vmul.u32 10, %v330_v27  ;;  %v377_v36 = vshrl.u32 %v372_v25, 16  ;;  %vm538_vm9 = vcmp.ne.s32.totalorder %v274_v23, 0  ;;  %vm539_vm10 = vcmp.ne.s32.totalorder %v303_v26, 0 }
  0x28   : > { %v357_v37 = vadd.s32 %v356_v30, %v346_v9  ;;  %vm378_vm11 = vc.u32 %v370_v18, %v374_v31  ;;  %v380_v38 = vadd.s32 %v374_v31, %v370_v18  ;;  %vm548_vm12 = vcmp.lt.s32.totalorder %v274_v23, 0 }
  0x29   : > { %v332_v4 = vsub.s32 %v1786_v5, %v331_v35  ;;  %v379_v39 = vsel %vm378_vm11, 1, %v1736_v34  ;;  %vm549_vm13 = vcmp.lt.s32.totalorder %v303_v26, 0  ;;  %vm1839_vm14 = vmand %vm548_vm12, %vm538_vm9  ;;  %v568_v41 = vadd.s32 10, %v274_v23 }
  0x2a   : > { %v358_v42 = vadd.s32 %v357_v37, %v348_v15  ;;  %v381_v43 = vadd.s32 %v379_v39, %v373_v29  ;;  %vm382_vm15 = vc.u32 %v380_v38, %v376_v33  ;;  %vm1843_vm1 = vmand %vm549_vm13, %vm539_vm10  ;;  %v569_v45 = vadd.s32 10, %v303_v26 }
  0x2b   : > { %v383_v5 = vsel %vm382_vm15, 1, %v1736_v34  ;;  %vm540_vm2 = vcmp.ne.s32.totalorder %v332_v4, 0  ;;  %vm550_vm3 = vcmp.lt.s32.totalorder %v332_v4, 0  ;;  %v570_v46 = vadd.s32 10, %v332_v4 }
  0x2c   : > { %v359_v48 = vshrl.u32 %v358_v42, 3  ;;  %v385_v49 = vadd.s32 %v383_v5, %v381_v43  ;;  %vm560_vm4 = vmand %vm550_vm3, %vm540_vm2  ;;  %v578_v50 = vsel %vm1839_vm14, %v568_v41, %v274_v23  ;;  %v579_v51 = vsel %vm1843_vm1, %v569_v45, %v303_v26 }
  0x2d   : > { %v580_v54 = vsel %vm560_vm4, %v570_v46, %v332_v4  ;;  %vm588_vm5 = vcmp.lt.s32.totalorder %v578_v50, 8  ;;  %vm1866_vm6 = vcmp.lt.s32.totalorder %v579_v51, 8  ;;  %v1872_v62 = vadd.s32 48, %v1780_v3 }
  0x2e   : > { %v360_v58 = vmul.u32 10, %v359_v48  ;;  %v386_v59 = vadd.s32 %v385_v49, %v375_v32  ;;  %vm1874_vm7 = vcmp.lt.s32.totalorder %v580_v54, 8  ;;  %v1737_v0 = vmov 0.0  }
  0x2f   : > { %v1879_v1 = vsel %vm588_vm5, 1.0, %v1737_v0  ;;  %v632_v2 = vmul.f32 %v1851_v47, %v618_v52  ;;  %v633_v8 = vmul.f32 %v1851_v47, %v619_v53  ;;  %v634_v12 = vmul.f32 %v1851_v47, %v620_v55 }
  0x30   : > { %v361_v9 = vsub.s32 %v1789_v6, %v360_v58  ;;  %v387_v11 = vadd.s32 %v386_v59, %v377_v36  ;;  %v635_v13 = vmul.f32 %v1851_v47, %v621_v56  ;;  %v636_v14 = vmul.f32 %v1851_v47, %v622_v61  ;;  %v623_v56 = vld [vmem:[%s1835_s26 + $0x28] sm:$0xff]  ;;  %v624_v58 = vld [vmem:[%s1835_s26 + $0x30] sm:$0xff] }
  0x31   : > { %v646_v15 = vadd.f32 %v1864_v57, %v632_v2  ;;  %v647_v16 = vadd.f32 %v1864_v57, %v633_v8  ;;  %vm676_vm8 = vcmask 64512   ;;  %v1894_v6 = vsel %vm1866_vm6, 1.0, %v1737_v0 }
  0x32   : > { %v388_v17 = vshrl.u32 %v387_v11, 3  ;;  %vm541_vm9 = vcmp.ne.s32.totalorder %v361_v9, 0  ;;  %vm551_vm10 = vcmp.lt.s32.totalorder %v361_v9, 0  ;;  %v571_v18 = vadd.s32 10, %v361_v9  ;;  %678 = vst.msk [vmem:[#allocation2 + $0x8] sm:$0xff] %vm676_vm8, %v1737_v0 }
  0x33   : > { %vm561_vm11 = vmand %vm551_vm10, %vm541_vm9  ;;  %v648_v19 = vadd.f32 %v1864_v57, %v634_v12  ;;  %v649_v20 = vadd.f32 %v1864_v57, %v635_v13  ;;  %v656_v21 = vmax.f32 %v646_v15, 0.0  ;;  %679 = vst.msk [vmem:[#allocation2 + $0x10] sm:$0xff] %vm676_vm8, %v1737_v0  ;;  %v1903_v24 = vsel %vm1874_vm7, 1.0, %v1737_v0 }
  0x34   : > { %v389_v22 = vmul.u32 10, %v388_v17  ;;  %v581_v23 = vsel %vm561_vm11, %v571_v18, %v361_v9  ;;  %v657_v25 = vmax.f32 %v647_v16, 0.0  ;;  %680 = vst.msk [vmem:[#allocation2 + $0x18] sm:$0xff] %vm676_vm8, %v1737_v0  ;;  %v650_v26 = vadd.f32 %v1864_v57, %v636_v14 }
  0x35   : > { %vm591_vm12 = vcmp.lt.s32.totalorder %v581_v23, 8  ;;  %v658_v27 = vmax.f32 %v648_v19, 0.0  ;;  %v659_v28 = vmax.f32 %v649_v20, 0.0  ;;  %681 = vst.msk [vmem:[#allocation2 + $0x20] sm:$0xff] %vm676_vm8, %v1737_v0  ;;  %v666_v31 = vmul.f32 %v1879_v1, %v656_v21 }
  0x36   : > { %v390_v29 = vsub.s32 %v1792_v7, %v389_v22  ;;  %v1912_v30 = vsel %vm591_vm12, 1.0, %v1737_v0  ;;  %v667_v32 = vmul.f32 %v1894_v6, %v657_v25  ;;  %682 = vst.msk [vmem:[#allocation2 + $0x28] sm:$0xff] %vm676_vm8, %v1737_v0  ;;  %v396_v36 = vand.u32 65535, %v1797_v10 }
  0x37   : > { %v668_v33 = vmul.f32 %v1903_v24, %v658_v27  ;;  %v669_v35 = vmul.f32 %v1912_v30, %v659_v28  ;;  %683 = vst.msk [vmem:[#allocation2 + $0x30] sm:$0xff] %vm676_vm8, %v1737_v0  ;;  %v397_v7 = vshrl.u32 %v1797_v10, 16  ;;  %v425_v38 = vand.u32 65535, %v1872_v62 }
  0x38   : > { %vm542_vm13 = vcmp.ne.s32.totalorder %v390_v29, 0  ;;  %vm552_vm14 = vcmp.lt.s32.totalorder %v390_v29, 0  ;;  %v572_v37 = vadd.s32 10, %v390_v29  ;;  %691 = vst.msk [vmem:[#allocation2 + $0xb] sm:$0xff] %vm676_vm8, %v666_v31  ;;  %v660_v4 = vmax.f32 %v650_v26, 0.0 }
  0x39   : > { %vm562_vm15 = vmand %vm552_vm14, %vm542_vm13  ;;  %692 = vst.msk [vmem:[#allocation2 + $0x13] sm:$0xff] %vm676_vm8, %v667_v32  ;;  %v399_v39 = vmul.u32 52429, %v396_v36  ;;  %v400_v40 = vmul.u32 52428, %v396_v36  ;;  %v401_v41 = vmul.u32 52429, %v397_v7  ;;  %v402_v43 = vmul.u32 52428, %v397_v7 }
  0x3a   : > { %v582_v42 = vsel %vm562_vm15, %v572_v37, %v390_v29  ;;  %693 = vst.msk [vmem:[#allocation2 + $0x1b] sm:$0xff] %vm676_vm8, %v668_v33  ;;  %v426_v44 = vshrl.u32 %v1872_v62, 16  ;;  %v429_v45 = vmul.u32 52428, %v425_v38  ;;  %v428_v48 = vmul.u32 52429, %v425_v38 }
  0x3b   : > { %vm592_vm1 = vcmp.lt.s32.totalorder %v582_v42, 8  ;;  %694 = vst.msk [vmem:[#allocation2 + $0x23] sm:$0xff] %vm676_vm8, %v669_v35  ;;  %v403_v5 = vshll.u32 %v400_v40, 16  ;;  %v405_v46 = vshll.u32 %v401_v41, 16  ;;  %v404_v50 = vshrl.u32 %v400_v40, 16 }
  0x3c   : > { %v1931_v49 = vsel %vm592_vm1, 1.0, %v1737_v0  ;;  %677 = vst.msk [vmem:[#allocation2] sm:$0xff] %vm676_vm8, %v1737_v0  ;;  %v430_v51 = vmul.u32 52429, %v426_v44  ;;  %v431_v52 = vmul.u32 52428, %v426_v44  ;;  %v432_v55 = vshll.u32 %v429_v45, 16 }
  0x3d   : > { %v670_v53 = vmul.f32 %v1931_v49, %v660_v4  ;;  %684 = vst.msk [vmem:[#allocation2 + $0x38] sm:$0xff] %vm676_vm8, %v1737_v0  ;;  %vm407_vm2 = vc.u32 %v399_v39, %v403_v5  ;;  %v409_v54 = vadd.s32 %v403_v5, %v399_v39  ;;  %v406_v59 = vshrl.u32 %v401_v41, 16  ;;  %v1668_v35 = vld [vmem:[%s2388_s3 + $0x8] sm:$0xf] }
  0x3e   : > { %685 = vst.msk [vmem:[#allocation2 + $0x40] sm:$0xff] %vm676_vm8, %v1737_v0  ;;  %v408_v60 = vsel %vm407_vm2, 1, %v1736_v34  ;;  %v433_v61 = vshrl.u32 %v429_v45, 16  ;;  %v434_v63 = vshll.u32 %v430_v51, 16  ;;  %vm436_vm4 = vc.u32 %v428_v48, %v432_v55 }
  0x3f   : > { %695 = vst.msk [vmem:[#allocation2 + $0x2b] sm:$0xff] %vm676_vm8, %v670_v53  ;;  %v410_v2 = vadd.s32 %v408_v60, %v402_v43  ;;  %vm411_vm3 = vc.u32 %v409_v54, %v405_v46  ;;  %v438_v8 = vadd.s32 %v432_v55, %v428_v48  ;;  %v437_v12 = vsel %vm436_vm4, 1, %v1736_v34 }
  0x40   : > { %v1944_v9 = vld [vmem:[#allocation2 + $0x10] sm:$0xff]  ;;  %686 = vst.msk [vmem:[#allocation2 + $0x48] sm:$0xff] %vm676_vm8, %v1737_v0  ;;  %v412_v11 = vsel %vm411_vm3, 1, %v1736_v34  ;;  %v637_v13 = vmul.f32 %v1851_v47, %v623_v56  ;;  %v638_v14 = vmul.f32 %v1851_v47, %v624_v58  ;;  %v439_v17 = vadd.s32 %v437_v12, %v431_v52 }
  0x41   : > { %v1952_v15 = vld [vmem:[#allocation2 + $0x18] sm:$0xff]  ;;  %687 = vst.msk [vmem:[#allocation2 + $0x50] sm:$0xff] %vm676_vm8, %v1737_v0  ;;  %v414_v16 = vadd.s32 %v412_v11, %v410_v2  ;;  %vm440_vm5 = vc.u32 %v438_v8, %v434_v63  ;;  %v1957_v18 = vadd.s32 56, %v1780_v3  ;;  %v435_v22 = vshrl.u32 %v430_v51, 16 }
  0x42   : > { %v1961_v19 = vpack.c.bf16 %v1952_v15, %v1944_v9  ;;  %688 = vst.msk [vmem:[#allocation2 + $0x58] sm:$0xff] %vm676_vm8, %v1737_v0  ;;  %v441_v20 = vsel %vm440_vm5, 1, %v1736_v34  ;;  %v1967_v26 = vld [vmem:[#allocation2 + $0x20] sm:$0xff]  ;;  %v1971_v28 = vadd.f32 %v1864_v57, %v637_v13  ;;  %v1974_v29 = vadd.f32 %v1864_v57, %v638_v14 }
  0x43   : > { %v415_v21 = vadd.s32 %v414_v16, %v404_v50  ;;  %v443_v23 = vadd.s32 %v441_v20, %v439_v17  ;;  %v454_v25 = vand.u32 65535, %v1957_v18  ;;  %v455_v36 = vshrl.u32 %v1957_v18, 16 }
  0x44   : > { %v732_v27 = vshll.u32 %v1961_v19, 16  ;;  %v736_v31 = vshrl.u32 %v1961_v19, 16  ;;  %v896_v38 = vsel %vm778_vm0, %v1668_v35, 0  ;;  %vm723_vm6 = vsmask.f32 7424 }
  0x45   : > { %v416_v32 = vadd.s32 %v415_v21, %v406_v59  ;;  %v444_v33 = vadd.s32 %v443_v23, %v433_v61  ;;  %v457_v4 = vmul.u32 52429, %v454_v25  ;;  %v458_v39 = vmul.u32 52428, %v454_v25  ;;  %905 = vmatpush.bf16.msrb.mxu2 %v896_v38 }
  0x46   : > { %v1981_v7 = vld [vmem:[#allocation2 + $0x28] sm:$0xff]  ;;  %v1985_v37 = vrot.slane %v732_v27, 1  ;;  %v459_v43 = vmul.u32 52429, %v455_v36  ;;  %v661_v44 = vmax.f32 %v1971_v28, 0.0  ;;  %v1994_v45 = vadd.s32 64, %v1780_v3 }
  0x47   : > { %v1990_v40 = vpack.c.bf16 %v1981_v7, %v1967_v26  ;;  %v417_v41 = vshrl.u32 %v416_v32, 3  ;;  %v445_v42 = vadd.s32 %v444_v33, %v435_v22  ;;  %v461_v5 = vshll.u32 %v458_v39, 16  ;;  %v625_v33 = vld [vmem:[%s1835_s26 + $0x38] sm:$0xff] }
  0x48   : > { %v738_v46 = vor.u32 %v736_v31, %v1985_v37  ;;  %v460_v52 = vmul.u32 52428, %v455_v36  ;;  %v463_v53 = vshll.u32 %v459_v43, 16  ;;  %v662_v59 = vmax.f32 %v1974_v29, 0.0 }
  0x49   : > { %v740_v48 = vshll.u32 %v1990_v40, 16  ;;  %v418_v50 = vmul.u32 10, %v417_v41  ;;  %v446_v51 = vshrl.u32 %v445_v42, 3  ;;  %vm465_vm7 = vc.u32 %v457_v4, %v461_v5 }
  0x4a   : > { %v467_v54 = vadd.s32 %v461_v5, %v457_v4  ;;  %v462_v60 = vshrl.u32 %v458_v39, 16  ;;  %v466_v61 = vsel %vm465_vm7, 1, %v1736_v34  ;;  %v483_v63 = vand.u32 65535, %v1994_v45 }
  0x4b   : > { %v2002_v55 = vrot.slane %v740_v48, 1  ;;  %v419_v56 = vsub.s32 %v1797_v10, %v418_v50  ;;  %v447_v58 = vmul.u32 10, %v446_v51  ;;  %v464_v11 = vshrl.u32 %v459_v43, 16 }
  0x4c   : > { %vm469_vm9 = vc.u32 %v467_v54, %v463_v53  ;;  %v468_v12 = vadd.s32 %v466_v61, %v460_v52  ;;  %v484_v16 = vshrl.u32 %v1994_v45, 16  ;;  %v487_v21 = vmul.u32 52428, %v483_v63 }
  0x4d   : > { %v743_v2 = vsel %vm723_vm6, %v738_v46, %v2002_v55  ;;  %v448_v8 = vsub.s32 %v1872_v62, %v447_v58  ;;  %vm543_vm10 = vcmp.ne.s32.totalorder %v419_v56, 0  ;;  %vm553_vm11 = vcmp.lt.s32.totalorder %v419_v56, 0  ;;  %v702_v58 = vld [vmem:[#allocation2] sm:$0xff] }
  0x4e   : > { %1659 = vmatmul.msk.bf16.vlgmr.msra.gmra.mxu1 %vm676_vm8, %v743_v2  ;;  %vm563_vm12 = vmand %vm553_vm11, %vm543_vm10  ;;  %v573_v10 = vadd.s32 10, %v419_v56  ;;  %v470_v13 = vsel %vm469_vm9, 1, %v1736_v34  ;;  %v486_v62 = vmul.u32 52429, %v483_v63  ;;  %v488_v23 = vmul.u32 52429, %v484_v16  ;;  %v626_v63 = vld [vmem:[%s1835_s26 + $0x40] sm:$0xff] }
  0x4f   : > { %vm544_vm13 = vcmp.ne.s32.totalorder %v448_v8, 0  ;;  %vm554_vm14 = vcmp.lt.s32.totalorder %v448_v8, 0  ;;  %v574_v14 = vadd.s32 10, %v448_v8  ;;  %v472_v20 = vadd.s32 %v470_v13, %v468_v12  ;;  %v720_v12 = vld [vmem:[%s2388_s3] sm:$0xf] }
  0x50   : > { %vm564_vm15 = vmand %vm554_vm14, %vm544_vm13  ;;  %v583_v17 = vsel %vm563_vm12, %v573_v10, %v419_v56  ;;  %v489_v25 = vmul.u32 52428, %v484_v16  ;;  %v490_v32 = vshll.u32 %v487_v21, 16  ;;  %v492_v38 = vshll.u32 %v488_v23, 16 }
  0x51   : > { %v584_v22 = vsel %vm564_vm15, %v574_v14, %v448_v8  ;;  %vm593_vm1 = vcmp.lt.s32.totalorder %v583_v17, 8  ;;  %v473_v29 = vadd.s32 %v472_v20, %v462_v60  ;;  %v639_v43 = vmul.f32 %v1851_v47, %v625_v33  ;;  %v1674_v20 = vld [vmem:[%s2388_s3 + $0xc] sm:$0xf] }
  0x52   : > { %vm594_vm2 = vcmp.lt.s32.totalorder %v584_v22, 8  ;;  %v2015_v28 = vsel %vm593_vm1, 1.0, %v1737_v0  ;;  %vm494_vm3 = vc.u32 %v486_v62, %v490_v32  ;;  %v496_v42 = vadd.s32 %v490_v32, %v486_v62 }
  0x53   : > { %v2019_v35 = vsel %vm594_vm2, 1.0, %v1737_v0  ;;  %v671_v36 = vmul.f32 %v2015_v28, %v661_v44  ;;  %v474_v39 = vadd.s32 %v473_v29, %v464_v11  ;;  %v495_v41 = vsel %vm494_vm3, 1, %v1736_v34 }
  0x54   : > { %v672_v4 = vmul.f32 %v2019_v35, %v662_v59  ;;  %v497_v46 = vadd.s32 %v495_v41, %v489_v25  ;;  %v491_v50 = vshrl.u32 %v487_v21, 16  ;;  %vm498_vm4 = vc.u32 %v496_v42, %v492_v38  ;;  %v703_v59 = vld [vmem:[#allocation2 + $0x8] sm:$0xff] }
  0x55   : > { %696 = vst.msk [vmem:[#allocation2 + $0x33] sm:$0xff] %vm676_vm8, %v671_v36  ;;  %v475_v5 = vshrl.u32 %v474_v39, 3  ;;  %v653_v44 = vadd.f32 %v1864_v57, %v639_v43  ;;  %v499_v52 = vsel %vm498_vm4, 1, %v1736_v34  ;;  %v493_v53 = vshrl.u32 %v488_v23, 16 }
  0x56   : > { %697 = vst.msk [vmem:[#allocation2 + $0x3b] sm:$0xff] %vm676_vm8, %v672_v4  ;;  %v501_v54 = vadd.s32 %v499_v52, %v497_v46  ;;  %v744_v60 = vshrl.u32 %v1990_v40, 16  ;;  %v2032_v8 = vpack.c.bf16 %v703_v59, %v702_v58  ;;  %v827_v14 = vsel %vm778_vm0, %v720_v12, 0  ;;  %v1692_v58 = vld [vmem:[%s2388_s3 + $0x18] sm:$0xf] }
  0x57   : > { %v476_v51 = vmul.u32 10, %v475_v5  ;;  %v663_v2 = vmax.f32 %v653_v44, 0.0  ;;  %v640_v22 = vmul.f32 %v1851_v47, %v626_v63  ;;  %836 = vmatpush.bf16.msrb.mxu1 %v827_v14  ;;  %v979_v23 = vsel %vm778_vm0, %v1674_v20, 0 }
  0x58   : > { %v502_v61 = vadd.s32 %v501_v54, %v491_v50  ;;  %v725_v16 = vshrl.u32 %v2032_v8, 16  ;;  %v727_v17 = vshll.u32 %v2032_v8, 16  ;;  %988 = vmatpush.bf16.msrb.mxu3 %v979_v23  ;;  %v746_v32 = vor.u32 %v744_v60, %v2002_v55 }
  0x59   : > { %v477_v56 = vsub.s32 %v1957_v18, %v476_v51  ;;  %v654_v42 = vadd.f32 %v1864_v57, %v640_v22  ;;  %v2083_v52 = vpack.c.bf16 %v1967_v26, %v1952_v15  ;;  %vm1028_vm15 = vsmask.f32 6400 }
  0x5a   : > { %v503_v18 = vadd.s32 %v502_v61, %v493_v53  ;;  %v729_v29 = vrot.slane %v727_v17, 1  ;;  %v1680_v53 = vld [vmem:[%s2388_s3 + $0x10] sm:$0xf] }
  0x5b   : > { %vm545_vm5 = vcmp.ne.s32.totalorder %v477_v56, 0  ;;  %vm555_vm7 = vcmp.lt.s32.totalorder %v477_v56, 0  ;;  %v575_v11 = vadd.s32 10, %v477_v56  ;;  %v664_v50 = vmax.f32 %v654_v42, 0.0 }
  0x5c   : > { %v2034_v10 = vld [vmem:[#allocation2 + $0x30] sm:$0xff]  ;;  %vm565_vm9 = vmand %vm555_vm7, %vm545_vm5  ;;  %v504_v25 = vshrl.u32 %v503_v18, 3  ;;  %v730_v39 = vor.u32 %v729_v29, %v725_v16  ;;  %v1038_v15 = vshrl.u32 %v2083_v52, 16  ;;  %v1041_v63 = vshll.u32 %v2083_v52, 16 }
  0x5d   : > { %v2039_v13 = vld [vmem:[#allocation2 + $0x38] sm:$0xff]  ;;  %v585_v21 = vsel %vm565_vm9, %v575_v11, %v477_v56  ;;  %v1094_v56 = vsel %vm778_vm0, %v1680_v53, 0  ;;  %v2102_v18 = vadd.s32 72, %v1780_v3  ;;  %vm700_vm7 = vcmask 62464  }
  0x5e   : > { %v2049_v62 = vpack.c.bf16 %v2039_v13, %v2034_v10  ;;  %vm595_vm10 = vcmp.lt.s32.totalorder %v585_v21, 8  ;;  %v505_v38 = vmul.u32 10, %v504_v25  ;;  %1663 = vmatmul.msk.bf16.vlgmr.msrb.gmra.mxu1 %vm676_vm8, %v2032_v8  ;;  %v735_v55 = vsel %vm723_vm6, %v730_v39, %v1985_v37  ;;  %1103 = vmatpush.bf16.msrb.mxu0 %v1094_v56 }
  0x5f   : > { %v2058_v36 = vsel %vm595_vm10, 1.0, %v1737_v0  ;;  %1658 = vmatmul.msk.bf16.vlgmr.msra.gmra.mxu0 %vm676_vm8, %v735_v55  ;;  %v2078_v37 = vpack.c.bf16 %v1944_v9, %v703_v59  ;;  %v1250_v59 = vsel %vm778_vm0, %v1692_v58, 0  ;;  %v1040_v11 = vrot.slane %v1038_v15, 1  ;;  %v1698_v55 = vld [vmem:[%s2388_s3 + $0x1c] sm:$0xf] }
  0x60   : > { %v748_v33 = vshll.u32 %v2049_v62, 16  ;;  %v673_v4 = vmul.f32 %v2058_v36, %v663_v2  ;;  %v506_v43 = vsub.s32 %v1994_v45, %v505_v38  ;;  %v1686_v2 = vld [vmem:[%s2388_s3 + $0x14] sm:$0xf]  ;;  %v752_v16 = vshrl.u32 %v2049_v62, 16 }
  0x61   : > { %v1030_v54 = vshrl.u32 %v2078_v37, 16  ;;  %v1033_v9 = vshll.u32 %v2078_v37, 16  ;;  %v1171_v12 = vsel %vm778_vm0, %v1686_v2, 0  ;;  %v1043_v20 = vrot.slane %v1041_v63, 2 }
  0x62   : > { %v750_v41 = vrot.slane %v748_v33, 1  ;;  %698 = vst.msk [vmem:[#allocation2 + $0x43] sm:$0xff] %vm676_vm8, %v673_v4  ;;  %vm546_vm11 = vcmp.ne.s32.totalorder %v506_v43, 0  ;;  %vm556_vm12 = vcmp.lt.s32.totalorder %v506_v43, 0  ;;  %v576_v46 = vadd.s32 10, %v506_v43  ;;  %1180 = vmatpush.bf16.msra.mxu1 %v1171_v12 }
  0x63   : > { %vm566_vm13 = vmand %vm556_vm12, %vm546_vm11  ;;  %v1032_v61 = vrot.slane %v1030_v54, 1  ;;  %v1035_v26 = vrot.slane %v1033_v9, 2  ;;  %v512_v21 = vand.u32 65535, %v2102_v18  ;;  %v1044_v23 = vor.u32 %v1043_v20, %v1040_v11 }
  0x64   : > { %v751_v5 = vsel %vm723_vm6, %v746_v32, %v750_v41  ;;  %v586_v44 = vsel %vm566_vm13, %v576_v46, %v506_v43  ;;  %v513_v25 = vshrl.u32 %v2102_v18, 16  ;;  %v754_v32 = vor.u32 %v752_v16, %v750_v41 }
  0x65   : > { %1660 = vmatmul.msk.bf16.vlgmr.msra.gmra.mxu2 %vm676_vm8, %v751_v5  ;;  %vm596_vm14 = vcmp.lt.s32.totalorder %v586_v44, 8  ;;  %v1036_v17 = vor.u32 %v1035_v26, %v1032_v61  ;;  %v516_v29 = vmul.u32 52428, %v512_v21  ;;  %v515_v42 = vmul.u32 52429, %v512_v21 }
  0x66   : > { %v2074_v45 = vsel %vm596_vm14, 1.0, %v1737_v0  ;;  %1259 = vmatpush.bf16.msra.mxu2 %v1250_v59  ;;  %v517_v43 = vmul.u32 52429, %v513_v25  ;;  %v2130_v44 = vpack.c.bf16 %v2034_v10, %v1981_v7  ;;  %v1348_v56 = vsel %vm778_vm0, %v1698_v55, 0  ;;  %v1704_v7 = vld [vmem:[%s2388_s3 + $0x20] sm:$0xf] }
  0x67   : > { %v674_v51 = vmul.f32 %v2074_v45, %v664_v50  ;;  %v1045_v38 = vsel %vm1028_vm15, %v1036_v17, %v1044_v23  ;;  %v519_v5 = vshll.u32 %v516_v29, 16  ;;  %v518_v50 = vmul.u32 52428, %v513_v25 }
  0x68   : > { %v521_v41 = vshll.u32 %v517_v43, 16  ;;  %v1047_v10 = vshrl.u32 %v2130_v44, 16  ;;  %v1050_v59 = vshll.u32 %v2130_v44, 16  ;;  %v1424_v61 = vsel %vm778_vm0, %v1704_v7, 0 }
  0x69   : > { %699 = vst.msk [vmem:[#allocation2 + $0x4b] sm:$0xff] %vm676_vm8, %v674_v51  ;;  %v2104_v14 = vld [vmem:[#allocation2 + $0x40] sm:$0xff]  ;;  %vm523_vm1 = vc.u32 %v515_v42, %v519_v5  ;;  %v525_v51 = vadd.s32 %v519_v5, %v515_v42  ;;  %v520_v15 = vshrl.u32 %v516_v29, 16  ;;  %1433 = vmatpush.bf16.msra.mxu0 %v1424_v61  ;;  %v522_v11 = vshrl.u32 %v517_v43, 16  ;;  %v627_v43 = vld [vmem:[%s1835_s26 + $0x48] sm:$0x3f] }
  0x6a   : > { %v524_v58 = vsel %vm523_vm1, 1, %v1736_v34  ;;  %v1049_v63 = vrot.slane %v1047_v10, 1  ;;  %v1052_v2 = vrot.slane %v1050_v59, 2  ;;  %v872_v29 = vrot.slane %v1961_v19, 1 }
  0x6b   : > { %v526_v9 = vadd.s32 %v524_v58, %v518_v50  ;;  %vm527_vm2 = vc.u32 %v525_v51, %v521_v41  ;;  %vm870_vm0 = vcmask 1046528   ;;  %v641_v5 = vmul.f32 %v1851_v47, %v627_v43 }
  0x6c   : > { %v528_v26 = vsel %vm527_vm2, 1, %v1736_v34  ;;  %v1053_v17 = vor.u32 %v1052_v2, %v1049_v63  ;;  %v954_v34 = vrot.slane %v2078_v37, 1  ;;  %v2162_v41 = vpack.c.bf16 %v2104_v14, %v2039_v13 }
  0x6d   : > { %v530_v12 = vadd.s32 %v528_v26, %v526_v9  ;;  %v655_v50 = vadd.f32 %v1864_v57, %v641_v5  ;;  %v874_v7 = vrot.slane %v1990_v40, 1  ;;  %v957_v10 = vrot.slane %v2130_v44, 1 }
  0x6e   : > { %1664 = vmatmul.msk.bf16.gmra.mxu1 %vm676_vm8, %v1961_v19  ;;  %v1054_v21 = vsel %vm1028_vm15, %v1044_v23, %v1053_v17  ;;  %v1056_v47 = vshrl.u32 %v2162_v41, 16  ;;  %vm1143_vm9 = vcmask 1045504   ;;  %v1145_v43 = vrot.slane %v2083_v52, 2 }
  0x6f   : > { %1681 = vmatmul.msk.bf16.vlgmr.msrb.gmra.mxu0 %vm676_vm8, %v1045_v38  ;;  %v531_v20 = vadd.s32 %v530_v12, %v520_v15  ;;  %v955_v38 = vrot.slane %v2083_v52, 1  ;;  %v875_v59 = vsel %vm870_vm0, %v872_v29, %v874_v7  ;;  %vm1298_vm10 = vsmask.f32 5376 }
  0x70   : > { %v2110_v22 = vld [vmem:[#allocation2 + $0x48] sm:$0xff]  ;;  %vm1396_vm11 = vcmask 1044480   ;;  %vm689_vm12 = vcmask 60416  }
  0x71   : > { %v2114_v3 = vpack.c.bf16 %v2110_v22, %v2104_v14  ;;  %v532_v25 = vadd.s32 %v531_v20, %v522_v11  ;;  %v956_v23 = vsel %vm870_vm0, %v954_v34, %v955_v38  ;;  %v958_v61 = vsel %vm870_vm0, %v955_v38, %v957_v10  ;;  %690 = vst.msk [vmem:[#allocation2 + $0x60] sm:$0xf] %vm689_vm12, %v1737_v0 }
  0x72   : > { %v1299_v38 = vrot.slane %v736_v31, 2 }
  0x73   : > { %v756_v4 = vshll.u32 %v2114_v3, 16  ;;  %v760_v39 = vshrl.u32 %v2114_v3, 16  ;;  %v533_v42 = vshrl.u32 %v532_v25, 3 }
  0x75   : > { %v758_v46 = vrot.slane %v756_v4, 1  ;;  %v534_v55 = vmul.u32 10, %v533_v42  ;;  %v1144_v42 = vrot.slane %v2078_v37, 2 }
  0x77   : > { %v762_v53 = vor.u32 %v760_v39, %v758_v46  ;;  %v759_v54 = vsel %vm723_vm6, %v754_v32, %v758_v46  ;;  %v871_v32 = vrot.slane %v2032_v8, 1  ;;  %v535_v8 = vsub.s32 %v2102_v18, %v534_v55 }
  0x78   : > { %1661 = vmatmul.msk.bf16.gmra.mxu2 %vm676_vm8, %v759_v54  ;;  %v665_v54 = vmax.f32 %v655_v50, 0.0  ;;  %v1146_v31 = vsel %vm1143_vm9, %v1144_v42, %v1145_v43 }
  0x79   : > { %1662 = vmatmul.msk.bf16.vlgmr.msra.gmra.mxu3 %vm676_vm8, %v762_v53  ;;  %v873_v46 = vsel %vm870_vm0, %v871_v32, %v872_v29  ;;  %vm547_vm6 = vcmp.ne.s32.totalorder %v535_v8, 0  ;;  %vm557_vm3 = vcmp.lt.s32.totalorder %v535_v8, 0  ;;  %v577_v51 = vadd.s32 10, %v535_v8 }
  0x7a   : > { %1357 = vmatpush.bf16.msra.mxu3 %v1348_v56  ;;  %v1059_v53 = vshll.u32 %v2162_v41, 16  ;;  %vm567_vm4 = vmand %vm557_vm3, %vm547_vm6  ;;  %v1058_v56 = vrot.slane %v1056_v47, 1  ;;  %v1303_v32 = vrot.slane %v740_v48, 3  ;;  %v1302_v29 = vrot.slane %v744_v60, 2 }
  0x7b   : > { %v587_v18 = vsel %vm567_vm4, %v577_v51, %v535_v8  ;;  %v1300_v60 = vrot.slane %v732_v27, 3  ;;  %v878_v51 = vrot.slane %v2114_v3, 1 }
  0x7c   : > { %v1061_v57 = vrot.slane %v1059_v53, 2  ;;  %vm597_vm5 = vcmp.lt.s32.totalorder %v587_v18, 8 }
  0x7d   : > { %v2169_v13 = vsel %vm597_vm5, 1.0, %v1737_v0  ;;  %v1301_v8 = vor.u32 %v1300_v60, %v1299_v38  ;;  %v1228_v0 = vrot.slane %v2114_v3, 2 }
  0x7e   : > { %1665 = vmatmul.msk.bf16.gmra.mxu1 %vm676_vm8, %v1990_v40  ;;  %v1062_v14 = vor.u32 %v1061_v57, %v1058_v56  ;;  %v675_v58 = vmul.f32 %v2169_v13, %v665_v54  ;;  %v1147_v54 = vrot.slane %v2130_v44, 2  ;;  %v1397_v56 = vrot.slane %v1961_v19, 3 }
  0x7f   : > { %1682 = vmatmul.msk.bf16.gmra.mxu0 %vm676_vm8, %v1054_v21  ;;  %v876_v21 = vrot.slane %v2049_v62, 1  ;;  %v1398_v57 = vrot.slane %v1990_v40, 3  ;;  %v1149_v44 = vrot.slane %v2162_v41, 2 }
  0x80   : > { %701 = vst.msk [vmem:[#allocation2 + $0x53] sm:$0x3f] %vm700_vm7, %v675_v58  ;;  %v1063_v9 = vsel %vm1028_vm15, %v1053_v17, %v1062_v14  ;;  %v1148_v18 = vsel %vm1143_vm9, %v1145_v43, %v1147_v54 }
  0x81   : > { %v877_v25 = vsel %vm870_vm0, %v874_v7, %v876_v21  ;;  %v879_v27 = vsel %vm870_vm0, %v876_v21, %v878_v51  ;;  %v1400_v7 = vrot.slane %v2049_v62, 3 }
  0x87   : > { %v712_v15 = vld [vmem:[#allocation2 + $0x50] sm:$0xff]  ;;  %v713_v55 = vld [vmem:[#allocation2 + $0x58] sm:$0xff] }
  0x88   : > { %1669 = vmatmul.msk.bf16.vlgmr.msrb.gmra.mxu2 %vm676_vm8, %v873_v46  ;;  %v2182_v26 = vpack.c.bf16 %v712_v15, %v2110_v22  ;;  %v959_v22 = vrot.slane %v2162_v41, 1  ;;  %v2206_v5 = vpack.c.bf16 %v713_v55, %v713_v55  ;;  %v2208_v48 = vpack.c.bf16 %v713_v55, %v712_v15 }
  0x89   : > { %1675 = vmatmul.msk.bf16.vlgmr.msrb.gmra.mxu3 %vm676_vm8, %v956_v23  ;;  %v1304_v46 = vor.u32 %v1303_v32, %v1302_v29 }
  0x8a   : > { %v1065_v63 = vshrl.u32 %v2182_v26, 16  ;;  %v1068_v2 = vshll.u32 %v2182_v26, 16  ;;  %v960_v34 = vsel %vm870_vm0, %v957_v10, %v959_v22  ;;  %v1074_v23 = vshll.u32 %v2206_v5, 16 }
  0x8b   : > { %v1305_v52 = vsel %vm1298_vm10, %v1301_v8, %v1304_v46  ;;  %v961_v47 = vrot.slane %v2182_v26, 1  ;;  %v1401_v10 = vsel %vm1396_vm11, %v1398_v57, %v1400_v7  ;;  %v1318_v32 = vshll.u32 %v2208_v48, 16 }
  0x8c   : > { %v1067_v11 = vrot.slane %v1065_v63, 1  ;;  %v1070_v12 = vrot.slane %v1068_v2, 2  ;;  %v1076_v37 = vrot.slane %v1074_v23, 2  ;;  %v1151_v2 = vrot.slane %v2182_v26, 2 }
  0x8d   : > { %v962_v53 = vsel %vm870_vm0, %v959_v22, %v961_v47  ;;  %v1310_v26 = vrot.slane %v760_v39, 2  ;;  %v1226_v22 = vrot.slane %v2049_v62, 2  ;;  %v1320_v38 = vrot.slane %v1318_v32, 3 }
  0x8e   : > { %1666 = vmatmul.msk.bf16.gmra.mxu1 %vm676_vm8, %v2049_v62  ;;  %v1071_v17 = vor.u32 %v1070_v12, %v1067_v11  ;;  %v1402_v11 = vrot.slane %v2114_v3, 3  ;;  %v1306_v12 = vrot.slane %v752_v16, 2  ;;  %v1311_v16 = vrot.slane %v756_v4, 3 }
  0x8f   : > { %1683 = vmatmul.msk.bf16.gmra.mxu0 %vm676_vm8, %v1063_v9  ;;  %v1150_v9 = vsel %vm1143_vm9, %v1147_v54, %v1149_v44  ;;  %v1153_v8 = vrot.slane %v2206_v5, 2 }
  0x90   : > { %v1072_v20 = vsel %vm1028_vm15, %v1062_v14, %v1071_v17  ;;  %v1077_v50 = vsel %vm1028_vm15, %v1071_v17, %v1076_v37  ;;  %v1399_v14 = vsel %vm1396_vm11, %v1397_v56, %v1398_v57  ;;  %v1152_v17 = vsel %vm1143_vm9, %v1149_v44, %v1151_v2 }
  0x91   : > { %v1403_v21 = vsel %vm1396_vm11, %v1400_v7, %v1402_v11  ;;  %v1312_v39 = vor.u32 %v1311_v16, %v1310_v26  ;;  %v1404_v37 = vrot.slane %v2208_v48, 3 }
  0x98   : > { %1670 = vmatmul.msk.bf16.gmra.mxu2 %vm676_vm8, %v875_v59  ;;  %v1223_v59 = vrot.slane %v1961_v19, 2  ;;  %v1307_v19 = vrot.slane %v748_v33, 3  ;;  %v1315_v33 = vshrl.u32 %v2208_v48, 16 }
  0x99   : > { %1676 = vmatmul.msk.bf16.gmra.mxu3 %vm676_vm8, %v958_v61  ;;  %v1224_v61 = vrot.slane %v1990_v40, 2 }
  0x9b   : > { %v1225_v63 = vsel %vm1143_vm9, %v1223_v59, %v1224_v61  ;;  %v1227_v42 = vsel %vm1143_vm9, %v1224_v61, %v1226_v22 }
  0x9e   : > { %1667 = vmatmul.msk.bf16.gmra.mxu1 %vm676_vm8, %v2114_v3 }
  0x9f   : > { %1684 = vmatmul.msk.bf16.gmra.mxu0 %vm676_vm8, %v1072_v20 }
  0xa8   : > { %1671 = vmatmul.msk.bf16.gmra.mxu2 %vm676_vm8, %v877_v25  ;;  %v1308_v25 = vor.u32 %v1307_v19, %v1306_v12 }
  0xa9   : > { %1677 = vmatmul.msk.bf16.gmra.mxu3 %vm676_vm8, %v960_v34  ;;  %v1317_v34 = vrot.slane %v1315_v33, 2 }
  0xaa   : > { %v1309_v43 = vsel %vm1298_vm10, %v1304_v46, %v1308_v25  ;;  %v1313_v44 = vsel %vm1298_vm10, %v1308_v25, %v1312_v39 }
  0xab   : > { %v1321_v62 = vor.u32 %v1320_v38, %v1317_v34 }
  0xad   : > { %v1322_v4 = vsel %vm1298_vm10, %v1312_v39, %v1321_v62 }
  0xae   : > { %1687 = vmatmul.msk.bf16.vlgmr.msra.gmra.mxu1 %vm676_vm8, %v1146_v31 }
  0xaf   : > { %1685 = vmatmul.msk.bf16.gmra.mxu0 %vm676_vm8, %v1077_v50  ;;  %v714_v50 = vld [vmem:[#allocation2 + $0x60] sm:$0xf] }
  0xb8   : > { %1672 = vmatmul.msk.bf16.gmra.mxu2 %vm676_vm8, %v879_v27  ;;  %v1218_v27 = vpack.c.bf16 %v714_v50, %v714_v50 }
  0xb9   : > { %1678 = vmatmul.msk.bf16.gmra.mxu3 %vm676_vm8, %v962_v53 }
  0xba   : > { %v1324_v54 = vshrl.u32 %v1218_v27, 16  ;;  %v1232_v34 = vrot.slane %v1218_v27, 2 }
  0xbc   : > { %v1326_v56 = vrot.slane %v1324_v54, 2 }
  0xbe   : > { %1688 = vmatmul.msk.bf16.gmra.mxu1 %vm676_vm8, %v1148_v18  ;;  %v1327_v18 = vshll.u32 %v1218_v27, 16 }
  0xbf   : > { %1705 = vmatmul.msk.bf16.vlgmr.msra.gmra.mxu0 %vm676_vm8, %v1399_v14  ;;  %v1229_v14 = vsel %vm1143_vm9, %v1226_v22, %v1228_v0 }
  0xc0   : > { %v1329_v57 = vrot.slane %v1327_v18, 3 }
  0xc8   : > { %1673 = vmatmul.msk.bf16.gmra.mxu2 %vm676_vm8, %v878_v51 }
  0xc9   : > { %1679 = vmatmul.msk.bf16.gmra.mxu3 %vm676_vm8, %v961_v47  ;;  %v1405_v47 = vsel %vm1396_vm11, %v1402_v11, %v1404_v37 }
  0xcb   : > { %v796_v58 = vpop.f32.mrf.mxu1 }
  0xce   : > { %1689 = vmatmul.msk.bf16.gmra.mxu1 %vm676_vm8, %v1150_v9  ;;  %v1330_v9 = vor.u32 %v1329_v57, %v1326_v56 }
  0xcf   : > { %1706 = vmatmul.msk.bf16.gmra.mxu0 %vm676_vm8, %v1401_v10 }
  0xd0   : > { %v1331_v10 = vsel %vm1298_vm10, %v1321_v62, %v1330_v9 }
  0xd3   : > { %v798_v15 = vpop.f32.mrf.mxu1 }
  0xd8   : > { %1693 = vmatmul.msk.bf16.vlgmr.msra.gmra.mxu2 %vm676_vm8, %v1225_v63  ;;  %v1406_v63 = vrot.slane %v1218_v27, 3 }
  0xd9   : > { %1699 = vmatmul.msk.bf16.vlgmr.msra.gmra.mxu3 %vm676_vm8, %v1305_v52  ;;  %v1154_v52 = vsel %vm1143_vm9, %v1151_v2, %v1153_v8 }
  0xda   : > { %v1407_v2 = vsel %vm1396_vm11, %v1404_v37, %v1406_v63 }
  0xdb   : > { %v838_v41 = vpop.f32.mrf.mxu1 }
  0xdc   : > { %v791_v40 = vpop.f32.mrf.mxu0 }
  0xdd   : > { %v2251_v20 = vadd.f32 %v838_v41, %v791_v40 }
  0xde   : > { %1690 = vmatmul.msk.bf16.gmra.mxu1 %vm676_vm8, %v1152_v17 }
  0xdf   : > { %1707 = vmatmul.msk.bf16.gmra.mxu0 %vm676_vm8, %v1403_v21 }
  0xe3   : > { %v840_v29 = vpop.f32.mrf.mxu1 }
  0xe4   : > { %v793_v55 = vpop.f32.mrf.mxu0 }
  0xe5   : > { %v841_v31 = vadd.f32 %v840_v29, %v793_v55 }
  0xe8   : > { %v801_v60 = vpop.f32.mrf.mxu2  ;;  %1694 = vmatmul.msk.bf16.gmra.mxu2 %vm676_vm8, %v1227_v42 }
  0xe9   : > { %1700 = vmatmul.msk.bf16.gmra.mxu3 %vm676_vm8, %v1309_v43 }
  0xeb   : > { %v843_v23 = vpop.f32.mrf.mxu1 }
  0xec   : > { %v844_v46 = vadd.f32 %v843_v23, %v796_v58  ;;  %v1105_v51 = vpop.f32.mrf.mxu0 }
  0xee   : > { %1691 = vmatmul.msk.bf16.gmra.mxu1 %vm676_vm8, %v1154_v52 }
  0xef   : > { %1708 = vmatmul.msk.bf16.gmra.mxu0 %vm676_vm8, %v1405_v47 }
  0xf0   : > { %v803_v53 = vpop.f32.mrf.mxu2 }
  0xf3   : > { %v845_v5 = vpop.f32.mrf.mxu1 }
  0xf4   : > { %v846_v58 = vadd.f32 %v845_v5, %v798_v15  ;;  %v1107_v7 = vpop.f32.mrf.mxu0  ;;  %v1230_v15 = vrot.slane %v2208_v48, 2 }
  0xf6   : > { %v1231_v17 = vsel %vm1143_vm9, %v1228_v0, %v1230_v15  ;;  %v1233_v62 = vsel %vm1143_vm9, %v1230_v15, %v1232_v34 }
  0xf8   : > { %1695 = vmatmul.msk.bf16.gmra.mxu2 %vm676_vm8, %v1229_v14 }
  0xf9   : > { %1701 = vmatmul.msk.bf16.gmra.mxu3 %vm676_vm8, %v1313_v44 }
  0xfb   : > { %v806_v3 = vpop.f32.mrf.mxu2  ;;  %v848_v61 = vpop.f32.mrf.mxu1 }
  0xfc   : > { %v811_v59 = vpop.f32.mrf.mxu3  ;;  %v849_v41 = vadd.f32 %v848_v61, %v801_v60  ;;  %v1110_v11 = vpop.f32.mrf.mxu0 }
  0xff   : > { %1709 = vmatmul.msk.bf16.gmra.mxu0 %vm676_vm8, %v1407_v2 }
 0x103   : > { %v808_v12 = vpop.f32.mrf.mxu2  ;;  %v850_v40 = vpop.f32.mrf.mxu1 }
 0x104   : > { %v813_v19 = vpop.f32.mrf.mxu3  ;;  %v851_v21 = vadd.f32 %v850_v40, %v803_v53  ;;  %v1112_v26 = vpop.f32.mrf.mxu0 }
 0x108   : > { %1696 = vmatmul.msk.bf16.gmra.mxu2 %vm676_vm8, %v1231_v17 }
 0x109   : > { %1702 = vmatmul.msk.bf16.gmra.mxu3 %vm676_vm8, %v1322_v4 }
 0x10b   : > { %v907_v22 = vpop.f32.mrf.mxu2  ;;  %v853_v33 = vpop.f32.mrf.mxu1 }
 0x10c   : > { %v990_v25 = vpop.f32.mrf.mxu3  ;;  %v932_v16 = vadd.f32 %v907_v22, %v2251_v20  ;;  %v854_v32 = vadd.f32 %v853_v33, %v806_v3  ;;  %v1115_v38 = vpop.f32.mrf.mxu0 }
 0x10e   : > { %v1015_v48 = vadd.f32 %v990_v25, %v932_v16 }
 0x110   : > { %v2288_v29 = vadd.f32 %v1105_v51, %v1015_v48 }
 0x113   : > { %v909_v42 = vpop.f32.mrf.mxu2  ;;  %v855_v55 = vpop.f32.mrf.mxu1 }
 0x114   : > { %v992_v43 = vpop.f32.mrf.mxu3  ;;  %v933_v39 = vadd.f32 %v909_v42, %v841_v31  ;;  %v856_v60 = vadd.f32 %v855_v55, %v808_v12  ;;  %v1117_v8 = vpop.f32.mrf.mxu0 }
 0x116   : > { %v1016_v23 = vadd.f32 %v992_v43, %v933_v39 }
 0x118   : > { %1697 = vmatmul.msk.bf16.gmra.mxu2 %vm676_vm8, %v1233_v62  ;;  %v2292_v4 = vadd.f32 %v1107_v7, %v1016_v23 }
 0x119   : > { %1703 = vmatmul.msk.bf16.gmra.mxu3 %vm676_vm8, %v1331_v10 }
 0x11b   : > { %v912_v20 = vpop.f32.mrf.mxu2  ;;  %v858_v50 = vpop.f32.mrf.mxu1 }
 0x11c   : > { %v995_v37 = vpop.f32.mrf.mxu3  ;;  %v934_v52 = vadd.f32 %v912_v20, %v844_v46  ;;  %v859_v51 = vadd.f32 %v858_v50, %v811_v59  ;;  %v1120_v18 = vpop.f32.mrf.mxu0 }
 0x11e   : > { %v1017_v47 = vadd.f32 %v995_v37, %v934_v52 }
 0x120   : > { %v2295_v27 = vadd.f32 %v1110_v11, %v1017_v47 }
 0x123   : > { %v914_v31 = vpop.f32.mrf.mxu2  ;;  %v860_v54 = vpop.f32.mrf.mxu1 }
 0x124   : > { %v997_v53 = vpop.f32.mrf.mxu3  ;;  %v935_v0 = vadd.f32 %v914_v31, %v846_v58  ;;  %v861_v5 = vadd.f32 %v860_v54, %v813_v19  ;;  %v1122_v10 = vpop.f32.mrf.mxu0 }
 0x126   : > { %v1018_v56 = vadd.f32 %v997_v53, %v935_v0 }
 0x128   : > { %v2297_v57 = vadd.f32 %v1112_v26, %v1018_v56 }
 0x12b   : > { %v917_v14 = vpop.f32.mrf.mxu2  ;;  %v1182_v25 = vpop.f32.mrf.mxu1 }
 0x12c   : > { %v1000_v44 = vpop.f32.mrf.mxu3  ;;  %v936_v9 = vadd.f32 %v917_v14, %v849_v41  ;;  %v1125_v58 = vpop.f32.mrf.mxu0  ;;  %v1207_v37 = vadd.f32 %v1182_v25, %v2288_v29 }
 0x12e   : > { %v1019_v7 = vadd.f32 %v1000_v44, %v936_v9 }
 0x130   : > { %v2299_v46 = vadd.f32 %v1115_v38, %v1019_v7 }
 0x133   : > { %v919_v3 = vpop.f32.mrf.mxu2  ;;  %v1184_v43 = vpop.f32.mrf.mxu1 }
 0x134   : > { %v1002_v59 = vpop.f32.mrf.mxu3  ;;  %v937_v61 = vadd.f32 %v919_v3, %v851_v21  ;;  %v1127_v26 = vpop.f32.mrf.mxu0  ;;  %v1208_v0 = vadd.f32 %v1184_v43, %v2292_v4 }
 0x136   : > { %v1020_v63 = vadd.f32 %v1002_v59, %v937_v61 }
 0x138   : > { %v2301_v2 = vadd.f32 %v1117_v8, %v1020_v63 }
 0x13b   : > { %v922_v11 = vpop.f32.mrf.mxu2 }
 0x13c   : > { %v1005_v15 = vpop.f32.mrf.mxu3  ;;  %v938_v12 = vadd.f32 %v922_v11, %v854_v32  ;;  %v1435_v38 = vpop.f32.mrf.mxu0 }
 0x13e   : > { %v1021_v19 = vadd.f32 %v1005_v15, %v938_v12 }
 0x140   : > { %v2303_v40 = vadd.f32 %v1120_v18, %v1021_v19 }
 0x143   : > { %v924_v17 = vpop.f32.mrf.mxu2 }
 0x144   : > { %v1007_v41 = vpop.f32.mrf.mxu3  ;;  %v939_v22 = vadd.f32 %v924_v17, %v856_v60  ;;  %v1437_v20 = vpop.f32.mrf.mxu0 }
 0x145   : > { %v1187_v60 = vpop.f32.mrf.mxu1 }
 0x146   : > { %v1022_v16 = vadd.f32 %v1007_v41, %v939_v22  ;;  %v1209_v9 = vadd.f32 %v1187_v60, %v2295_v27 }
 0x148   : > { %v2305_v33 = vadd.f32 %v1122_v10, %v1022_v16 }
 0x14b   : > { %v927_v48 = vpop.f32.mrf.mxu2 }
 0x14c   : > { %v1010_v21 = vpop.f32.mrf.mxu3  ;;  %v940_v34 = vadd.f32 %v927_v48, %v859_v51  ;;  %v1440_v53 = vpop.f32.mrf.mxu0 }
 0x14d   : > { %v1189_v54 = vpop.f32.mrf.mxu1 }
 0x14e   : > { %v1023_v42 = vadd.f32 %v1010_v21, %v940_v34 }
 0x150   : > { %v2307_v39 = vadd.f32 %v1125_v58, %v1023_v42 }
 0x153   : > { %v929_v32 = vpop.f32.mrf.mxu2 }
 0x154   : > { %v1012_v55 = vpop.f32.mrf.mxu3  ;;  %v941_v62 = vadd.f32 %v929_v32, %v861_v5  ;;  %v1442_v4 = vpop.f32.mrf.mxu0 }
 0x155   : > { %v1192_v15 = vpop.f32.mrf.mxu1 }
 0x156   : > { %v1024_v23 = vadd.f32 %v1012_v55, %v941_v62 }
 0x158   : > { %v2309_v8 = vadd.f32 %v1127_v26, %v1024_v23  ;;  %v1210_v26 = vadd.f32 %v1189_v54, %v2297_v57  ;;  %v1211_v57 = vadd.f32 %v1192_v15, %v2299_v46 }
 0x15b   : > { %v1261_v52 = vpop.f32.mrf.mxu2 }
 0x15c   : > { %v1359_v50 = vpop.f32.mrf.mxu3  ;;  %v1286_v47 = vadd.f32 %v1261_v52, %v1207_v37 }
 0x15d   : > { %v1194_v55 = vpop.f32.mrf.mxu1 }
 0x15e   : > { %v1384_v51 = vadd.f32 %v1359_v50, %v1286_v47  ;;  %v1212_v46 = vadd.f32 %v1194_v55, %v2301_v2 }
 0x160   : > { %v1460_v31 = vadd.f32 %v1435_v38, %v1384_v51  ;;  %v1445_v38 = vpop.f32.mrf.mxu0 }
 0x162   : > { %1543 = vst.msk [vmem:[%s2317_s27] sm:$0xff] %vm676_vm8, %v1460_v31  ;;  %v1470_v56 = vmul.f32 %v1879_v1, %v1460_v31 }
 0x163   : > { %v1263_v29 = vpop.f32.mrf.mxu2 }
 0x164   : > { %v1361_v18 = vpop.f32.mrf.mxu3  ;;  %v1287_v5 = vadd.f32 %v1263_v29, %v1208_v0  ;;  %v1507_v7 = vmul.f32 %v1470_v56, %v1460_v31  ;;  %v1480_v59 = vsel %vm676_vm8, %v1470_v56, 0.0 }
 0x165   : > { %v1197_v54 = vpop.f32.mrf.mxu1 }
 0x166   : > { %v1385_v14 = vadd.f32 %v1361_v18, %v1287_v5  ;;  %v1517_v12 = vsel %vm676_vm8, %v1507_v7, 0.0  ;;  %v1213_v2 = vadd.f32 %v1197_v54, %v2303_v40 }
 0x168   : > { %v1461_v44 = vadd.f32 %v1437_v20, %v1385_v14 }
 0x16a   : > { %v1471_v10 = vmul.f32 %v1894_v6, %v1461_v44  ;;  %1544 = vst.msk [vmem:[%s2317_s27 + $0x8] sm:$0xff] %vm676_vm8, %v1461_v44 }
 0x16b   : > { %v1266_v3 = vpop.f32.mrf.mxu2 }
 0x16c   : > { %v1481_v61 = vsel %vm676_vm8, %v1471_v10, 0.0  ;;  %v1508_v63 = vmul.f32 %v1471_v10, %v1461_v44  ;;  %v1364_v58 = vpop.f32.mrf.mxu3  ;;  %v1288_v11 = vadd.f32 %v1266_v3, %v1209_v9 }
 0x16d   : > { %v1482_v1 = vadd.f32 %v1481_v61, %v1480_v59  ;;  %v1199_v59 = vpop.f32.mrf.mxu1 }
 0x16e   : > { %v1518_v27 = vsel %vm676_vm8, %v1508_v63, 0.0  ;;  %v1386_v19 = vadd.f32 %v1364_v58, %v1288_v11  ;;  %v1214_v40 = vadd.f32 %v1199_v59, %v2305_v33 }
 0x16f   : > { %v1519_v6 = vadd.f32 %v1518_v27, %v1517_v12 }
 0x170   : > { %v1462_v17 = vadd.f32 %v1440_v53, %v1386_v19  ;;  %v1447_v53 = vpop.f32.mrf.mxu0 }
 0x172   : > { %v1472_v41 = vmul.f32 %v1903_v24, %v1462_v17  ;;  %1545 = vst.msk [vmem:[%s2317_s27 + $0x10] sm:$0xff] %vm676_vm8, %v1462_v17 }
 0x173   : > { %v1268_v22 = vpop.f32.mrf.mxu2 }
 0x174   : > { %v1483_v25 = vsel %vm676_vm8, %v1472_v41, 0.0  ;;  %v1509_v16 = vmul.f32 %v1472_v41, %v1462_v17  ;;  %v1366_v48 = vpop.f32.mrf.mxu3  ;;  %v1289_v21 = vadd.f32 %v1268_v22, %v1210_v26 }
 0x175   : > { %v1484_v34 = vadd.f32 %v1483_v25, %v1482_v1 }
 0x176   : > { %v1520_v42 = vsel %vm676_vm8, %v1509_v16, 0.0  ;;  %v1387_v43 = vadd.f32 %v1366_v48, %v1289_v21  ;;  %v1202_v48 = vpop.f32.mrf.mxu1 }
 0x177   : > { %v1521_v32 = vadd.f32 %v1520_v42, %v1519_v6  ;;  %v1215_v33 = vadd.f32 %v1202_v48, %v2307_v39 }
 0x178   : > { %v1463_v62 = vadd.f32 %v1442_v4, %v1387_v43  ;;  %v1450_v4 = vpop.f32.mrf.mxu0 }
 0x17a   : > { %v1473_v24 = vmul.f32 %v1912_v30, %v1463_v62  ;;  %1546 = vst.msk [vmem:[%s2317_s27 + $0x18] sm:$0xff] %vm676_vm8, %v1463_v62 }
 0x17b   : > { %v1271_v23 = vpop.f32.mrf.mxu2 }
 0x17c   : > { %v1485_v20 = vsel %vm676_vm8, %v1473_v24, 0.0  ;;  %v1510_v60 = vmul.f32 %v1473_v24, %v1463_v62  ;;  %v1369_v37 = vpop.f32.mrf.mxu3  ;;  %v1290_v52 = vadd.f32 %v1271_v23, %v1211_v57 }
 0x17d   : > { %v1486_v50 = vadd.f32 %v1485_v20, %v1484_v34 }
 0x17e   : > { %v1522_v47 = vsel %vm676_vm8, %v1510_v60, 0.0  ;;  %v1388_v51 = vadd.f32 %v1369_v37, %v1290_v52  ;;  %v1204_v52 = vpop.f32.mrf.mxu1 }
 0x17f   : > { %v1523_v31 = vadd.f32 %v1522_v47, %v1521_v32 }
 0x180   : > { %v1464_v0 = vadd.f32 %v1445_v38, %v1388_v51 }
 0x182   : > { %v1474_v30 = vmul.f32 %v1931_v49, %v1464_v0  ;;  %1547 = vst.msk [vmem:[%s2317_s27 + $0x20] sm:$0xff] %vm676_vm8, %v1464_v0 }
 0x183   : > { %v1273_v29 = vpop.f32.mrf.mxu2 }
 0x184   : > { %v1487_v18 = vsel %vm676_vm8, %v1474_v30, 0.0  ;;  %v1511_v5 = vmul.f32 %v1474_v30, %v1464_v0  ;;  %v1371_v56 = vpop.f32.mrf.mxu3  ;;  %v1291_v14 = vadd.f32 %v1273_v29, %v1212_v46 }
 0x185   : > { %v1488_v44 = vadd.f32 %v1487_v18, %v1486_v50 }
 0x186   : > { %v1524_v9 = vsel %vm676_vm8, %v1511_v5, 0.0  ;;  %v1389_v7 = vadd.f32 %v1371_v56, %v1291_v14 }
 0x187   : > { %v1525_v10 = vadd.f32 %v1524_v9, %v1523_v31 }
 0x188   : > { %v1465_v3 = vadd.f32 %v1447_v53, %v1389_v7 }
 0x18a   : > { %v1475_v49 = vmul.f32 %v2015_v28, %v1465_v3  ;;  %1548 = vst.msk [vmem:[%s2317_s27 + $0x28] sm:$0xff] %vm676_vm8, %v1465_v3  ;;  %v1452_v28 = vpop.f32.mrf.mxu0 }
 0x18b   : > { %v1276_v61 = vpop.f32.mrf.mxu2 }
 0x18c   : > { %v1489_v63 = vsel %vm676_vm8, %v1475_v49, 0.0  ;;  %v1512_v58 = vmul.f32 %v1475_v49, %v1465_v3  ;;  %v1374_v11 = vpop.f32.mrf.mxu3  ;;  %v1292_v1 = vadd.f32 %v1276_v61, %v1213_v2 }
 0x18d   : > { %v1490_v15 = vadd.f32 %v1489_v63, %v1488_v44 }
 0x18e   : > { %v1526_v12 = vsel %vm676_vm8, %v1512_v58, 0.0  ;;  %v1390_v27 = vadd.f32 %v1374_v11, %v1292_v1 }
 0x18f   : > { %v1527_v19 = vadd.f32 %v1526_v12, %v1525_v10 }
 0x190   : > { %v1466_v6 = vadd.f32 %v1450_v4, %v1390_v27 }
 0x192   : > { %v1476_v17 = vmul.f32 %v2019_v35, %v1466_v6  ;;  %1549 = vst.msk [vmem:[%s2317_s27 + $0x30] sm:$0xff] %vm676_vm8, %v1466_v6  ;;  %v1455_v20 = vpop.f32.mrf.mxu0 }
 0x193   : > { %v1278_v26 = vpop.f32.mrf.mxu2 }
 0x194   : > { %v1491_v41 = vsel %vm676_vm8, %v1476_v17, 0.0  ;;  %v1513_v22 = vmul.f32 %v1476_v17, %v1466_v6  ;;  %v1376_v25 = vpop.f32.mrf.mxu3  ;;  %v1293_v16 = vadd.f32 %v1278_v26, %v1214_v40 }
 0x195   : > { %v1492_v21 = vadd.f32 %v1491_v41, %v1490_v15 }
 0x196   : > { %v1528_v34 = vsel %vm676_vm8, %v1513_v22, 0.0  ;;  %v1391_v38 = vadd.f32 %v1376_v25, %v1293_v16 }
 0x197   : > { %v1529_v42 = vadd.f32 %v1528_v34, %v1527_v19 }
 0x198   : > { %v1467_v43 = vadd.f32 %v1452_v28, %v1391_v38 }
 0x19a   : > { %v1477_v35 = vmul.f32 %v2058_v36, %v1467_v43  ;;  %1550 = vst.msk [vmem:[%s2317_s27 + $0x38] sm:$0xff] %vm676_vm8, %v1467_v43  ;;  %v1216_v36 = vadd.f32 %v1204_v52, %v2309_v8  ;;  %v1457_v5 = vpop.f32.mrf.mxu0 }
 0x19b   : > { %v1281_v32 = vpop.f32.mrf.mxu2 }
 0x19c   : > { %v1493_v55 = vsel %vm676_vm8, %v1477_v35, 0.0  ;;  %v1514_v62 = vmul.f32 %v1477_v35, %v1467_v43  ;;  %v1379_v57 = vpop.f32.mrf.mxu3  ;;  %v1294_v24 = vadd.f32 %v1281_v32, %v1215_v33 }
 0x19d   : > { %v1494_v23 = vadd.f32 %v1493_v55, %v1492_v21 }
 0x19e   : > { %v1530_v60 = vsel %vm676_vm8, %v1514_v62, 0.0  ;;  %v1392_v37 = vadd.f32 %v1379_v57, %v1294_v24 }
 0x19f   : > { %v1531_v50 = vadd.f32 %v1530_v60, %v1529_v42 }
 0x1a0   : > { %v1468_v47 = vadd.f32 %v1455_v20, %v1392_v37 }
 0x1a2   : > { %v1478_v39 = vmul.f32 %v2074_v45, %v1468_v47  ;;  %1551 = vst.msk [vmem:[%s2317_s27 + $0x40] sm:$0xff] %vm676_vm8, %v1468_v47 }
 0x1a3   : > { %v1283_v51 = vpop.f32.mrf.mxu2 }
 0x1a4   : > { %v1495_v31 = vsel %vm676_vm8, %v1478_v39, 0.0  ;;  %v1515_v53 = vmul.f32 %v1478_v39, %v1468_v47  ;;  %v1295_v0 = vadd.f32 %v1283_v51, %v1216_v36  ;;  %v1381_v46 = vpop.f32.mrf.mxu3 }
 0x1a5   : > { %v1496_v54 = vadd.f32 %v1495_v31, %v1494_v23 }
 0x1a6   : > { %v1532_v30 = vsel %vm676_vm8, %v1515_v53, 0.0  ;;  %v1393_v29 = vadd.f32 %v1381_v46, %v1295_v0  ;;  %vm1505_vm8 = vcmask 57344  }
 0x1a7   : > { %v1533_v18 = vadd.f32 %v1532_v30, %v1531_v50 }
 0x1a8   : > { %v1469_v56 = vadd.f32 %v1457_v5, %v1393_v29 }
 0x1aa   : > { %v1479_v8 = vmul.f32 %v2169_v13, %v1469_v56  ;;  %1552 = vst.msk [vmem:[%s2317_s27 + $0x48] sm:$0x3f] %vm700_vm7, %v1469_v56 }
 0x1ac   : > { %v1497_v45 = vsel %vm700_vm7, %v1479_v8, 0.0  ;;  %v1516_v14 = vmul.f32 %v1479_v8, %v1469_v56 }
 0x1ad   : > { %v1498_v44 = vadd.f32 %v1497_v45, %v1496_v54 }
 0x1ae   : > { %v1534_v9 = vsel %vm700_vm7, %v1516_v14, 0.0 }
 0x1af   : > { %v1499_v7 = vrot.slane %v1498_v44, 4  ;;  %v1535_v10 = vadd.f32 %v1534_v9, %v1533_v18 }
 0x1b1   : > { %v1500_v3 = vadd.f32 %v1499_v7, %v1498_v44  ;;  %v1536_v4 = vrot.slane %v1535_v10, 4 }
 0x1b3   : > { %v1501_v2 = vrot.slane %v1500_v3, 2  ;;  %v1537_v49 = vadd.f32 %v1536_v4, %v1535_v10 }
 0x1b5   : > { %v1502_v59 = vadd.f32 %v1501_v2, %v1500_v3  ;;  %v1538_v61 = vrot.slane %v1537_v49, 2 }
 0x1b7   : > { %v1503_v63 = vrot.slane %v1502_v59, 1  ;;  %v1539_v58 = vadd.f32 %v1538_v61, %v1537_v49 }
 0x1b9   : > { %v1504_v13 = vadd.f32 %v1503_v63, %v1502_v59  ;;  %v1540_v11 = vrot.slane %v1539_v58, 1 }
 0x1bb   : > { %1506 = vst.msk [vmem:[%s235_s30] sm:$0x1] %vm1505_vm8, %v1504_v13  ;;  %v1541_v1 = vadd.f32 %v1540_v11, %v1539_v58 }
 0x1bd   : > { %1542 = vst.msk [vmem:[%s235_s30 + $0x1] sm:$0x1] %vm1505_vm8, %v1541_v1 }
 0x1be PF: > { %s16_s18 = sadd.s32 1, %s1734_s18  }
 0x1bf   : > { %p13_p4 = scmp.ge.s32.totalorder %s16_s18, 4  }
 0x1c1   :  { %15 = sbr.rel (!%p13_p4) target bundleno = 1 (0x1), region = 86 }

</bundles_post_ra>
